<compile_context>
chip_gen: v5e
topology: v5e:2x2
jax: 0.10.0
libtpu: 0.0.40
codegen_flags: <defaults>
</compile_context>

<pallas_src>
import jax
import jax.numpy as jnp
from jax.experimental import pallas as pl
from jax.experimental.pallas import tpu as pltpu

# ---------------- model hyper-parameters (match the PyTorch module) ----------
EMB_DIM   = 256
D_FFN     = 1024
NUM_HEADS = 8
HEAD_DIM  = EMB_DIM // NUM_HEADS
LN_EPS    = 1e-5


def _layer_norm(x, gamma, beta, eps=LN_EPS):
    mu  = jnp.mean(x, axis=-1, keepdims=True)
    xc  = x - mu                                   # centered once
    var = jnp.mean(xc * xc, axis=-1, keepdims=True)
    return xc * (gamma * jax.lax.rsqrt(var + eps)) + beta


def _decoder_layer_kernel(emb1_ref, emb2_ref,
                          wq_ref, wk_ref, wv_ref, wo_ref,
                          bq_ref, bk_ref, bv_ref, bo_ref,
                          g1_ref, be1_ref,
                          w1_ref, b1_ref, w2_ref, b2_ref,
                          g2_ref, be2_ref,
                          out_ref):
    Bt, Lq, E = emb1_ref.shape
    _,  Lk, _ = emb2_ref.shape
    H, D = NUM_HEADS, HEAD_DIM
    Rq, Rk = Bt * Lq, Bt * Lk
    bf16 = jnp.bfloat16

    x = emb1_ref[...].reshape(Rq, E)          # f32, kept for residual / LN
    m = emb2_ref[...].reshape(Rk, E)

    # ---- fused QKV projections over every row of the batch block ------------
    # bf16 operands on the MXU, f32 accumulation.  1/sqrt(head_dim) is already
    # folded into (wq, bq) by the wrapper -> no extra scaling multiply here.
    q = jnp.dot(x.astype(bf16), wq_ref[...], preferred_element_type=jnp.float32) + bq_ref[...]
    k = jnp.dot(m.astype(bf16), wk_ref[...], preferred_element_type=jnp.float32) + bk_ref[...]
    v = jnp.dot(m.astype(bf16), wv_ref[...], preferred_element_type=jnp.float32) + bv_ref[...]

    # ---- head split: one bf16 cast per tensor, one slice+stack pass, then ----
    # leading-dim reshapes to a single (H*Bt) batch axis for the batched MXU ops
    def to_batched_heads(t, L):               # (Bt*L, E) f32 -> (H*Bt, L, D) bf16
        tb = t.astype(bf16)
        th = jnp.stack([tb[:, h * D:(h + 1) * D] for h in range(H)], axis=0)  # (H, Bt*L, D)
        return th.reshape(H, Bt, L, D).reshape(H * Bt, L, D)

    qg = to_batched_heads(q, Lq)              # (G, Lq, D)
    kg = to_batched_heads(k, Lk)              # (G, Lk, D)
    vg = to_batched_heads(v, Lk)

    # ---- attention: ONE batched score matmul, ONE softmax, ONE P@V matmul ----
    # over all (head, batch) pairs in the block -- no per-batch Python loop,
    # no concat of per-batch results.
    s = jnp.einsum("gqd,gkd->gqk", qg, kg,
                   preferred_element_type=jnp.float32)         # (G, Lq, Lk) f32
    s = s - jnp.max(s, axis=-1, keepdims=True)                 # stable softmax
    p = jnp.exp(s)
    p = p * pl.reciprocal(jnp.sum(p, axis=-1, keepdims=True), approx=True)
    og = jnp.einsum("gqk,gkd->gqd", p.astype(bf16), vg,
                    preferred_element_type=jnp.float32)        # (G, Lq, D)

    # ---- merge heads (single bf16 lane concat) + fused K=256 output proj -----
    # No (H, Rq, E) f32 intermediate, no per-head add chain: one matmul with a
    # full 256-deep contraction against the original (E, E) wo.
    oh = og.astype(bf16).reshape(H, Bt, Lq, D).reshape(H, Rq, D)
    o_cat = jnp.concatenate([oh[h] for h in range(H)], axis=-1)          # (Rq, E) bf16
    attn = jnp.dot(o_cat, wo_ref[...], preferred_element_type=jnp.float32) + bo_ref[...]

    # ---- residual + LayerNorm 1 (dropouts are identity in eval mode) ---------
    y = _layer_norm(attn + x, g1_ref[...], be1_ref[...])

    # ---- feed-forward network -------------------------------------------------
    h1 = jnp.dot(y.astype(bf16), w1_ref[...], preferred_element_type=jnp.float32) + b1_ref[...]
    h1 = jnp.maximum(h1, 0.0)                                   # ReLU
    h2 = jnp.dot(h1.astype(bf16), w2_ref[...], preferred_element_type=jnp.float32) + b2_ref[...]

    # ---- residual + LayerNorm 2 -----------------------------------------------
    z = _layer_norm(y + h2, g2_ref[...], be2_ref[...])
    out_ref[...] = z.reshape(Bt, Lq, E).astype(out_ref.dtype)


def _pick_batch_block(B, Lq, target_rows):
    """Batch elements per grid step.

    Aims the row tile Bt*Lq at ~target_rows (amortizes the ~0.35us per-step
    pipeline overhead), but caps Bt at B//2 so the grid always has >=2
    parallel steps and both v7x TensorCores get work.  Bt need NOT divide B:
    the wrapper zero-pads the batch and slices the output back.
    """
    bt = max(1, min(B, target_rows // max(Lq, 1)))
    if B >= 2:
        bt = min(bt, max(1, B // 2))
    return max(1, bt)


def cross_attention_decoder_layer(emb1, emb2, params, *, target_rows=512):
    """emb1: (B, Lq, E) query stream; emb2: (B, Lk, E) key/value stream (f32)."""
    B, Lq, E = emb1.shape
    Bk, Lk, Ek = emb2.shape
    assert E == EMB_DIM and Ek == EMB_DIM and Bk == B

    Bt = _pick_batch_block(B, Lq, target_rows)
    num_blocks = pl.cdiv(B, Bt)
    B_pad = num_blocks * Bt
    if B_pad != B:                            # awkward B: zero-pad, slice after
        emb1 = jnp.pad(emb1, ((0, B_pad - B), (0, 0), (0, 0)))
        emb2 = jnp.pad(emb2, ((0, B_pad - B), (0, 0), (0, 0)))

    bf16 = jnp.bfloat16
    scale = 1.0 / (HEAD_DIM ** 0.5)
    # bf16 MXU operands; fold the attention scale into wq/bq (exact, free).
    wq = (params["wq"] * scale).astype(bf16)
    bq = params["bq"] * scale
    wk = params["wk"].astype(bf16)
    wv = params["wv"].astype(bf16)
    wo = params["wo"].astype(bf16)            # full (E, E), used after head merge
    w1 = params["w1"].astype(bf16)
    w2 = params["w2"].astype(bf16)

    def rep(shape):   # parameter replicated across the grid
        # TODO(synk): on v7x, pipeline_mode=pl.Buffered(1) here would drop the
        # duplicated weight buffers when pushing the row tile toward ~1024.
        return pl.BlockSpec(shape, lambda i: (0,) * len(shape))

    in_specs = [
        pl.BlockSpec((Bt, Lq, E), lambda i: (i, 0, 0)),      # emb1
        pl.BlockSpec((Bt, Lk, E), lambda i: (i, 0, 0)),      # emb2
        rep((E, E)), rep((E, E)), rep((E, E)), rep((E, E)),  # wq wk wv wo
        rep((1, E)), rep((1, E)), rep((1, E)), rep((1, E)),  # bq bk bv bo
        rep((1, E)), rep((1, E)),                            # ln1 gamma / beta
        rep((E, D_FFN)), rep((1, D_FFN)),                    # w1 b1
        rep((D_FFN, E)), rep((1, E)),                        # w2 b2
        rep((1, E)), rep((1, E)),                            # ln2 gamma / beta
    ]

    out = pl.pallas_call(
        _decoder_layer_kernel,
        out_shape=jax.ShapeDtypeStruct((B_pad, Lq, E), emb1.dtype),
        grid_spec=pltpu.PrefetchScalarGridSpec(
            num_scalar_prefetch=0,
            grid=(num_blocks,),
            in_specs=in_specs,
            out_specs=pl.BlockSpec((Bt, Lq, E), lambda i: (i, 0, 0)),
        ),
        compiler_params=pltpu.CompilerParams(
            dimension_semantics=("parallel",),
            # Explicit scoped-VMEM budget: ample for the ~512-row tile + bf16
            # weights, and safely under v7x's 64 MiB physical VMEM.
            vmem_limit_bytes=48 * 1024 * 1024,
        ),
    )(emb1, emb2,
      wq, wk, wv, wo,
      bq, params["bk"], params["bv"], params["bo"],
      params["g1"], params["be1"],
      w1, params["b1"], w2, params["b2"],
      params["g2"], params["be2"])

    return out[:B] if B_pad != B else out


# ---------------- pure-JAX reference (f32, for correctness check) ------------
def reference_forward(emb1, emb2, p):
    B, Lq, E = emb1.shape
    Lk = emb2.shape[1]
    q = emb1 @ p["wq"] + p["bq"]
    k = emb2 @ p["wk"] + p["bk"]
    v = emb2 @ p["wv"] + p["bv"]
    q = q.reshape(B, Lq, NUM_HEADS, HEAD_DIM).transpose(0, 2, 1, 3)
    k = k.reshape(B, Lk, NUM_HEADS, HEAD_DIM).transpose(0, 2, 1, 3)
    v = v.reshape(B, Lk, NUM_HEADS, HEAD_DIM).transpose(0, 2, 1, 3)
    s = jnp.einsum("bhqd,bhkd->bhqk", q, k) / (HEAD_DIM ** 0.5)
    pw = jax.nn.softmax(s, axis=-1)
    a = jnp.einsum("bhqk,bhkd->bhqd", pw, v).transpose(0, 2, 1, 3).reshape(B, Lq, E)
    a = a @ p["wo"] + p["bo"]
    y = _layer_norm(a + emb1, p["g1"], p["be1"])
    h = jnp.maximum(y @ p["w1"] + p["b1"], 0.0) @ p["w2"] + p["b2"]
    return _layer_norm(y + h, p["g2"], p["be2"])


def init_params(key):
    ks = jax.random.split(key, 8)
    def u(k, shape, fan_in):
        bound = 1.0 / (fan_in ** 0.5)
        return jax.random.uniform(k, shape, jnp.float32, -bound, bound)
    E, F = EMB_DIM, D_FFN
    # weights stored (in, out) so the math is x @ W + b
    return {
        "wq": u(ks[0], (E, E), E), "wk": u(ks[1], (E, E), E), "wv": u(ks[2], (E, E), E),
        "wo": u(ks[3], (E, E), E),
        "bq": jnp.zeros((1, E), jnp.float32), "bk": jnp.zeros((1, E), jnp.float32),
        "bv": jnp.zeros((1, E), jnp.float32), "bo": jnp.zeros((1, E), jnp.float32),
        "g1": jnp.ones((1, E), jnp.float32), "be1": jnp.zeros((1, E), jnp.float32),
        "w1": u(ks[4], (E, F), E), "b1": u(ks[5], (1, F), E),
        "w2": u(ks[6], (F, E), F), "b2": u(ks[7], (1, E), F),
        "g2": jnp.ones((1, E), jnp.float32), "be2": jnp.zeros((1, E), jnp.float32),
    }


if __name__ == "__main__":
    key = jax.random.PRNGKey(0)
    kp, k1, k2, k3, k4 = jax.random.split(key, 5)
    params = init_params(kp)

    # ---- case 1: B=2 -> Bt=1, grid of 2 parallel steps --------------------------
    B, Lq, Lk = 2, 8, 8
    emb1 = jax.random.normal(k1, (B, Lq, EMB_DIM), jnp.float32)
    emb2 = jax.random.normal(k2, (B, Lk, EMB_DIM), jnp.float32)
    out = jax.block_until_ready(cross_attention_decoder_layer(emb1, emb2, params))
    ref = reference_forward(emb1, emb2, params)
    assert out.shape == (B, Lq, EMB_DIM)
    max_err = float(jnp.max(jnp.abs(out - ref)))
    assert jnp.allclose(out, ref, atol=5e-2, rtol=5e-2), \
        f"case1 mismatch vs JAX reference (max |err| = {max_err})"

    # ---- case 2: awkward batch (B=5 -> Bt=2, padded to 6) and Lk == 16 ----------
    B, Lq, Lk = 5, 16, 16
    emb1 = jax.random.normal(k3, (B, Lq, EMB_DIM), jnp.float32)
    emb2 = jax.random.normal(k4, (B, Lk, EMB_DIM), jnp.float32)
    out = jax.block_until_ready(cross_attention_decoder_layer(emb1, emb2, params))
    ref = reference_forward(emb1, emb2, params)
    assert out.shape == (B, Lq, EMB_DIM)
    max_err = float(jnp.max(jnp.abs(out - ref)))
    assert jnp.allclose(out, ref, atol=5e-2, rtol=5e-2), \
        f"case2 mismatch vs JAX reference (max |err| = {max_err})"

    print("KERNEL_OK")
</pallas_src>

<mosaic_0001>
module attributes {stable_mosaic.version = 11 : i64} {
  func.func @_decoder_layer_kernel(%arg0: i32, %arg1: memref<1x8x256xf32, #tpu.memory_space<vmem>>, %arg2: memref<1x8x256xf32, #tpu.memory_space<vmem>>, %arg3: memref<256x256xbf16, #tpu.memory_space<vmem>>, %arg4: memref<256x256xbf16, #tpu.memory_space<vmem>>, %arg5: memref<256x256xbf16, #tpu.memory_space<vmem>>, %arg6: memref<256x256xbf16, #tpu.memory_space<vmem>>, %arg7: memref<1x256xf32, #tpu.memory_space<vmem>>, %arg8: memref<1x256xf32, #tpu.memory_space<vmem>>, %arg9: memref<1x256xf32, #tpu.memory_space<vmem>>, %arg10: memref<1x256xf32, #tpu.memory_space<vmem>>, %arg11: memref<1x256xf32, #tpu.memory_space<vmem>>, %arg12: memref<1x256xf32, #tpu.memory_space<vmem>>, %arg13: memref<256x1024xbf16, #tpu.memory_space<vmem>>, %arg14: memref<1x1024xf32, #tpu.memory_space<vmem>>, %arg15: memref<1024x256xbf16, #tpu.memory_space<vmem>>, %arg16: memref<1x256xf32, #tpu.memory_space<vmem>>, %arg17: memref<1x256xf32, #tpu.memory_space<vmem>>, %arg18: memref<1x256xf32, #tpu.memory_space<vmem>>, %arg19: memref<1x8x256xf32, #tpu.memory_space<vmem>>) attributes {dimension_semantics = [#tpu.dimension_semantics<parallel>], iteration_bounds = array<i64: 2>, scalar_prefetch = 0 : i64, scratch_operands = 0 : i64, tpu.core_type = #tpu.core_type<tc>, window_params = [{transform_indices = @transform_0, window_bounds = array<i64: 1, 8, 256>}, {transform_indices = @transform_1, window_bounds = array<i64: 1, 8, 256>}, {pipeline_mode = #tpu.pipeline_mode<synchronous>, transform_indices = @transform_2, window_bounds = array<i64: 256, 256>}, {pipeline_mode = #tpu.pipeline_mode<synchronous>, transform_indices = @transform_3, window_bounds = array<i64: 256, 256>}, {pipeline_mode = #tpu.pipeline_mode<synchronous>, transform_indices = @transform_4, window_bounds = array<i64: 256, 256>}, {pipeline_mode = #tpu.pipeline_mode<synchronous>, transform_indices = @transform_5, window_bounds = array<i64: 256, 256>}, {pipeline_mode = #tpu.pipeline_mode<synchronous>, transform_indices = @transform_6, window_bounds = array<i64: 1, 256>}, {pipeline_mode = #tpu.pipeline_mode<synchronous>, transform_indices = @transform_7, window_bounds = array<i64: 1, 256>}, {pipeline_mode = #tpu.pipeline_mode<synchronous>, transform_indices = @transform_8, window_bounds = array<i64: 1, 256>}, {pipeline_mode = #tpu.pipeline_mode<synchronous>, transform_indices = @transform_9, window_bounds = array<i64: 1, 256>}, {pipeline_mode = #tpu.pipeline_mode<synchronous>, transform_indices = @transform_10, window_bounds = array<i64: 1, 256>}, {pipeline_mode = #tpu.pipeline_mode<synchronous>, transform_indices = @transform_11, window_bounds = array<i64: 1, 256>}, {pipeline_mode = #tpu.pipeline_mode<synchronous>, transform_indices = @transform_12, window_bounds = array<i64: 256, 1024>}, {pipeline_mode = #tpu.pipeline_mode<synchronous>, transform_indices = @transform_13, window_bounds = array<i64: 1, 1024>}, {pipeline_mode = #tpu.pipeline_mode<synchronous>, transform_indices = @transform_14, window_bounds = array<i64: 1024, 256>}, {pipeline_mode = #tpu.pipeline_mode<synchronous>, transform_indices = @transform_15, window_bounds = array<i64: 1, 256>}, {pipeline_mode = #tpu.pipeline_mode<synchronous>, transform_indices = @transform_16, window_bounds = array<i64: 1, 256>}, {pipeline_mode = #tpu.pipeline_mode<synchronous>, transform_indices = @transform_17, window_bounds = array<i64: 1, 256>}, {transform_indices = @transform_18, window_bounds = array<i64: 1, 8, 256>}]} {
    %c0 = arith.constant 0 : index
    %c0_0 = arith.constant 0 : index
    %c0_1 = arith.constant 0 : index
    %0 = vector.load %arg1[%c0, %c0_0, %c0_1] : memref<1x8x256xf32, #tpu.memory_space<vmem>>, vector<1x8x256xf32>
    %1 = vector.shape_cast %0 : vector<1x8x256xf32> to vector<8x256xf32>
    %c0_2 = arith.constant 0 : index
    %c0_3 = arith.constant 0 : index
    %c0_4 = arith.constant 0 : index
    %2 = vector.load %arg2[%c0_2, %c0_3, %c0_4] : memref<1x8x256xf32, #tpu.memory_space<vmem>>, vector<1x8x256xf32>
    %3 = vector.shape_cast %2 : vector<1x8x256xf32> to vector<8x256xf32>
    %4 = arith.truncf %1 : vector<8x256xf32> to vector<8x256xbf16>
    %c0_5 = arith.constant 0 : index
    %c0_6 = arith.constant 0 : index
    %5 = vector.load %arg3[%c0_5, %c0_6] : memref<256x256xbf16, #tpu.memory_space<vmem>>, vector<256x256xbf16>
    %cst = arith.constant dense<0.000000e+00> : vector<8x256xf32>
    %6 = tpu.matmul %4, %5, %cst {dimension_numbers = #tpu.dot_dimension_numbers<[1], [0], [0], [1], [0, 0, 1, 1], [], []>} : vector<8x256xbf16>, vector<256x256xbf16>, vector<8x256xf32> -> vector<8x256xf32>
    %c0_7 = arith.constant 0 : index
    %c0_8 = arith.constant 0 : index
    %7 = vector.load %arg7[%c0_7, %c0_8] : memref<1x256xf32, #tpu.memory_space<vmem>>, vector<1x256xf32>
    %8 = vector.broadcast %7 : vector<1x256xf32> to vector<8x256xf32>
    %9 = arith.addf %6, %8 : vector<8x256xf32>
    %10 = arith.truncf %3 : vector<8x256xf32> to vector<8x256xbf16>
    %c0_9 = arith.constant 0 : index
    %c0_10 = arith.constant 0 : index
    %11 = vector.load %arg4[%c0_9, %c0_10] : memref<256x256xbf16, #tpu.memory_space<vmem>>, vector<256x256xbf16>
    %cst_11 = arith.constant dense<0.000000e+00> : vector<8x256xf32>
    %12 = tpu.matmul %10, %11, %cst_11 {dimension_numbers = #tpu.dot_dimension_numbers<[1], [0], [0], [1], [0, 0, 1, 1], [], []>} : vector<8x256xbf16>, vector<256x256xbf16>, vector<8x256xf32> -> vector<8x256xf32>
    %c0_12 = arith.constant 0 : index
    %c0_13 = arith.constant 0 : index
    %13 = vector.load %arg8[%c0_12, %c0_13] : memref<1x256xf32, #tpu.memory_space<vmem>>, vector<1x256xf32>
    %14 = vector.broadcast %13 : vector<1x256xf32> to vector<8x256xf32>
    %15 = arith.addf %12, %14 : vector<8x256xf32>
    %16 = arith.truncf %3 : vector<8x256xf32> to vector<8x256xbf16>
    %c0_14 = arith.constant 0 : index
    %c0_15 = arith.constant 0 : index
    %17 = vector.load %arg5[%c0_14, %c0_15] : memref<256x256xbf16, #tpu.memory_space<vmem>>, vector<256x256xbf16>
    %cst_16 = arith.constant dense<0.000000e+00> : vector<8x256xf32>
    %18 = tpu.matmul %16, %17, %cst_16 {dimension_numbers = #tpu.dot_dimension_numbers<[1], [0], [0], [1], [0, 0, 1, 1], [], []>} : vector<8x256xbf16>, vector<256x256xbf16>, vector<8x256xf32> -> vector<8x256xf32>
    %c0_17 = arith.constant 0 : index
    %c0_18 = arith.constant 0 : index
    %19 = vector.load %arg9[%c0_17, %c0_18] : memref<1x256xf32, #tpu.memory_space<vmem>>, vector<1x256xf32>
    %20 = vector.broadcast %19 : vector<1x256xf32> to vector<8x256xf32>
    %21 = arith.addf %18, %20 : vector<8x256xf32>
    %22 = arith.truncf %9 : vector<8x256xf32> to vector<8x256xbf16>
    %23 = vector.extract_strided_slice %22 {offsets = [0, 0], sizes = [8, 32], strides = [1, 1]} : vector<8x256xbf16> to vector<8x32xbf16>
    %24 = vector.extract_strided_slice %22 {offsets = [0, 32], sizes = [8, 32], strides = [1, 1]} : vector<8x256xbf16> to vector<8x32xbf16>
    %25 = vector.extract_strided_slice %22 {offsets = [0, 64], sizes = [8, 32], strides = [1, 1]} : vector<8x256xbf16> to vector<8x32xbf16>
    %26 = vector.extract_strided_slice %22 {offsets = [0, 96], sizes = [8, 32], strides = [1, 1]} : vector<8x256xbf16> to vector<8x32xbf16>
    %27 = vector.extract_strided_slice %22 {offsets = [0, 128], sizes = [8, 32], strides = [1, 1]} : vector<8x256xbf16> to vector<8x32xbf16>
    %28 = vector.extract_strided_slice %22 {offsets = [0, 160], sizes = [8, 32], strides = [1, 1]} : vector<8x256xbf16> to vector<8x32xbf16>
    %29 = vector.extract_strided_slice %22 {offsets = [0, 192], sizes = [8, 32], strides = [1, 1]} : vector<8x256xbf16> to vector<8x32xbf16>
    %30 = vector.extract_strided_slice %22 {offsets = [0, 224], sizes = [8, 32], strides = [1, 1]} : vector<8x256xbf16> to vector<8x32xbf16>
    %31 = vector.shape_cast %23 : vector<8x32xbf16> to vector<1x8x32xbf16>
    %32 = vector.shape_cast %24 : vector<8x32xbf16> to vector<1x8x32xbf16>
    %33 = vector.shape_cast %25 : vector<8x32xbf16> to vector<1x8x32xbf16>
    %34 = vector.shape_cast %26 : vector<8x32xbf16> to vector<1x8x32xbf16>
    %35 = vector.shape_cast %27 : vector<8x32xbf16> to vector<1x8x32xbf16>
    %36 = vector.shape_cast %28 : vector<8x32xbf16> to vector<1x8x32xbf16>
    %37 = vector.shape_cast %29 : vector<8x32xbf16> to vector<1x8x32xbf16>
    %38 = vector.shape_cast %30 : vector<8x32xbf16> to vector<1x8x32xbf16>
    %39 = tpu.concatenate %31, %32, %33, %34, %35, %36, %37, %38 in 0 : vector<1x8x32xbf16>, vector<1x8x32xbf16>, vector<1x8x32xbf16>, vector<1x8x32xbf16>, vector<1x8x32xbf16>, vector<1x8x32xbf16>, vector<1x8x32xbf16>, vector<1x8x32xbf16> -> vector<8x8x32xbf16>
    %40 = vector.shape_cast %39 : vector<8x8x32xbf16> to vector<8x1x8x32xbf16>
    %41 = vector.shape_cast %40 : vector<8x1x8x32xbf16> to vector<8x8x32xbf16>
    %42 = arith.truncf %15 : vector<8x256xf32> to vector<8x256xbf16>
    %43 = vector.extract_strided_slice %42 {offsets = [0, 0], sizes = [8, 32], strides = [1, 1]} : vector<8x256xbf16> to vector<8x32xbf16>
    %44 = vector.extract_strided_slice %42 {offsets = [0, 32], sizes = [8, 32], strides = [1, 1]} : vector<8x256xbf16> to vector<8x32xbf16>
    %45 = vector.extract_strided_slice %42 {offsets = [0, 64], sizes = [8, 32], strides = [1, 1]} : vector<8x256xbf16> to vector<8x32xbf16>
    %46 = vector.extract_strided_slice %42 {offsets = [0, 96], sizes = [8, 32], strides = [1, 1]} : vector<8x256xbf16> to vector<8x32xbf16>
    %47 = vector.extract_strided_slice %42 {offsets = [0, 128], sizes = [8, 32], strides = [1, 1]} : vector<8x256xbf16> to vector<8x32xbf16>
    %48 = vector.extract_strided_slice %42 {offsets = [0, 160], sizes = [8, 32], strides = [1, 1]} : vector<8x256xbf16> to vector<8x32xbf16>
    %49 = vector.extract_strided_slice %42 {offsets = [0, 192], sizes = [8, 32], strides = [1, 1]} : vector<8x256xbf16> to vector<8x32xbf16>
    %50 = vector.extract_strided_slice %42 {offsets = [0, 224], sizes = [8, 32], strides = [1, 1]} : vector<8x256xbf16> to vector<8x32xbf16>
    %51 = vector.shape_cast %43 : vector<8x32xbf16> to vector<1x8x32xbf16>
    %52 = vector.shape_cast %44 : vector<8x32xbf16> to vector<1x8x32xbf16>
    %53 = vector.shape_cast %45 : vector<8x32xbf16> to vector<1x8x32xbf16>
    %54 = vector.shape_cast %46 : vector<8x32xbf16> to vector<1x8x32xbf16>
    %55 = vector.shape_cast %47 : vector<8x32xbf16> to vector<1x8x32xbf16>
    %56 = vector.shape_cast %48 : vector<8x32xbf16> to vector<1x8x32xbf16>
    %57 = vector.shape_cast %49 : vector<8x32xbf16> to vector<1x8x32xbf16>
    %58 = vector.shape_cast %50 : vector<8x32xbf16> to vector<1x8x32xbf16>
    %59 = tpu.concatenate %51, %52, %53, %54, %55, %56, %57, %58 in 0 : vector<1x8x32xbf16>, vector<1x8x32xbf16>, vector<1x8x32xbf16>, vector<1x8x32xbf16>, vector<1x8x32xbf16>, vector<1x8x32xbf16>, vector<1x8x32xbf16>, vector<1x8x32xbf16> -> vector<8x8x32xbf16>
    %60 = vector.shape_cast %59 : vector<8x8x32xbf16> to vector<8x1x8x32xbf16>
    %61 = vector.shape_cast %60 : vector<8x1x8x32xbf16> to vector<8x8x32xbf16>
    %62 = arith.truncf %21 : vector<8x256xf32> to vector<8x256xbf16>
    %63 = vector.extract_strided_slice %62 {offsets = [0, 0], sizes = [8, 32], strides = [1, 1]} : vector<8x256xbf16> to vector<8x32xbf16>
    %64 = vector.extract_strided_slice %62 {offsets = [0, 32], sizes = [8, 32], strides = [1, 1]} : vector<8x256xbf16> to vector<8x32xbf16>
    %65 = vector.extract_strided_slice %62 {offsets = [0, 64], sizes = [8, 32], strides = [1, 1]} : vector<8x256xbf16> to vector<8x32xbf16>
    %66 = vector.extract_strided_slice %62 {offsets = [0, 96], sizes = [8, 32], strides = [1, 1]} : vector<8x256xbf16> to vector<8x32xbf16>
    %67 = vector.extract_strided_slice %62 {offsets = [0, 128], sizes = [8, 32], strides = [1, 1]} : vector<8x256xbf16> to vector<8x32xbf16>
    %68 = vector.extract_strided_slice %62 {offsets = [0, 160], sizes = [8, 32], strides = [1, 1]} : vector<8x256xbf16> to vector<8x32xbf16>
    %69 = vector.extract_strided_slice %62 {offsets = [0, 192], sizes = [8, 32], strides = [1, 1]} : vector<8x256xbf16> to vector<8x32xbf16>
    %70 = vector.extract_strided_slice %62 {offsets = [0, 224], sizes = [8, 32], strides = [1, 1]} : vector<8x256xbf16> to vector<8x32xbf16>
    %71 = vector.shape_cast %63 : vector<8x32xbf16> to vector<1x8x32xbf16>
    %72 = vector.shape_cast %64 : vector<8x32xbf16> to vector<1x8x32xbf16>
    %73 = vector.shape_cast %65 : vector<8x32xbf16> to vector<1x8x32xbf16>
    %74 = vector.shape_cast %66 : vector<8x32xbf16> to vector<1x8x32xbf16>
    %75 = vector.shape_cast %67 : vector<8x32xbf16> to vector<1x8x32xbf16>
    %76 = vector.shape_cast %68 : vector<8x32xbf16> to vector<1x8x32xbf16>
    %77 = vector.shape_cast %69 : vector<8x32xbf16> to vector<1x8x32xbf16>
    %78 = vector.shape_cast %70 : vector<8x32xbf16> to vector<1x8x32xbf16>
    %79 = tpu.concatenate %71, %72, %73, %74, %75, %76, %77, %78 in 0 : vector<1x8x32xbf16>, vector<1x8x32xbf16>, vector<1x8x32xbf16>, vector<1x8x32xbf16>, vector<1x8x32xbf16>, vector<1x8x32xbf16>, vector<1x8x32xbf16>, vector<1x8x32xbf16> -> vector<8x8x32xbf16>
    %80 = vector.shape_cast %79 : vector<8x8x32xbf16> to vector<8x1x8x32xbf16>
    %81 = vector.shape_cast %80 : vector<8x1x8x32xbf16> to vector<8x8x32xbf16>
    "tpu.trace_start"() <{level = 10 : i32, message = "gqd,gkd->gqk"}> : () -> ()
    %cst_19 = arith.constant dense<0.000000e+00> : vector<8x8x8xf32>
    %82 = tpu.matmul %41, %61, %cst_19 {dimension_numbers = #tpu.dot_dimension_numbers<[2], [2], [1], [1], [0, 0, 0, 1, 1, 1], [0], [0]>} : vector<8x8x32xbf16>, vector<8x8x32xbf16>, vector<8x8x8xf32> -> vector<8x8x8xf32>
    "tpu.trace_stop"() : () -> ()
    %cst_20 = arith.constant dense<0xFF800000> : vector<8x8xf32>
    %83 = vector.multi_reduction <maximumf>, %82, %cst_20 [2] : vector<8x8x8xf32> to vector<8x8xf32>
    %84 = vector.shape_cast %83 : vector<8x8xf32> to vector<8x8x1xf32>
    %85 = vector.broadcast %84 : vector<8x8x1xf32> to vector<8x8x8xf32>
    %86 = arith.subf %82, %85 : vector<8x8x8xf32>
    %87 = math.exp %86 : vector<8x8x8xf32>
    %cst_21 = arith.constant dense<0.000000e+00> : vector<8x8xf32>
    %88 = vector.multi_reduction <add>, %87, %cst_21 [2] : vector<8x8x8xf32> to vector<8x8xf32>
    %89 = vector.shape_cast %88 : vector<8x8xf32> to vector<8x8x1xf32>
    %90 = tpu.reciprocal %89 {approx = true} : vector<8x8x1xf32> -> vector<8x8x1xf32>
    %91 = vector.broadcast %90 : vector<8x8x1xf32> to vector<8x8x8xf32>
    %92 = arith.mulf %87, %91 : vector<8x8x8xf32>
    %93 = arith.truncf %92 : vector<8x8x8xf32> to vector<8x8x8xbf16>
    "tpu.trace_start"() <{level = 10 : i32, message = "gqk,gkd->gqd"}> : () -> ()
    %cst_22 = arith.constant dense<0.000000e+00> : vector<8x8x32xf32>
    %94 = tpu.matmul %93, %81, %cst_22 {dimension_numbers = #tpu.dot_dimension_numbers<[2], [1], [1], [2], [0, 0, 0, 1, 1, 2], [0], [0]>} : vector<8x8x8xbf16>, vector<8x8x32xbf16>, vector<8x8x32xf32> -> vector<8x8x32xf32>
    "tpu.trace_stop"() : () -> ()
    %95 = arith.truncf %94 : vector<8x8x32xf32> to vector<8x8x32xbf16>
    %96 = vector.shape_cast %95 : vector<8x8x32xbf16> to vector<8x1x8x32xbf16>
    %97 = vector.shape_cast %96 : vector<8x1x8x32xbf16> to vector<8x8x32xbf16>
    %98 = vector.extract_strided_slice %97 {offsets = [0, 0, 0], sizes = [1, 8, 32], strides = [1, 1, 1]} : vector<8x8x32xbf16> to vector<1x8x32xbf16>
    %99 = vector.shape_cast %98 : vector<1x8x32xbf16> to vector<8x32xbf16>
    %100 = vector.extract_strided_slice %97 {offsets = [1, 0, 0], sizes = [1, 8, 32], strides = [1, 1, 1]} : vector<8x8x32xbf16> to vector<1x8x32xbf16>
    %101 = vector.shape_cast %100 : vector<1x8x32xbf16> to vector<8x32xbf16>
    %102 = vector.extract_strided_slice %97 {offsets = [2, 0, 0], sizes = [1, 8, 32], strides = [1, 1, 1]} : vector<8x8x32xbf16> to vector<1x8x32xbf16>
    %103 = vector.shape_cast %102 : vector<1x8x32xbf16> to vector<8x32xbf16>
    %104 = vector.extract_strided_slice %97 {offsets = [3, 0, 0], sizes = [1, 8, 32], strides = [1, 1, 1]} : vector<8x8x32xbf16> to vector<1x8x32xbf16>
    %105 = vector.shape_cast %104 : vector<1x8x32xbf16> to vector<8x32xbf16>
    %106 = vector.extract_strided_slice %97 {offsets = [4, 0, 0], sizes = [1, 8, 32], strides = [1, 1, 1]} : vector<8x8x32xbf16> to vector<1x8x32xbf16>
    %107 = vector.shape_cast %106 : vector<1x8x32xbf16> to vector<8x32xbf16>
    %108 = vector.extract_strided_slice %97 {offsets = [5, 0, 0], sizes = [1, 8, 32], strides = [1, 1, 1]} : vector<8x8x32xbf16> to vector<1x8x32xbf16>
    %109 = vector.shape_cast %108 : vector<1x8x32xbf16> to vector<8x32xbf16>
    %110 = vector.extract_strided_slice %97 {offsets = [6, 0, 0], sizes = [1, 8, 32], strides = [1, 1, 1]} : vector<8x8x32xbf16> to vector<1x8x32xbf16>
    %111 = vector.shape_cast %110 : vector<1x8x32xbf16> to vector<8x32xbf16>
    %112 = vector.extract_strided_slice %97 {offsets = [7, 0, 0], sizes = [1, 8, 32], strides = [1, 1, 1]} : vector<8x8x32xbf16> to vector<1x8x32xbf16>
    %113 = vector.shape_cast %112 : vector<1x8x32xbf16> to vector<8x32xbf16>
    %114 = tpu.concatenate %99, %101, %103, %105, %107, %109, %111, %113 in 1 : vector<8x32xbf16>, vector<8x32xbf16>, vector<8x32xbf16>, vector<8x32xbf16>, vector<8x32xbf16>, vector<8x32xbf16>, vector<8x32xbf16>, vector<8x32xbf16> -> vector<8x256xbf16>
    %c0_23 = arith.constant 0 : index
    %c0_24 = arith.constant 0 : index
    %115 = vector.load %arg6[%c0_23, %c0_24] : memref<256x256xbf16, #tpu.memory_space<vmem>>, vector<256x256xbf16>
    %cst_25 = arith.constant dense<0.000000e+00> : vector<8x256xf32>
    %116 = tpu.matmul %114, %115, %cst_25 {dimension_numbers = #tpu.dot_dimension_numbers<[1], [0], [0], [1], [0, 0, 1, 1], [], []>} : vector<8x256xbf16>, vector<256x256xbf16>, vector<8x256xf32> -> vector<8x256xf32>
    %c0_26 = arith.constant 0 : index
    %c0_27 = arith.constant 0 : index
    %117 = vector.load %arg10[%c0_26, %c0_27] : memref<1x256xf32, #tpu.memory_space<vmem>>, vector<1x256xf32>
    %118 = vector.broadcast %117 : vector<1x256xf32> to vector<8x256xf32>
    %119 = arith.addf %116, %118 : vector<8x256xf32>
    %120 = arith.addf %119, %1 : vector<8x256xf32>
    %c0_28 = arith.constant 0 : index
    %c0_29 = arith.constant 0 : index
    %121 = vector.load %arg11[%c0_28, %c0_29] : memref<1x256xf32, #tpu.memory_space<vmem>>, vector<1x256xf32>
    %c0_30 = arith.constant 0 : index
    %c0_31 = arith.constant 0 : index
    %122 = vector.load %arg12[%c0_30, %c0_31] : memref<1x256xf32, #tpu.memory_space<vmem>>, vector<1x256xf32>
    %cst_32 = arith.constant dense<0.000000e+00> : vector<8xf32>
    %123 = vector.multi_reduction <add>, %120, %cst_32 [1] : vector<8x256xf32> to vector<8xf32>
    %124 = vector.shape_cast %123 : vector<8xf32> to vector<8x1xf32>
    %cst_33 = arith.constant 2.560000e+02 : f32
    %125 = vector.broadcast %cst_33 : f32 to vector<8x1xf32>
    %126 = arith.divf %124, %125 : vector<8x1xf32>
    %127 = vector.broadcast %126 : vector<8x1xf32> to vector<8x256xf32>
    %128 = arith.subf %120, %127 : vector<8x256xf32>
    %129 = arith.mulf %128, %128 : vector<8x256xf32>
    %cst_34 = arith.constant dense<0.000000e+00> : vector<8xf32>
    %130 = vector.multi_reduction <add>, %129, %cst_34 [1] : vector<8x256xf32> to vector<8xf32>
    %131 = vector.shape_cast %130 : vector<8xf32> to vector<8x1xf32>
    %cst_35 = arith.constant 2.560000e+02 : f32
    %132 = vector.broadcast %cst_35 : f32 to vector<8x1xf32>
    %133 = arith.divf %131, %132 : vector<8x1xf32>
    %cst_36 = arith.constant 9.99999974E-6 : f32
    %134 = vector.broadcast %cst_36 : f32 to vector<8x1xf32>
    %135 = arith.addf %133, %134 : vector<8x1xf32>
    %136 = math.rsqrt %135 : vector<8x1xf32>
    %137 = vector.broadcast %121 : vector<1x256xf32> to vector<8x256xf32>
    %138 = vector.broadcast %136 : vector<8x1xf32> to vector<8x256xf32>
    %139 = arith.mulf %137, %138 : vector<8x256xf32>
    %140 = arith.mulf %128, %139 : vector<8x256xf32>
    %141 = vector.broadcast %122 : vector<1x256xf32> to vector<8x256xf32>
    %142 = arith.addf %140, %141 : vector<8x256xf32>
    %143 = arith.truncf %142 : vector<8x256xf32> to vector<8x256xbf16>
    %c0_37 = arith.constant 0 : index
    %c0_38 = arith.constant 0 : index
    %144 = vector.load %arg13[%c0_37, %c0_38] : memref<256x1024xbf16, #tpu.memory_space<vmem>>, vector<256x1024xbf16>
    %cst_39 = arith.constant dense<0.000000e+00> : vector<8x1024xf32>
    %145 = tpu.matmul %143, %144, %cst_39 {dimension_numbers = #tpu.dot_dimension_numbers<[1], [0], [0], [1], [0, 0, 1, 1], [], []>} : vector<8x256xbf16>, vector<256x1024xbf16>, vector<8x1024xf32> -> vector<8x1024xf32>
    %c0_40 = arith.constant 0 : index
    %c0_41 = arith.constant 0 : index
    %146 = vector.load %arg14[%c0_40, %c0_41] : memref<1x1024xf32, #tpu.memory_space<vmem>>, vector<1x1024xf32>
    %147 = vector.broadcast %146 : vector<1x1024xf32> to vector<8x1024xf32>
    %148 = arith.addf %145, %147 : vector<8x1024xf32>
    %cst_42 = arith.constant 0.000000e+00 : f32
    %149 = vector.broadcast %cst_42 : f32 to vector<8x1024xf32>
    %150 = arith.maximumf %148, %149 : vector<8x1024xf32>
    %151 = arith.truncf %150 : vector<8x1024xf32> to vector<8x1024xbf16>
    %c0_43 = arith.constant 0 : index
    %c0_44 = arith.constant 0 : index
    %152 = vector.load %arg15[%c0_43, %c0_44] : memref<1024x256xbf16, #tpu.memory_space<vmem>>, vector<1024x256xbf16>
    %cst_45 = arith.constant dense<0.000000e+00> : vector<8x256xf32>
    %153 = tpu.matmul %151, %152, %cst_45 {dimension_numbers = #tpu.dot_dimension_numbers<[1], [0], [0], [1], [0, 0, 1, 1], [], []>} : vector<8x1024xbf16>, vector<1024x256xbf16>, vector<8x256xf32> -> vector<8x256xf32>
    %c0_46 = arith.constant 0 : index
    %c0_47 = arith.constant 0 : index
    %154 = vector.load %arg16[%c0_46, %c0_47] : memref<1x256xf32, #tpu.memory_space<vmem>>, vector<1x256xf32>
    %155 = vector.broadcast %154 : vector<1x256xf32> to vector<8x256xf32>
    %156 = arith.addf %153, %155 : vector<8x256xf32>
    %157 = arith.addf %142, %156 : vector<8x256xf32>
    %c0_48 = arith.constant 0 : index
    %c0_49 = arith.constant 0 : index
    %158 = vector.load %arg17[%c0_48, %c0_49] : memref<1x256xf32, #tpu.memory_space<vmem>>, vector<1x256xf32>
    %c0_50 = arith.constant 0 : index
    %c0_51 = arith.constant 0 : index
    %159 = vector.load %arg18[%c0_50, %c0_51] : memref<1x256xf32, #tpu.memory_space<vmem>>, vector<1x256xf32>
    %cst_52 = arith.constant dense<0.000000e+00> : vector<8xf32>
    %160 = vector.multi_reduction <add>, %157, %cst_52 [1] : vector<8x256xf32> to vector<8xf32>
    %161 = vector.shape_cast %160 : vector<8xf32> to vector<8x1xf32>
    %cst_53 = arith.constant 2.560000e+02 : f32
    %162 = vector.broadcast %cst_53 : f32 to vector<8x1xf32>
    %163 = arith.divf %161, %162 : vector<8x1xf32>
    %164 = vector.broadcast %163 : vector<8x1xf32> to vector<8x256xf32>
    %165 = arith.subf %157, %164 : vector<8x256xf32>
    %166 = arith.mulf %165, %165 : vector<8x256xf32>
    %cst_54 = arith.constant dense<0.000000e+00> : vector<8xf32>
    %167 = vector.multi_reduction <add>, %166, %cst_54 [1] : vector<8x256xf32> to vector<8xf32>
    %168 = vector.shape_cast %167 : vector<8xf32> to vector<8x1xf32>
    %cst_55 = arith.constant 2.560000e+02 : f32
    %169 = vector.broadcast %cst_55 : f32 to vector<8x1xf32>
    %170 = arith.divf %168, %169 : vector<8x1xf32>
    %cst_56 = arith.constant 9.99999974E-6 : f32
    %171 = vector.broadcast %cst_56 : f32 to vector<8x1xf32>
    %172 = arith.addf %170, %171 : vector<8x1xf32>
    %173 = math.rsqrt %172 : vector<8x1xf32>
    %174 = vector.broadcast %158 : vector<1x256xf32> to vector<8x256xf32>
    %175 = vector.broadcast %173 : vector<8x1xf32> to vector<8x256xf32>
    %176 = arith.mulf %174, %175 : vector<8x256xf32>
    %177 = arith.mulf %165, %176 : vector<8x256xf32>
    %178 = vector.broadcast %159 : vector<1x256xf32> to vector<8x256xf32>
    %179 = arith.addf %177, %178 : vector<8x256xf32>
    %180 = vector.shape_cast %179 : vector<8x256xf32> to vector<1x8x256xf32>
    %c0_57 = arith.constant 0 : index
    %c0_58 = arith.constant 0 : index
    %c0_59 = arith.constant 0 : index
    %181 = vector.load %arg19[%c0_57, %c0_58, %c0_59] : memref<1x8x256xf32, #tpu.memory_space<vmem>>, vector<1x8x256xf32>
    tpu.vector_store %arg19[%c0_57, %c0_58, %c0_59], %180 {strides = array<i32>} : memref<1x8x256xf32, #tpu.memory_space<vmem>>, vector<1x8x256xf32>,
    return
  }
  func.func @transform_0(%arg0: i32) -> (i32, i32, i32) {
    %c0_i32 = arith.constant 0 : i32
    %c0_i32_0 = arith.constant 0 : i32
    %c0_i32_1 = arith.constant 0 : i32
    return %arg0, %c0_i32, %c0_i32_0 : i32, i32, i32
  }
  func.func @transform_1(%arg0: i32) -> (i32, i32, i32) {
    %c0_i32 = arith.constant 0 : i32
    %c0_i32_0 = arith.constant 0 : i32
    %c0_i32_1 = arith.constant 0 : i32
    return %arg0, %c0_i32, %c0_i32_0 : i32, i32, i32
  }
  func.func @transform_2(%arg0: i32) -> (i32, i32) {
    %c0_i32 = arith.constant 0 : i32
    %c0_i32_0 = arith.constant 0 : i32
    %c0_i32_1 = arith.constant 0 : i32
    return %c0_i32, %c0_i32_0 : i32, i32
  }
  func.func @transform_3(%arg0: i32) -> (i32, i32) {
    %c0_i32 = arith.constant 0 : i32
    %c0_i32_0 = arith.constant 0 : i32
    %c0_i32_1 = arith.constant 0 : i32
    return %c0_i32, %c0_i32_0 : i32, i32
  }
  func.func @transform_4(%arg0: i32) -> (i32, i32) {
    %c0_i32 = arith.constant 0 : i32
    %c0_i32_0 = arith.constant 0 : i32
    %c0_i32_1 = arith.constant 0 : i32
    return %c0_i32, %c0_i32_0 : i32, i32
  }
  func.func @transform_5(%arg0: i32) -> (i32, i32) {
    %c0_i32 = arith.constant 0 : i32
    %c0_i32_0 = arith.constant 0 : i32
    %c0_i32_1 = arith.constant 0 : i32
    return %c0_i32, %c0_i32_0 : i32, i32
  }
  func.func @transform_6(%arg0: i32) -> (i32, i32) {
    %c0_i32 = arith.constant 0 : i32
    %c0_i32_0 = arith.constant 0 : i32
    %c0_i32_1 = arith.constant 0 : i32
    return %c0_i32, %c0_i32_0 : i32, i32
  }
  func.func @transform_7(%arg0: i32) -> (i32, i32) {
    %c0_i32 = arith.constant 0 : i32
    %c0_i32_0 = arith.constant 0 : i32
    %c0_i32_1 = arith.constant 0 : i32
    return %c0_i32, %c0_i32_0 : i32, i32
  }
  func.func @transform_8(%arg0: i32) -> (i32, i32) {
    %c0_i32 = arith.constant 0 : i32
    %c0_i32_0 = arith.constant 0 : i32
    %c0_i32_1 = arith.constant 0 : i32
    return %c0_i32, %c0_i32_0 : i32, i32
  }
  func.func @transform_9(%arg0: i32) -> (i32, i32) {
    %c0_i32 = arith.constant 0 : i32
    %c0_i32_0 = arith.constant 0 : i32
    %c0_i32_1 = arith.constant 0 : i32
    return %c0_i32, %c0_i32_0 : i32, i32
  }
  func.func @transform_10(%arg0: i32) -> (i32, i32) {
    %c0_i32 = arith.constant 0 : i32
    %c0_i32_0 = arith.constant 0 : i32
    %c0_i32_1 = arith.constant 0 : i32
    return %c0_i32, %c0_i32_0 : i32, i32
  }
  func.func @transform_11(%arg0: i32) -> (i32, i32) {
    %c0_i32 = arith.constant 0 : i32
    %c0_i32_0 = arith.constant 0 : i32
    %c0_i32_1 = arith.constant 0 : i32
    return %c0_i32, %c0_i32_0 : i32, i32
  }
  func.func @transform_12(%arg0: i32) -> (i32, i32) {
    %c0_i32 = arith.constant 0 : i32
    %c0_i32_0 = arith.constant 0 : i32
    %c0_i32_1 = arith.constant 0 : i32
    return %c0_i32, %c0_i32_0 : i32, i32
  }
  func.func @transform_13(%arg0: i32) -> (i32, i32) {
    %c0_i32 = arith.constant 0 : i32
    %c0_i32_0 = arith.constant 0 : i32
    %c0_i32_1 = arith.constant 0 : i32
    return %c0_i32, %c0_i32_0 : i32, i32
  }
  func.func @transform_14(%arg0: i32) -> (i32, i32) {
    %c0_i32 = arith.constant 0 : i32
    %c0_i32_0 = arith.constant 0 : i32
    %c0_i32_1 = arith.constant 0 : i32
    return %c0_i32, %c0_i32_0 : i32, i32
  }
  func.func @transform_15(%arg0: i32) -> (i32, i32) {
    %c0_i32 = arith.constant 0 : i32
    %c0_i32_0 = arith.constant 0 : i32
    %c0_i32_1 = arith.constant 0 : i32
    return %c0_i32, %c0_i32_0 : i32, i32
  }
  func.func @transform_16(%arg0: i32) -> (i32, i32) {
    %c0_i32 = arith.constant 0 : i32
    %c0_i32_0 = arith.constant 0 : i32
    %c0_i32_1 = arith.constant 0 : i32
    return %c0_i32, %c0_i32_0 : i32, i32
  }
  func.func @transform_17(%arg0: i32) -> (i32, i32) {
    %c0_i32 = arith.constant 0 : i32
    %c0_i32_0 = arith.constant 0 : i32
    %c0_i32_1 = arith.constant 0 : i32
    return %c0_i32, %c0_i32_0 : i32, i32
  }
  func.func @transform_18(%arg0: i32) -> (i32, i32, i32) {
    %c0_i32 = arith.constant 0 : i32
    %c0_i32_0 = arith.constant 0 : i32
    %c0_i32_1 = arith.constant 0 : i32
    return %arg0, %c0_i32, %c0_i32_0 : i32, i32, i32
  }
}

</mosaic_0001>

<bundles_post_ra>
// kernel: tpu_custom_call.1
= control target key start
LH: loop header
LB: loop body
LE: loop exit
PB: predicated region body
PF: predicated region fallthrough
CT: control target
= control target key end

     0   :  { %s7913_s0 = inlined_call_operand.hbm [shape: f32[2,8,256], index: 0, kind: input, shape index: {}]   ;;  %s7914_s1 = inlined_call_operand.hbm [shape: f32[2,8,256], index: 1, kind: input, shape index: {}]   ;;  %s7915_s2 = inlined_call_operand.hbm [shape: bf16[256,256], index: 2, kind: input, shape index: {}]   ;;  %s7916_s3 = inlined_call_operand.hbm [shape: bf16[256,256], index: 3, kind: input, shape index: {}]   ;;  %s7917_s4 = inlined_call_operand.hbm [shape: bf16[256,256], index: 4, kind: input, shape index: {}]   ;;  %s7918_s5 = inlined_call_operand.hbm [shape: bf16[256,256], index: 5, kind: input, shape index: {}]   ;;  %s7919_s6 = inlined_call_operand.vmem [shape: f32[1,256], index: 6, kind: input, shape index: {}]   ;;  %s7920_s7 = inlined_call_operand.vmem [shape: f32[1,256], index: 7, kind: input, shape index: {}]   ;;  %s7921_s8 = inlined_call_operand.hbm [shape: f32[1,256], index: 8, kind: input, shape index: {}]   ;;  %s7922_s9 = inlined_call_operand.hbm [shape: f32[1,256], index: 9, kind: input, shape index: {}]   ;;  %s7923_s10 = inlined_call_operand.hbm [shape: f32[1,256], index: 10, kind: input, shape index: {}]   ;;  %s7924_s11 = inlined_call_operand.hbm [shape: f32[1,256], index: 11, kind: input, shape index: {}]   ;;  %s7925_s12 = inlined_call_operand.hbm [shape: bf16[256,1024], index: 12, kind: input, shape index: {}]   ;;  %s7926_s13 = inlined_call_operand.vmem [shape: f32[1,1024], index: 13, kind: input, shape index: {}]   ;;  %s7927_s14 = inlined_call_operand.hbm [shape: bf16[1024,256], index: 14, kind: input, shape index: {}]   ;;  %s7928_s15 = inlined_call_operand.vmem [shape: f32[1,256], index: 15, kind: input, shape index: {}]   ;;  %s7929_s16 = inlined_call_operand.hbm [shape: f32[1,256], index: 16, kind: input, shape index: {}]   ;;  %s7930_s17 = inlined_call_operand.vmem [shape: f32[1,256], index: 17, kind: input, shape index: {}]   ;;  %s7931_s18 = inlined_call_operand.hbm [shape: f32[2,8,256], index: 18, kind: output, shape index: {}]  }
   0x1   :  { %7936 = sst [smem:[#allocation35_spill]] %s7913_s0 }
   0x2   :  { %7937 = sst [smem:[#allocation36_spill]] %s7914_s1 }
   0x3   :  { %7938 = sst [smem:[#allocation37_spill]] %s7915_s2 }
   0x4   :  { %7939 = sst [smem:[#allocation38_spill]] %s7916_s3 }
   0x5   :  { %7940 = sst [smem:[#allocation39_spill]] %s7917_s4 }
   0x6   :  { %7941 = sst [smem:[#allocation40_spill]] %s7918_s5 }
   0x7   :  { %7942 = sst [smem:[#allocation41_spill]] %s7921_s8 }
   0x8   :  { %7943 = sst [smem:[#allocation42_spill]] %s7922_s9 }
   0x9   :  { %7944 = sst [smem:[#allocation43_spill]] %s7923_s10 }
   0xa   :  { %7945 = sst [smem:[#allocation44_spill]] %s7924_s11 }
   0xb   :  { %7946 = sst [smem:[#allocation45_spill]] %s7925_s12 }
   0xc   :  { %7947 = sst [smem:[#allocation46_spill]] %s7926_s13 }
   0xd   :  { %7948 = sst [smem:[#allocation47_spill]] %s7927_s14 }
   0xe   :  { %7949 = sst [smem:[#allocation48_spill]] %s7928_s15 }
   0xf   :  { %7950 = sst [smem:[#allocation49_spill]] %s7929_s16 }
  0x10   :  { %7951 = sst [smem:[#allocation50_spill]] %s7930_s17 }
  0x11   :  { %7952 = sst [smem:[#allocation51_spill]] %s7931_s18 }
  0x12   :  { %23 = vsyncpa [#allocation3], 0 }
  0x13   :  { %25 = vsyncpa [#allocation3 + $0x1], 0 }
  0x14   :  { %26 = vsyncpa [#allocation6], 0 }
  0x15   :  { %28 = vsyncpa [#allocation6 + $0x1], 0 }
  0x16   :  { %29 = vsyncpa [#allocation9], 0 }
  0x17   :  { %30 = vsyncpa [#allocation12], 0 }
  0x18   :  { %31 = vsyncpa [#allocation15], 0 }
  0x19   :  { %32 = vsyncpa [#allocation18], 0 }
  0x1a   :  { %33 = vsyncpa [#allocation21], 0 }
  0x1b   :  { %34 = vsyncpa [#allocation4], 0 }
  0x1c   :  { %36 = vsyncpa [#allocation4 + $0x1], 0  ;;  %s7401_s27 = smov 0   ;;  %s7403_s28 = smov 0  }
  0x1d   :  { %s7405_s29 = smov 0   ;;  %s7407_s30 = smov 0  }
  0x1e LB: > { %7953 = sst [smem:[#allocation33_spill]] %s7281_s29  ;;  %s7425_s21 = sadd.s32 4294967295, %s7285_s30   ;;  %s7285_s30 = sphi %s7407_s30, %s7984_s30   ;;  %s7281_s29 = sphi %s7405_s29, %s7981_s29   ;;  %s7277_s28 = sphi %s7403_s28, %s7983_s28   ;;  %s7273_s27 = sphi %s7401_s27, %s7982_s27  }
  0x1f   : > { %s7954_s1 = sld [smem:[#allocation37_spill]]  ;;  %p4613_p0 = scmp.ge.s32.totalorder %s7285_s30, 1 }
  0x20   : > { %p63_p1 = scmp.eq.s32.totalorder %s7425_s21, 0  ;;  %p461_p2 = scmp.lt.s32.totalorder %s7285_s30, 3 }
  0x21   : > { %s7287_s2 = smov [#allocation7]   ;;  %s7956_s3 = sld [smem:[#allocation38_spill]] }
  0x22   : > { %p7430_p3 = pnand %p4613_p0, %p461_p2  ;;  %s474_s23 = sshll.u32 %s7287_s2, 4  ;;  %s475_s23 = int_to_ptr.vmem [resolvable:$true] %s474_s23 }
  0x23   : > { %s7958_s5 = sld [smem:[#allocation40_spill]]  ;;  %s7288_s18 = smov [#allocation8]  }
  0x24   : > { %p6641_p4 = pneg %p7430_p3  ;;  %s488_s17 = sshll.u32 %s7288_s18, 4  ;;  %s489_s17 = int_to_ptr.vmem [resolvable:$true] %s488_s17 }
  0x25   : > { %s472_s20 = sshll.u32 %s7954_s1, 4  ;;  %s7289_s15 = smov 128   ;;  %s473_s20 = int_to_ptr.hbm [resolvable:$true] %s472_s20 }
  0x26   : > { %p7442_p6 = pnand %p6641_p4, %p63_p1  ;;  %s7290_s13 = smov 8  }
  0x27   : > { %s486_s26 = sshll.u32 %s7956_s3, 4  ;;  %s7959_s9 = sld [smem:[#allocation42_spill]]  ;;  %s487_s26 = int_to_ptr.hbm [resolvable:$true] %s486_s26 }
  0x28   : > { %6644 = dma.hbm_to_vmem [thread:$0]  (!%p7442_p6), %s473_s20, 4096, %s475_s23, [#allocation6], %s7289_s15, %s7289_s15, %s7290_s13  }
  0x29   : > { %s514_s2 = sshll.u32 %s7958_s5, 4  ;;  %s7291_s18 = smov [#allocation11]   ;;  %s515_s2 = int_to_ptr.hbm [resolvable:$true] %s514_s2 }
  0x2a   : > { %6647 = dma.hbm_to_vmem [thread:$0]  (!%p7442_p6), %s487_s26, 4096, %s489_s17, [#allocation9], %s7289_s15, %s7289_s15, %s7290_s13  }
  0x2b   : > { %s516_s1 = sshll.u32 %s7291_s18, 4  ;;  %s7292_s20 = smov [#allocation14]   ;;  %s517_s1 = int_to_ptr.vmem [resolvable:$true] %s516_s1 }
  0x2c   : > { %6653 = dma.hbm_to_vmem [thread:$0]  (!%p7442_p6), %s515_s2, 4096, %s517_s1, [#allocation12], %s7289_s15, %s7289_s15, %s7290_s13  }
  0x2d   : > { %s547_s19 = sshll.u32 %s7959_s9, 4  ;;  %s549_s23 = sshll.u32 %s7292_s20, 4  ;;  %s548_s19 = int_to_ptr.hbm [resolvable:$true] %s547_s19  ;;  %s550_s23 = int_to_ptr.vmem [resolvable:$true] %s549_s23 }
  0x2e   : > { %s7960_s11 = sld [smem:[#allocation44_spill]]  ;;  %s7293_s18 = smov [#allocation17]  }
  0x2f   : > { %6659 = dma.hbm_to_vmem [thread:$0]  (!%p7442_p6), %s548_s19, 32, %s550_s23, [#allocation15]  }
  0x30   : > { %s7961_s14 = sld [smem:[#allocation47_spill]]  ;;  %s573_s9 = sshll.u32 %s7293_s18, 4  ;;  %s574_s9 = int_to_ptr.vmem [resolvable:$true] %s573_s9 }
  0x31   : > { %s7294_s2 = smov [#allocation20]   ;;  %s7962_s4 = sld [smem:[#allocation39_spill]] }
  0x32   : > { %s601_s1 = sshll.u32 %s7294_s2, 4  ;;  %s7963_s8 = sld [smem:[#allocation41_spill]]  ;;  %s602_s1 = int_to_ptr.vmem [resolvable:$true] %s601_s1 }
  0x33   : > { %s7295_s24 = smov [#allocation10]   ;;  %s7964_s10 = sld [smem:[#allocation43_spill]] }
  0x34   : > { %s571_s17 = sshll.u32 %s7960_s11, 4  ;;  %s7965_s12 = sld [smem:[#allocation45_spill]]  ;;  %s572_s17 = int_to_ptr.hbm [resolvable:$true] %s571_s17 }
  0x35   : > { %6665 = dma.hbm_to_vmem [thread:$0]  (!%p7442_p6), %s572_s17, 32, %s574_s9, [#allocation18]  }
  0x36   : > { %s599_s25 = sshll.u32 %s7961_s14, 4  ;;  %s502_s9 = sshll.u32 %s7295_s24, 4  ;;  %s600_s25 = int_to_ptr.hbm [resolvable:$true] %s599_s25  ;;  %s503_s9 = int_to_ptr.vmem [resolvable:$true] %s502_s9 }
  0x37   : > { %s500_s20 = sshll.u32 %s7962_s4, 4  ;;  %s7296_s17 = smov [#allocation13]   ;;  %s501_s20 = int_to_ptr.hbm [resolvable:$true] %s500_s20 }
  0x38   : > { %6671 = dma.hbm_to_vmem [thread:$0]  (!%p7442_p6), %s600_s25, 16384, %s602_s1, [#allocation21], %s7289_s15, %s7289_s15, %s7290_s13  }
  0x39   : > { %s535_s26 = sshll.u32 %s7963_s8, 4  ;;  %s537_s18 = sshll.u32 %s7296_s17, 4  ;;  %s536_s26 = int_to_ptr.hbm [resolvable:$true] %s535_s26  ;;  %s538_s18 = int_to_ptr.vmem [resolvable:$true] %s537_s18 }
  0x3a   : > { %6650 = dma.hbm_to_vmem [thread:$0]  (!%p7442_p6), %s501_s20, 4096, %s503_s9, [#allocation9], %s7289_s15, %s7289_s15, %s7290_s13  }
  0x3b   : > { %s559_s25 = sshll.u32 %s7964_s10, 4  ;;  %s582_s19 = sshll.u32 %s7965_s12, 4  ;;  %s560_s25 = int_to_ptr.hbm [resolvable:$true] %s559_s25  ;;  %s583_s19 = int_to_ptr.hbm [resolvable:$true] %s582_s19 }
  0x3c   : > { %6656 = dma.hbm_to_vmem [thread:$0]  (!%p7442_p6), %s536_s26, 32, %s538_s18, [#allocation12]  }
  0x3d   : > { %s7297_s23 = smov [#allocation16]   ;;  %s7298_s13 = smov [#allocation19]  }
  0x3e   : > { %s561_s24 = sshll.u32 %s7297_s23, 4  ;;  %s584_s15 = sshll.u32 %s7298_s13, 4  ;;  %s562_s24 = int_to_ptr.vmem [resolvable:$true] %s561_s24  ;;  %s585_s15 = int_to_ptr.vmem [resolvable:$true] %s584_s15 }
  0x3f   : > { %6662 = dma.hbm_to_vmem [thread:$0]  (!%p7442_p6), %s560_s25, 32, %s562_s24, [#allocation15]  }
  0x40   : > { %s7299_s20 = smov 512   ;;  %s7300_s26 = smov 32  }
  0x41   : > { %6668 = dma.hbm_to_vmem [thread:$0]  (!%p7442_p6), %s583_s19, 16384, %s585_s15, [#allocation18], %s7299_s20, %s7299_s20, %s7300_s26  }
  0x42   : > { %s7966_s16 = sld [smem:[#allocation49_spill]]  ;;  %s7301_s2 = smov [#allocation22]  }
  0x43   : > { %s619_s3 = sshll.u32 %s7301_s2, 4  ;;  %s4612_s25 = sadd.s32 4294967294, %s7285_s30   ;;  %s620_s3 = int_to_ptr.vmem [resolvable:$true] %s619_s3 }
  0x44   : > { %s7512_s1 = sadd.s32 1, %s7285_s30   ;;  %s49_s5 = sadd.s32 1, %s7281_s29 }
  0x45   : > { %s46_s19 = ssub.s32 %s7285_s30, %s7512_s1  ;;  %p56_p7 = scmp.ne.s32.totalorder %s7281_s29, %s7277_s28 }
  0x46   : > { %p47_p8 = scmp.eq.s32.totalorder %s46_s19, 0  ;;  %p57_p9 = scmp.eq.s32.totalorder %s7285_s30, 0 }
  0x47   : > { %p62_p10 = scmp.ne.s32.totalorder %s7277_s28, %s7273_s27  ;;  %p448_p11 = scmp.eq.s32.totalorder %s7425_s21, 1 }
  0x48   : > { %s617_s18 = sshll.u32 %s7966_s16, 4  ;;  %p7526_p12 = por %p57_p9, %p56_p7  ;;  %s618_s18 = int_to_ptr.hbm [resolvable:$true] %s617_s18 }
  0x49   : > { %6674 = dma.hbm_to_vmem [thread:$0]  (!%p7442_p6), %s618_s18, 32, %s620_s3, [#allocation21]  }
  0x4a   : > { %s7524_s23 = scalar_select %p47_p8, %s7281_s29, %s49_s5  }
  0x4b   : > { %p7532_p13 = por %p63_p1, %p62_p10  ;;  %p7536_p0 = por %p448_p11, %p56_p7 }
  0x4c   : > { %7967 = sst [smem:[#allocation34_spill]] %s7524_s23  ;;  %p454_p2 = scmp.eq.s32.totalorder %s4612_s25, 1 }
  0x4d   : > { %p6697_p4 = scmp.lt.s32.totalorder %s7285_s30, 2  ;;  %s633_s15 = sand.u32 1, %s7281_s29  }
  0x4e   : > { %p7542_p6 = por %p454_p2, %p62_p10  ;;  %s4626_s26 = sshll.u32 %s633_s15, 4 }
  0x4f   : > { %s6204_s9 = sshll.u32 %s7285_s30, 4  ;;  %s7972_s2 = sld [smem:[#allocation35_spill]] }
  0x50   : > { %s637_s19 = scalar_lea.vmem [#allocation2], %s4626_s26  ;;  %p7552_p7 = pnand %p6697_p4, %p7526_p12 }
  0x51   : > { %s646_s4 = sshll.u32 %s637_s19, 4  ;;  %s7974_s11 = sld [smem:[#allocation36_spill]]  ;;  %s647_s4 = int_to_ptr.vmem [resolvable:$true] %s646_s4 }
  0x52   : > { %s653_s14 = sand.u32 1, %s7285_s30   ;;  %s634_s16 = scalar_lea.sflag [#allocation3], %s633_s15 }
  0x53   : > { %p7135_p9 = pneg %p7552_p7 }
  0x55   : > { %s642_s3 = scalar_lea.hbm %s7972_s2, %s6204_s9  ;;  %s7138_s19 = scalar_lea.hbm %s7972_s2, 32 }
  0x56   : > { %s644_s5 = sshll.u32 %s642_s3, 4  ;;  %s645_s5 = int_to_ptr.hbm [resolvable:$true] %s644_s5 }
  0x57   : > { %s662_s12 = scalar_lea.hbm %s7974_s11, %s6204_s9  ;;  %s7131_s17 = sshra.s32 %s645_s5, 4  ;;  %s7132_s17 = int_to_ptr.hbm [resolvable:$true] %s7131_s17 }
  0x58   : > { %s7133_s18 = scalar_lea.hbm %s7132_s17, 16  ;;  %p7139_p12 = scmp.lt.s32.totalorder %s7132_s17, %s7972_s2 }
  0x59   : > { %p7134_p8 = scmp.ne.s32.totalorder %s7132_s17, %s7133_s18  ;;  %p7140_p2 = scmp.lt.s32.totalorder %s7138_s19, %s7133_s18 }
  0x5b   : > { %p7136_p10 = pnand %p7135_p9, %p7134_p8  ;;  %p7141_p4 = por %p7140_p2, %p7139_p12 }
  0x5d   : > { %p7137_p11 = pneg %p7136_p10 }
  0x5f   : > { %p7142_p5 = pnand %p7141_p4, %p7137_p11 }
  0x61   : > { %7145 = shalt.err (!%p7142_p5)
}
  0x62   : > { %6678 = dma.hbm_to_vmem [thread:$0]  (!%p7552_p7), %s645_s5, 256, %s647_s4, %s634_s16  }
  0x63   : > { %s664_s15 = sshll.u32 %s662_s12, 4  ;;  %s657_s9 = scalar_lea.vmem [#allocation5], %s4626_s26  ;;  %s665_s15 = int_to_ptr.hbm [resolvable:$true] %s664_s15 }
  0x64   : > { %s666_s23 = sshll.u32 %s657_s9, 4  ;;  %s654_s29 = scalar_lea.sflag [#allocation6], %s653_s14  ;;  %s667_s23 = int_to_ptr.vmem [resolvable:$true] %s666_s23 }
  0x65   : > { %s7161_s24 = sshra.s32 %s665_s15, 4  ;;  %s7168_s19 = scalar_lea.hbm %s7974_s11, 32  ;;  %s7162_s24 = int_to_ptr.hbm [resolvable:$true] %s7161_s24 }
  0x66   : > { %s7163_s3 = scalar_lea.hbm %s7162_s24, 16  ;;  %p7169_p5 = scmp.lt.s32.totalorder %s7162_s24, %s7974_s11 }
  0x67   : > { %p7164_p8 = scmp.ne.s32.totalorder %s7162_s24, %s7163_s3  ;;  %p7170_p11 = scmp.lt.s32.totalorder %s7168_s19, %s7163_s3 }
  0x69   : > { %p7166_p10 = pnand %p7164_p8, %p7135_p9  ;;  %p7171_p2 = por %p7170_p11, %p7169_p5 }
  0x6b   : > { %p7167_p12 = pneg %p7166_p10 }
  0x6d   : > { %p7172_p4 = pnand %p7171_p2, %p7167_p12 }
  0x6f   : > { %7175 = shalt.err (!%p7172_p4)
}
  0x70   : > { %6681 = dma.hbm_to_vmem [thread:$0]  (!%p7552_p7), %s665_s15, 256, %s667_s23, %s654_s29  }
  0x71   : > { %675 = sbr.rel (%p7430_p3) target bundleno = 2237 (0x8bd), region = 92  ;;  %s7587_s12 = sand.u32 (!%p7430_p3), 1, %s7277_s28  }
  0x72   : > { %s7590_s14 = sshll.u32 (!%p7430_p3), %s7587_s12, 4  ;;  %s678_s16 = scalar_lea.sflag (!%p7430_p3), [#allocation3], %s7587_s12 }
  0x73   : > { %s7594_s26 = scalar_lea.vmem (!%p7430_p3), [#allocation2], %s7590_s14 }
  0x76   : > { %7236 = dma.done.wait (%p7532_p13), %s678_s16, 256  }
  0x77   : > { %7238 = vsyncadd (%p7532_p13), %s678_s16, 4294967040  ;;  %s687_s29 = sand.u32 1, %s7425_s21   ;;  %s691_s23 = scalar_lea.vmem [#allocation5], %s7590_s14 }
  0x78   : > { %s688_s22 = scalar_lea.sflag [#allocation6], %s687_s29 }
  0x79   : > { %7240 = dma.done.wait (%p7532_p13), %s688_s22, 256  }
  0x7a   : > { %7242 = vsyncadd (%p7532_p13), %s688_s22, 4294967040 }
  0x7b   : > { %7244 = dma.done.wait (%p63_p1), [#allocation6], 4096  }
  0x7c   : > { %7246 = vsyncadd (%p63_p1), [#allocation6], 4294963200 }
  0x7d   : > { %7248 = dma.done.wait (%p63_p1), [#allocation9], 8192  }
  0x7e   : > { %7250 = vsyncadd (%p63_p1), [#allocation9], 4294959104 }
  0x7f   : > { %7252 = dma.done.wait (%p63_p1), [#allocation12], 4128  }
  0x80   : > { %7254 = vsyncadd (%p63_p1), [#allocation12], 4294963168 }
  0x81   : > { %7256 = dma.done.wait (%p63_p1), [#allocation15], 64  }
  0x82   : > { %7258 = vsyncadd (%p63_p1), [#allocation15], 4294967232 }
  0x83   : > { %7260 = dma.done.wait (%p63_p1), [#allocation18], 16416  }
  0x84   : > { %7262 = vsyncadd (%p63_p1), [#allocation18], 4294950880 }
  0x85   : > { %7264 = dma.done.wait (%p63_p1), [#allocation21], 16416  }
  0x86   : > { %7266 = vsyncadd (%p63_p1), [#allocation21], 4294950880  ;;  %v4705_v0 = vld [vmem:[#allocation7 + $0x70] sm:$0xf]  ;;  %v6221_v1 = vld [vmem:[#allocation7 + $0x74] sm:$0xf0] }
  0x87   : > { %v4769_v2 = vld [vmem:[#allocation7 + $0xf0] sm:$0xf]  ;;  %v4706_v3 = vor.u32 %v6221_v1, %v4705_v0  ;;  %v6237_v4 = vld [vmem:[#allocation7 + $0xf4] sm:$0xf0]  ;;  %v6220_v5 = vld [vmem:[#allocation7 + $0x74] sm:$0xf] }
  0x88   : > { %v4707_v6 = vld [vmem:[#allocation7 + $0x78] sm:$0xf0]  ;;  %v4770_v7 = vor.u32 %v6237_v4, %v4769_v2  ;;  %v6236_v9 = vld [vmem:[#allocation7 + $0xf4] sm:$0xf]  ;;  %v4697_v11 = vld [vmem:[#allocation7 + $0x60] sm:$0xf] }
  0x89   : > { %v4710_v8 = vor.u32 %v6220_v5, %v4707_v6  ;;  %v4771_v10 = vld [vmem:[#allocation7 + $0xf8] sm:$0xf0]  ;;  %1010 = vmatpush.bf16.msra.mxu0 %v4706_v3  ;;  %v6219_v13 = vld [vmem:[#allocation7 + $0x64] sm:$0xf0]  ;;  %v4761_v14 = vld [vmem:[#allocation7 + $0xe0] sm:$0xf] }
  0x8a   : > { %v4774_v12 = vor.u32 %v6236_v9, %v4771_v10  ;;  %v6235_v15 = vld [vmem:[#allocation7 + $0xe4] sm:$0xf0]  ;;  %1023 = vmatpush.bf16.msra.mxu1 %v4770_v7  ;;  %v4698_v16 = vor.u32 %v6219_v13, %v4697_v11  ;;  %v6218_v18 = vld [vmem:[#allocation7 + $0x64] sm:$0xf]  ;;  %v4699_v19 = vld [vmem:[#allocation7 + $0x68] sm:$0xf0] }
  0x8b   : > { %1036 = vmatpush.bf16.msra.mxu2 %v4710_v8  ;;  %v4762_v17 = vor.u32 %v6235_v15, %v4761_v14  ;;  %v6234_v20 = vld [vmem:[#allocation7 + $0xe4] sm:$0xf]  ;;  %v4702_v21 = vor.u32 %v6218_v18, %v4699_v19  ;;  %v4763_v22 = vld [vmem:[#allocation7 + $0xe8] sm:$0xf0]  ;;  %v4689_v23 = vld [vmem:[#allocation7 + $0x50] sm:$0xf] }
  0x8c   : > { %1049 = vmatpush.bf16.msra.mxu3 %v4774_v12  ;;  %v6217_v24 = vld [vmem:[#allocation7 + $0x54] sm:$0xf0]  ;;  %v4766_v25 = vor.u32 %v6234_v20, %v4763_v22  ;;  %v4753_v26 = vld [vmem:[#allocation7 + $0xd0] sm:$0xf]  ;;  %v6216_v28 = vld [vmem:[#allocation7 + $0x54] sm:$0xf] }
  0x8d   : > { %v6233_v27 = vld [vmem:[#allocation7 + $0xd4] sm:$0xf0]  ;;  %1011 = vmatpush.bf16.msra.mxu0 %v4698_v16  ;;  %v4690_v29 = vor.u32 %v6217_v24, %v4689_v23  ;;  %v4691_v30 = vld [vmem:[#allocation7 + $0x58] sm:$0xf0]  ;;  %v6232_v31 = vld [vmem:[#allocation7 + $0xd4] sm:$0xf] }
  0x8e   : > { %v4755_v32 = vld [vmem:[#allocation7 + $0xd8] sm:$0xf0]  ;;  %1024 = vmatpush.bf16.msra.mxu1 %v4762_v17  ;;  %v4754_v33 = vor.u32 %v6233_v27, %v4753_v26  ;;  %v4694_v34 = vor.u32 %v6216_v28, %v4691_v30  ;;  %v4681_v35 = vld [vmem:[#allocation7 + $0x40] sm:$0xf]  ;;  %v6215_v36 = vld [vmem:[#allocation7 + $0x44] sm:$0xf0] }
  0x8f   : > { %1037 = vmatpush.bf16.msra.mxu2 %v4702_v21  ;;  %v4745_v37 = vld [vmem:[#allocation7 + $0xc0] sm:$0xf]  ;;  %v4758_v38 = vor.u32 %v6232_v31, %v4755_v32  ;;  %v6231_v39 = vld [vmem:[#allocation7 + $0xc4] sm:$0xf0]  ;;  %v6214_v40 = vld [vmem:[#allocation7 + $0x44] sm:$0xf]  ;;  %v4682_v44 = vor.u32 %v6215_v36, %v4681_v35 }
  0x90   : > { %1050 = vmatpush.bf16.msra.mxu3 %v4766_v25  ;;  %v4683_v41 = vld [vmem:[#allocation7 + $0x48] sm:$0xf0]  ;;  %v6230_v42 = vld [vmem:[#allocation7 + $0xc4] sm:$0xf]  ;;  %v4746_v45 = vor.u32 %v6231_v39, %v4745_v37  ;;  %v4673_v47 = vld [vmem:[#allocation7 + $0x30] sm:$0xf] }
  0x91   : > { %v4747_v43 = vld [vmem:[#allocation7 + $0xc8] sm:$0xf0]  ;;  %1012 = vmatpush.bf16.msra.mxu0 %v4690_v29  ;;  %v4686_v46 = vor.u32 %v6214_v40, %v4683_v41  ;;  %v6213_v48 = vld [vmem:[#allocation7 + $0x34] sm:$0xf0]  ;;  %v4737_v49 = vld [vmem:[#allocation7 + $0xb0] sm:$0xf] }
  0x92   : > { %1025 = vmatpush.bf16.msra.mxu1 %v4754_v33  ;;  %v4750_v50 = vor.u32 %v6230_v42, %v4747_v43  ;;  %v6229_v51 = vld [vmem:[#allocation7 + $0xb4] sm:$0xf0]  ;;  %v6212_v52 = vld [vmem:[#allocation7 + $0x34] sm:$0xf]  ;;  %v4675_v53 = vld [vmem:[#allocation7 + $0x38] sm:$0xf0]  ;;  %v4674_v56 = vor.u32 %v6213_v48, %v4673_v47 }
  0x93   : > { %1038 = vmatpush.bf16.msra.mxu2 %v4694_v34  ;;  %v6228_v54 = vld [vmem:[#allocation7 + $0xb4] sm:$0xf]  ;;  %v4739_v55 = vld [vmem:[#allocation7 + $0xb8] sm:$0xf0]  ;;  %v4738_v57 = vor.u32 %v6229_v51, %v4737_v49  ;;  %v4678_v58 = vor.u32 %v6212_v52, %v4675_v53  ;;  %v4665_v59 = vld [vmem:[#allocation7 + $0x20] sm:$0xf] }
  0x94   : > { %1051 = vmatpush.bf16.msra.mxu3 %v4758_v38  ;;  %v6211_v60 = vld [vmem:[#allocation7 + $0x24] sm:$0xf0]  ;;  %v4729_v61 = vld [vmem:[#allocation7 + $0xa0] sm:$0xf]  ;;  %v4742_v62 = vor.u32 %v6228_v54, %v4739_v55  ;;  %v6210_v0 = vld [vmem:[#allocation7 + $0x24] sm:$0xf] }
  0x95   : > { %1013 = vmatpush.bf16.msra.mxu0 %v4682_v44  ;;  %v6227_v63 = vld [vmem:[#allocation7 + $0xa4] sm:$0xf0]  ;;  %v4667_v1 = vld [vmem:[#allocation7 + $0x28] sm:$0xf0]  ;;  %v6226_v2 = vld [vmem:[#allocation7 + $0xa4] sm:$0xf]  ;;  %v4666_v4 = vor.u32 %v6211_v60, %v4665_v59 }
  0x96   : > { %1026 = vmatpush.bf16.msra.mxu1 %v4746_v45  ;;  %v4731_v3 = vld [vmem:[#allocation7 + $0xa8] sm:$0xf0]  ;;  %v4730_v5 = vor.u32 %v6227_v63, %v4729_v61  ;;  %v4670_v6 = vor.u32 %v6210_v0, %v4667_v1  ;;  %v4657_v7 = vld [vmem:[#allocation7 + $0x10] sm:$0xf]  ;;  %v6209_v8 = vld [vmem:[#allocation7 + $0x14] sm:$0xf0] }
  0x97   : > { %1039 = vmatpush.bf16.msra.mxu2 %v4686_v46  ;;  %v4721_v9 = vld [vmem:[#allocation7 + $0x90] sm:$0xf]  ;;  %v4734_v10 = vor.u32 %v6226_v2, %v4731_v3  ;;  %v6225_v11 = vld [vmem:[#allocation7 + $0x94] sm:$0xf0]  ;;  %v6208_v12 = vld [vmem:[#allocation7 + $0x14] sm:$0xf]  ;;  %v4658_v16 = vor.u32 %v6209_v8, %v4657_v7 }
  0x98   : > { %1052 = vmatpush.bf16.msra.mxu3 %v4750_v50  ;;  %v4659_v13 = vld [vmem:[#allocation7 + $0x18] sm:$0xf0]  ;;  %v6224_v14 = vld [vmem:[#allocation7 + $0x94] sm:$0xf]  ;;  %v4649_v17 = vld [vmem:[#allocation7] sm:$0xf]  ;;  %v4722_v19 = vor.u32 %v6225_v11, %v4721_v9 }
  0x99   : > { %1014 = vmatpush.bf16.msra.mxu0 %v4674_v56  ;;  %v4723_v15 = vld [vmem:[#allocation7 + $0x98] sm:$0xf0]  ;;  %v6207_v18 = vld [vmem:[#allocation7 + $0x4] sm:$0xf0]  ;;  %v4662_v20 = vor.u32 %v6208_v12, %v4659_v13  ;;  %v4713_v21 = vld [vmem:[#allocation7 + $0x80] sm:$0xf] }
  0x9a   : > { %1027 = vmatpush.bf16.msra.mxu1 %v4738_v57  ;;  %v6223_v22 = vld [vmem:[#allocation7 + $0x84] sm:$0xf0]  ;;  %v6206_v23 = vld [vmem:[#allocation7 + $0x4] sm:$0xf]  ;;  %v4726_v24 = vor.u32 %v6224_v14, %v4723_v15  ;;  %v4651_v25 = vld [vmem:[#allocation7 + $0x8] sm:$0xf0]  ;;  %v4650_v31 = vor.u32 %v6207_v18, %v4649_v17 }
  0x9b   : > { %1040 = vmatpush.bf16.msra.mxu2 %v4678_v58  ;;  %v6222_v26 = vld [vmem:[#allocation7 + $0x84] sm:$0xf]  ;;  %v4715_v27 = vld [vmem:[#allocation7 + $0x88] sm:$0xf0]  ;;  %v4833_v28 = vld [vmem:[#allocation8 + $0x70] sm:$0xf]  ;;  %v4714_v35 = vor.u32 %v6223_v22, %v4713_v21  ;;  %v4654_v36 = vor.u32 %v6206_v23, %v4651_v25 }
  0x9c   : > { %1053 = vmatpush.bf16.msra.mxu3 %v4742_v62  ;;  %v6253_v29 = vld [vmem:[#allocation8 + $0x74] sm:$0xf0]  ;;  %v4897_v30 = vld [vmem:[#allocation8 + $0xf0] sm:$0xf]  ;;  %v6252_v33 = vld [vmem:[#allocation8 + $0x74] sm:$0xf]  ;;  %v4718_v40 = vor.u32 %v6222_v26, %v4715_v27 }
  0x9d   : > { %1015 = vmatpush.bf16.msra.mxu0 %v4666_v4  ;;  %v6269_v32 = vld [vmem:[#allocation8 + $0xf4] sm:$0xf0]  ;;  %v4835_v34 = vld [vmem:[#allocation8 + $0x78] sm:$0xf0]  ;;  %v6268_v37 = vld [vmem:[#allocation8 + $0xf4] sm:$0xf]  ;;  %v4834_v41 = vor.u32 %v6253_v29, %v4833_v28 }
  0x9e   : > { %1028 = vmatpush.bf16.msra.mxu1 %v4730_v5  ;;  %v4899_v38 = vld [vmem:[#allocation8 + $0xf8] sm:$0xf0]  ;;  %v806_v39 = vld [vmem:[%s7594_s26] sm:$0xff]  ;;  %v4898_v43 = vor.u32 %v6269_v32, %v4897_v30  ;;  %v4838_v44 = vor.u32 %v6252_v33, %v4835_v34  ;;  %v6251_v46 = vld [vmem:[#allocation8 + $0x64] sm:$0xf0]  ;;  %s7302_s25 = smov 64  }
  0x9f   : > { %1041 = vmatpush.bf16.msra.mxu2 %v4670_v6  ;;  %v807_v42 = vld [vmem:[%s7594_s26 + $0x8] sm:$0xff]  ;;  %v4825_v45 = vld [vmem:[#allocation8 + $0x60] sm:$0xf]  ;;  %v4902_v48 = vor.u32 %v6268_v37, %v4899_v38  ;;  %v6250_v50 = vld [vmem:[#allocation8 + $0x64] sm:$0xf]  ;;  %v810_v52 = vpack.c.bf16 %v806_v39, %v806_v39  ;;  %s7303_s10 = smov 32  }
  0xa0   : > { %1054 = vmatpush.bf16.msra.mxu3 %v4734_v10  ;;  %v4889_v47 = vld [vmem:[#allocation8 + $0xe0] sm:$0xf]  ;;  %v6267_v49 = vld [vmem:[#allocation8 + $0xe4] sm:$0xf0]  ;;  %v4827_v51 = vld [vmem:[#allocation8 + $0x68] sm:$0xf0]  ;;  %v811_v55 = vpack.c.bf16 %v807_v42, %v807_v42  ;;  %v4826_v56 = vor.u32 %v6251_v46, %v4825_v45 }
  0xa1   : > { %1016 = vmatpush.bf16.msra.mxu0 %v4658_v16  ;;  %v6266_v53 = vld [vmem:[#allocation8 + $0xe4] sm:$0xf]  ;;  %v4891_v54 = vld [vmem:[#allocation8 + $0xe8] sm:$0xf0]  ;;  %v4890_v57 = vor.u32 %v6267_v49, %v4889_v47  ;;  %v4830_v58 = vor.u32 %v6250_v50, %v4827_v51  ;;  %v4817_v59 = vld [vmem:[#allocation8 + $0x50] sm:$0xf] }
  0xa2   : > { %1029 = vmatpush.bf16.msra.mxu1 %v4722_v19  ;;  %v6249_v60 = vld [vmem:[#allocation8 + $0x54] sm:$0xf0]  ;;  %v4881_v61 = vld [vmem:[#allocation8 + $0xd0] sm:$0xf]  ;;  %v4894_v62 = vor.u32 %v6266_v53, %v4891_v54  ;;  %v6248_v0 = vld [vmem:[#allocation8 + $0x54] sm:$0xf] }
  0xa3   : > { %1042 = vmatpush.bf16.msra.mxu2 %v4662_v20  ;;  %v6265_v63 = vld [vmem:[#allocation8 + $0xd4] sm:$0xf0]  ;;  %v4819_v1 = vld [vmem:[#allocation8 + $0x58] sm:$0xf0]  ;;  %v6264_v2 = vld [vmem:[#allocation8 + $0xd4] sm:$0xf]  ;;  %v4818_v4 = vor.u32 %v6249_v60, %v4817_v59 }
  0xa4   : > { %1055 = vmatpush.bf16.msra.mxu3 %v4726_v24  ;;  %v4883_v3 = vld [vmem:[#allocation8 + $0xd8] sm:$0xf0]  ;;  %v4882_v5 = vor.u32 %v6265_v63, %v4881_v61  ;;  %v4822_v6 = vor.u32 %v6248_v0, %v4819_v1  ;;  %v4809_v7 = vld [vmem:[#allocation8 + $0x40] sm:$0xf]  ;;  %v6247_v8 = vld [vmem:[#allocation8 + $0x44] sm:$0xf0] }
  0xa5   : > { %1017 = vmatpush.bf16.msra.mxu0 %v4650_v31  ;;  %v4873_v9 = vld [vmem:[#allocation8 + $0xc0] sm:$0xf]  ;;  %v4886_v10 = vor.u32 %v6264_v2, %v4883_v3  ;;  %v6263_v11 = vld [vmem:[#allocation8 + $0xc4] sm:$0xf0]  ;;  %v6246_v12 = vld [vmem:[#allocation8 + $0x44] sm:$0xf]  ;;  %v4810_v16 = vor.u32 %v6247_v8, %v4809_v7 }
  0xa6   : > { %1030 = vmatpush.bf16.msra.mxu1 %v4714_v35  ;;  %v4811_v13 = vld [vmem:[#allocation8 + $0x48] sm:$0xf0]  ;;  %v6262_v14 = vld [vmem:[#allocation8 + $0xc4] sm:$0xf]  ;;  %v4874_v17 = vor.u32 %v6263_v11, %v4873_v9  ;;  %v4801_v19 = vld [vmem:[#allocation8 + $0x30] sm:$0xf] }
  0xa7   : > { %1043 = vmatpush.bf16.msra.mxu2 %v4654_v36  ;;  %v4875_v15 = vld [vmem:[#allocation8 + $0xc8] sm:$0xf0]  ;;  %v4814_v18 = vor.u32 %v6246_v12, %v4811_v13  ;;  %v6245_v20 = vld [vmem:[#allocation8 + $0x34] sm:$0xf0]  ;;  %v4865_v21 = vld [vmem:[#allocation8 + $0xb0] sm:$0xf] }
  0xa8   : > { %1056 = vmatpush.bf16.msra.mxu3 %v4718_v40  ;;  %1018 = vmatmul.bf16.vlgmr.msra.gmra.mxu0 %v810_v52  ;;  %v4878_v22 = vor.u32 %v6262_v14, %v4875_v15  ;;  %v6261_v23 = vld [vmem:[#allocation8 + $0xb4] sm:$0xf0]  ;;  %v6244_v24 = vld [vmem:[#allocation8 + $0x34] sm:$0xf]  ;;  %v4803_v25 = vld [vmem:[#allocation8 + $0x38] sm:$0xf0]  ;;  %v4802_v28 = vor.u32 %v6245_v20, %v4801_v19 }
  0xa9   : > { %1262 = vmatpush.bf16.msrb.mxu0 %v4834_v41  ;;  %1031 = vmatmul.bf16.vlgmr.msra.gmra.mxu1 %v811_v55  ;;  %v6260_v26 = vld [vmem:[#allocation8 + $0xb4] sm:$0xf]  ;;  %v4867_v27 = vld [vmem:[#allocation8 + $0xb8] sm:$0xf0]  ;;  %v4866_v29 = vor.u32 %v6261_v23, %v4865_v21  ;;  %v4806_v30 = vor.u32 %v6244_v24, %v4803_v25  ;;  %v4793_v31 = vld [vmem:[#allocation8 + $0x20] sm:$0xf] }
  0xaa   : > { %1275 = vmatpush.bf16.msrb.mxu1 %v4898_v43  ;;  %1044 = vmatmul.bf16.vlgmr.msra.gmra.mxu2 %v810_v52  ;;  %v6243_v32 = vld [vmem:[#allocation8 + $0x24] sm:$0xf0]  ;;  %v4857_v33 = vld [vmem:[#allocation8 + $0xa0] sm:$0xf]  ;;  %v4870_v34 = vor.u32 %v6260_v26, %v4867_v27  ;;  %v6242_v36 = vld [vmem:[#allocation8 + $0x24] sm:$0xf] }
  0xab   : > { %1288 = vmatpush.bf16.msrb.mxu2 %v4838_v44  ;;  %1057 = vmatmul.bf16.vlgmr.msra.gmra.mxu3 %v811_v55  ;;  %v6259_v35 = vld [vmem:[#allocation8 + $0xa4] sm:$0xf0]  ;;  %v4795_v37 = vld [vmem:[#allocation8 + $0x28] sm:$0xf0]  ;;  %v6258_v38 = vld [vmem:[#allocation8 + $0xa4] sm:$0xf]  ;;  %v4794_v40 = vor.u32 %v6243_v32, %v4793_v31 }
  0xac   : > { %1301 = vmatpush.bf16.msrb.mxu3 %v4902_v48  ;;  %v4859_v39 = vld [vmem:[#allocation8 + $0xa8] sm:$0xf0]  ;;  %v4858_v41 = vor.u32 %v6259_v35, %v4857_v33  ;;  %v4798_v42 = vor.u32 %v6242_v36, %v4795_v37  ;;  %v4785_v43 = vld [vmem:[#allocation8 + $0x10] sm:$0xf]  ;;  %v6241_v44 = vld [vmem:[#allocation8 + $0x14] sm:$0xf0] }
  0xad   : > { %1263 = vmatpush.bf16.msrb.mxu0 %v4826_v56  ;;  %v4849_v45 = vld [vmem:[#allocation8 + $0x90] sm:$0xf]  ;;  %v4862_v46 = vor.u32 %v6258_v38, %v4859_v39  ;;  %v6257_v47 = vld [vmem:[#allocation8 + $0x94] sm:$0xf0]  ;;  %v6240_v48 = vld [vmem:[#allocation8 + $0x14] sm:$0xf]  ;;  %v4786_v52 = vor.u32 %v6241_v44, %v4785_v43 }
  0xae   : > { %1276 = vmatpush.bf16.msrb.mxu1 %v4890_v57  ;;  %v4787_v49 = vld [vmem:[#allocation8 + $0x18] sm:$0xf0]  ;;  %v6256_v50 = vld [vmem:[#allocation8 + $0x94] sm:$0xf]  ;;  %v4777_v53 = vld [vmem:[#allocation8] sm:$0xf]  ;;  %v4850_v54 = vor.u32 %v6257_v47, %v4849_v45 }
  0xaf   : > { %1289 = vmatpush.bf16.msrb.mxu2 %v4830_v58  ;;  %v4851_v51 = vld [vmem:[#allocation8 + $0x98] sm:$0xf0]  ;;  %v4790_v55 = vor.u32 %v6240_v48, %v4787_v49  ;;  %v6239_v56 = vld [vmem:[#allocation8 + $0x4] sm:$0xf0]  ;;  %v4841_v57 = vld [vmem:[#allocation8 + $0x80] sm:$0xf] }
  0xb0   : > { %1302 = vmatpush.bf16.msrb.mxu3 %v4894_v62  ;;  %v6255_v58 = vld [vmem:[#allocation8 + $0x84] sm:$0xf0]  ;;  %v4854_v59 = vor.u32 %v6256_v50, %v4851_v51  ;;  %v6238_v60 = vld [vmem:[#allocation8 + $0x4] sm:$0xf]  ;;  %v4779_v61 = vld [vmem:[#allocation8 + $0x8] sm:$0xf0]  ;;  %v4778_v2 = vor.u32 %v6239_v56, %v4777_v53 }
  0xb1   : > { %1264 = vmatpush.bf16.msrb.mxu0 %v4818_v4  ;;  %v6254_v62 = vld [vmem:[#allocation8 + $0x84] sm:$0xf]  ;;  %v4843_v63 = vld [vmem:[#allocation8 + $0x88] sm:$0xf0]  ;;  %v4961_v0 = vld [vmem:[#allocation10 + $0x70] sm:$0xf]  ;;  %v4842_v4 = vor.u32 %v6255_v58, %v4841_v57 }
  0xb2   : > { %1277 = vmatpush.bf16.msrb.mxu1 %v4882_v5  ;;  %v6285_v1 = vld [vmem:[#allocation10 + $0x74] sm:$0xf0]  ;;  %v808_v3 = vld [vmem:[%s691_s23] sm:$0xff]  ;;  %v4782_v5 = vor.u32 %v6238_v60, %v4779_v61  ;;  %v4846_v7 = vor.u32 %v6254_v62, %v4843_v63  ;;  %v6283_v11 = vld [vmem:[#allocation10 + $0x64] sm:$0xf0]  ;;  %vm1600_vm0 = vcmask 261120  }
  0xb3   : > { %1290 = vmatpush.bf16.msrb.mxu2 %v4822_v6  ;;  %v809_v6 = vld [vmem:[%s691_s23 + $0x8] sm:$0xff]  ;;  %v4962_v8 = vor.u32 %v6285_v1, %v4961_v0  ;;  %v7636_v9 = vpack.c.bf16 %v808_v3, %v808_v3  ;;  %v4945_v14 = vld [vmem:[#allocation10 + $0x50] sm:$0xf]  ;;  %v4921_v23 = vld [vmem:[#allocation10 + $0x20] sm:$0xf]  ;;  %s7304_s24 = smov 96  }
  0xb4   : > { %1303 = vmatpush.bf16.msrb.mxu3 %v4886_v10  ;;  %v4953_v10 = vld [vmem:[#allocation10 + $0x60] sm:$0xf]  ;;  %v7638_v12 = vpack.c.bf16 %v809_v6, %v809_v6  ;;  %v6281_v15 = vld [vmem:[#allocation10 + $0x54] sm:$0xf0]  ;;  %v4929_v20 = vld [vmem:[#allocation10 + $0x30] sm:$0xf] }
  0xb5   : > { %1265 = vmatpush.bf16.msrb.mxu0 %v4810_v16  ;;  %v4954_v13 = vor.u32 %v6283_v11, %v4953_v10  ;;  %v4946_v16 = vor.u32 %v6281_v15, %v4945_v14  ;;  %v6277_v21 = vld [vmem:[#allocation10 + $0x34] sm:$0xf0]  ;;  %v6275_v24 = vld [vmem:[#allocation10 + $0x24] sm:$0xf0]  ;;  %v4913_v26 = vld [vmem:[#allocation10 + $0x10] sm:$0xf] }
  0xb6   : > { %1278 = vmatpush.bf16.msrb.mxu1 %v4874_v17  ;;  %v4937_v17 = vld [vmem:[#allocation10 + $0x40] sm:$0xf]  ;;  %v4922_v25 = vor.u32 %v6275_v24, %v4921_v23  ;;  %v6273_v27 = vld [vmem:[#allocation10 + $0x14] sm:$0xf0]  ;;  %v6271_v31 = vld [vmem:[#allocation10 + $0x4] sm:$0xf0] }
  0xb7   : > { %1291 = vmatpush.bf16.msrb.mxu2 %v4814_v18  ;;  %v6279_v18 = vld [vmem:[#allocation10 + $0x44] sm:$0xf0]  ;;  %v1096_v48 = vld [vmem:[%s7920_s7] sm:$0x3]  ;;  %v6301_v56 = vld [vmem:[#allocation10 + $0xf4] sm:$0xf0] }
  0xb8   : > { %1304 = vmatpush.bf16.msrb.mxu3 %v4878_v22  ;;  %v4938_v19 = vor.u32 %v6279_v18, %v4937_v17  ;;  %v4930_v22 = vor.u32 %v6277_v21, %v4929_v20  ;;  %v1098_v49 = vperm.slane %v1096_v48, 0  ;;  %v1099_v53 = vperm.slane %v1096_v48, 1  ;;  %v5017_v62 = vld [vmem:[#allocation10 + $0xe0] sm:$0xf]  ;;  %v6299_v63 = vld [vmem:[#allocation10 + $0xe4] sm:$0xf0] }
  0xb9   : > { %1266 = vmatpush.bf16.msrb.mxu0 %v4802_v28  ;;  %v4914_v28 = vor.u32 %v6273_v27, %v4913_v26  ;;  %v6284_v1 = vld [vmem:[#allocation10 + $0x74] sm:$0xf]  ;;  %v4963_v3 = vld [vmem:[#allocation10 + $0x78] sm:$0xf0]  ;;  %v5009_v11 = vld [vmem:[#allocation10 + $0xd0] sm:$0xf] }
  0xba   : > { %1279 = vmatpush.bf16.msrb.mxu1 %v4866_v29  ;;  %v844_v29 = vld [vmem:[%s7919_s6] sm:$0x3]  ;;  %v6300_v6 = vld [vmem:[#allocation10 + $0xf4] sm:$0xf]  ;;  %v4955_v15 = vld [vmem:[#allocation10 + $0x68] sm:$0xf0] }
  0xbb   : > { %1292 = vmatpush.bf16.msrb.mxu2 %v4806_v30  ;;  %v4905_v30 = vld [vmem:[#allocation10] sm:$0xf]  ;;  %v846_v32 = vperm.slane %v844_v29, 0  ;;  %v847_v37 = vperm.slane %v844_v29, 1  ;;  %v6298_v17 = vld [vmem:[#allocation10 + $0xe4] sm:$0xf] }
  0xbc   : > { %1305 = vmatpush.bf16.msrb.mxu3 %v4870_v34  ;;  %v4906_v33 = vor.u32 %v6271_v31, %v4905_v30  ;;  %v5019_v18 = vld [vmem:[#allocation10 + $0xe8] sm:$0xf0]  ;;  %v6280_v21 = vld [vmem:[#allocation10 + $0x54] sm:$0xf]  ;;  %v5001_v27 = vld [vmem:[#allocation10 + $0xc0] sm:$0xf] }
  0xbd   : > { %1267 = vmatpush.bf16.msrb.mxu0 %v4794_v40  ;;  %v5022_v29 = vor.u32 %v6298_v17, %v5019_v18  ;;  %v6296_v31 = vld [vmem:[#allocation10 + $0xd4] sm:$0xf]  ;;  %vm1753_vm1 = vcmask 64512   ;;  %vm1853_vm2 = vcmask 1043456   ;;  %vm2044_vm3 = vcmask 523264   ;;  %s7975_s18 = sld [smem:[#allocation46_spill]] }
  0xbe   : > { %1280 = vmatpush.bf16.msrb.mxu1 %v4858_v41  ;;  %vm2047_vm4 = vcmask 785408   ;;  %s7976_s4 = sld [smem:[#allocation48_spill]]  ;;  %s6590_s16 = sshll.u32 %s7425_s21, 4 }
  0xbf   : > { %1293 = vmatpush.bf16.msrb.mxu2 %v4798_v42  ;;  %s7977_s22 = sld [smem:[#allocation50_spill]]  ;;  %s804_s21 = scalar_lea.vmem [#allocation23], %s7590_s14 }
  0xc0   : > { %1306 = vmatpush.bf16.msrb.mxu3 %v4862_v46  ;;  %s7978_s5 = sld [smem:[#allocation51_spill]]  ;;  %s4399_s9 = scalar_lea.sflag [#allocation4], %s7587_s12 }
  0xc1   : > { %1268 = vmatpush.bf16.msrb.mxu0 %v4786_v52 }
  0xc2   : > { %1281 = vmatpush.bf16.msrb.mxu1 %v4850_v54 }
  0xc3   : > { %1294 = vmatpush.bf16.msrb.mxu2 %v4790_v55  ;;  %v5025_v55 = vld [vmem:[#allocation10 + $0xf0] sm:$0xf] }
  0xc4   : > { %1307 = vmatpush.bf16.msrb.mxu3 %v4854_v59  ;;  %v5026_v61 = vor.u32 %v6301_v56, %v5025_v55  ;;  %v4977_v55 = vld [vmem:[#allocation10 + $0x90] sm:$0xf]  ;;  %v6289_v56 = vld [vmem:[#allocation10 + $0x94] sm:$0xf0] }
  0xc5   : > { %1269 = vmatpush.bf16.msrb.mxu0 %v4778_v2 }
  0xc6   : > { %1282 = vmatpush.bf16.msrb.mxu1 %v4842_v4  ;;  %v5018_v4 = vor.u32 %v6299_v63, %v5017_v62  ;;  %v4969_v62 = vld [vmem:[#allocation10 + $0x80] sm:$0xf]  ;;  %v6287_v63 = vld [vmem:[#allocation10 + $0x84] sm:$0xf0]  ;;  %s7211_s14 = scalar_lea.hbm %s7978_s5, 32 }
  0xc7   : > { %1295 = vmatpush.bf16.msrb.mxu2 %v4782_v5  ;;  %v4966_v5 = vor.u32 %v6284_v1, %v4963_v3  ;;  %v4970_v1 = vor.u32 %v6287_v63, %v4969_v62  ;;  %v6272_v3 = vld [vmem:[#allocation10 + $0x14] sm:$0xf] }
  0xc8   : > { %1308 = vmatpush.bf16.msrb.mxu3 %v4846_v7  ;;  %1270 = vmatmul.bf16.vlgmr.msrb.gmra.mxu0 %v7636_v9  ;;  %v5027_v7 = vld [vmem:[#allocation10 + $0xf8] sm:$0xf0] }
  0xc9   : > { %1512 = vmatpush.bf16.msra.mxu0 %v4962_v8  ;;  %1283 = vmatmul.bf16.vlgmr.msrb.gmra.mxu1 %v7638_v12  ;;  %v6282_v8 = vld [vmem:[#allocation10 + $0x64] sm:$0xf]  ;;  %v5030_v14 = vor.u32 %v6300_v6, %v5027_v7  ;;  %v6288_v6 = vld [vmem:[#allocation10 + $0x94] sm:$0xf]  ;;  %v4979_v7 = vld [vmem:[#allocation10 + $0x98] sm:$0xf0] }
  0xca   : > { %1296 = vmatmul.bf16.vlgmr.msrb.gmra.mxu2 %v7636_v9  ;;  %1525 = vmatpush.bf16.msra.mxu1 %v5026_v61  ;;  %v4978_v61 = vor.u32 %v6289_v56, %v4977_v55 }
  0xcb   : > { %1309 = vmatmul.bf16.vlgmr.msrb.gmra.mxu3 %v7638_v12  ;;  %1538 = vmatpush.bf16.msra.mxu2 %v4966_v5 }
  0xcc   : > { %1551 = vmatpush.bf16.msra.mxu3 %v5030_v14  ;;  %v6286_v14 = vld [vmem:[#allocation10 + $0x84] sm:$0xf] }
  0xcd   : > { %1513 = vmatpush.bf16.msra.mxu0 %v4954_v13  ;;  %v6297_v13 = vld [vmem:[#allocation10 + $0xd4] sm:$0xf0] }
  0xce   : > { %1526 = vmatpush.bf16.msra.mxu1 %v5018_v4  ;;  %v5010_v24 = vor.u32 %v6297_v13, %v5009_v11  ;;  %v4915_v4 = vld [vmem:[#allocation10 + $0x18] sm:$0xf0]  ;;  %v4907_v11 = vld [vmem:[#allocation10 + $0x8] sm:$0xf0] }
  0xcf   : > { %v4918_v5 = vor.u32 %v6272_v3, %v4915_v4 }
  0xd0   : > { %1552 = vmatpush.bf16.msra.mxu3 %v5022_v29 }
  0xd1   : > { %1514 = vmatpush.bf16.msra.mxu0 %v4946_v16  ;;  %v4958_v16 = vor.u32 %v6282_v8, %v4955_v15  ;;  %v4982_v8 = vor.u32 %v6288_v6, %v4979_v7  ;;  %v4971_v15 = vld [vmem:[#allocation10 + $0x88] sm:$0xf0] }
  0xd2   : > { %1527 = vmatpush.bf16.msra.mxu1 %v5010_v24 }
  0xd3   : > { %1539 = vmatpush.bf16.msra.mxu2 %v4958_v16  ;;  %v4974_v16 = vor.u32 %v6286_v14, %v4971_v15 }
  0xd5   : > { %1515 = vmatpush.bf16.msra.mxu0 %v4938_v19 }
  0xd9   : > { %1516 = vmatpush.bf16.msra.mxu0 %v4930_v22  ;;  %v4947_v22 = vld [vmem:[#allocation10 + $0x58] sm:$0xf0] }
  0xda   : > { %v4950_v30 = vor.u32 %v6280_v21, %v4947_v22 }
  0xdc   : > { %1540 = vmatpush.bf16.msra.mxu2 %v4950_v30 }
  0xdd   : > { %1517 = vmatpush.bf16.msra.mxu0 %v4922_v25 }
  0xe1   : > { %1518 = vmatpush.bf16.msra.mxu0 %v4914_v28  ;;  %v6295_v28 = vld [vmem:[#allocation10 + $0xc4] sm:$0xf0] }
  0xe5   : > { %1519 = vmatpush.bf16.msra.mxu0 %v4906_v33  ;;  %v6278_v33 = vld [vmem:[#allocation10 + $0x44] sm:$0xf] }
  0xe8   : > { %1520 = vmatmul.bf16.vlgmr.msra.gmra.mxu0 %v7636_v9 }
 0x125   : > { %v1019_v34 = vpop.f32.mrf.mxu0 }
 0x126   : > { %v1032_v35 = vpop.f32.mrf.mxu1  ;;  %v1020_v36 = vadd.f32 %v1019_v34, %v846_v32  ;;  %v5011_v32 = vld [vmem:[#allocation10 + $0xd8] sm:$0xf0]  ;;  %v4939_v34 = vld [vmem:[#allocation10 + $0x48] sm:$0xf0] }
 0x128   : > { %v1033_v40 = vadd.f32 %v1032_v35, %v1020_v36  ;;  %v5002_v35 = vor.u32 %v6295_v28, %v5001_v27  ;;  %v4993_v36 = vld [vmem:[#allocation10 + $0xb0] sm:$0xf] }
 0x12a   : > { %1528 = vmatpush.bf16.msra.mxu1 %v5002_v35 }
 0x12d   : > { %v1045_v38 = vpop.f32.mrf.mxu2  ;;  %v1021_v43 = vpop.f32.mrf.mxu0 }
 0x12e   : > { %v1046_v39 = vadd.f32 %v1045_v38, %v847_v37  ;;  %v1058_v41 = vpop.f32.mrf.mxu3  ;;  %v1034_v44 = vpop.f32.mrf.mxu1  ;;  %v6293_v37 = vld [vmem:[#allocation10 + $0xb4] sm:$0xf0]  ;;  %v5014_v38 = vor.u32 %v6296_v31, %v5011_v32  ;;  %v4931_v43 = vld [vmem:[#allocation10 + $0x38] sm:$0xf0] }
 0x12f   : > { %v4994_v44 = vor.u32 %v6293_v37, %v4993_v36 }
 0x130   : > { %v1059_v42 = vadd.f32 %v1058_v41, %v1046_v39  ;;  %v4942_v39 = vor.u32 %v6278_v33, %v4939_v34  ;;  %v5003_v41 = vld [vmem:[#allocation10 + $0xc8] sm:$0xf0]  ;;  %1553 = vmatpush.bf16.msra.mxu3 %v5014_v38 }
 0x131   : > { %1529 = vmatpush.bf16.msra.mxu1 %v4994_v44 }
 0x132   : > { %v7648_v45 = vpack.c.bf16 %v1059_v42, %v1033_v40  ;;  %v6294_v40 = vld [vmem:[#allocation10 + $0xc4] sm:$0xf]  ;;  %v6276_v42 = vld [vmem:[#allocation10 + $0x34] sm:$0xf]  ;;  %1541 = vmatpush.bf16.msra.mxu2 %v4942_v39 }
 0x133   : > { %v5006_v48 = vor.u32 %v6294_v40, %v5003_v41  ;;  %v1346_v41 = vld [vmem:[#allocation13] sm:$0x3] }
 0x134   : > { %1570 = vrot.lane.b32.xlu1 %v7648_v45, %s7302_s25  ;;  %v1349_v44 = vperm.slane %v1346_v41, 1 }
 0x135   : > { %v1047_v46 = vpop.f32.mrf.mxu2  ;;  %1554 = vmatpush.bf16.msra.mxu3 %v5006_v48 }
 0x136   : > { %v1060_v47 = vpop.f32.mrf.mxu3  ;;  %v4985_v46 = vld [vmem:[#allocation10 + $0xa0] sm:$0xf] }
 0x137   : > { %v6291_v47 = vld [vmem:[#allocation10 + $0xa4] sm:$0xf0] }
 0x13c   : > { %1573 = vrot.lane.b32.xlu1 %v7648_v45, %s7303_s10 }
 0x145   : > { %v1271_v50 = vpop.f32.mrf.mxu0 }
 0x146   : > { %v1284_v51 = vpop.f32.mrf.mxu1  ;;  %v1272_v52 = vadd.f32 %v1271_v50, %v1098_v49  ;;  %v4934_v49 = vor.u32 %v6276_v42, %v4931_v43  ;;  %v6292_v50 = vld [vmem:[#allocation10 + $0xb4] sm:$0xf]  ;;  %v1348_v42 = vperm.slane %v1346_v41, 0 }
 0x148   : > { %v1285_v57 = vadd.f32 %v1284_v51, %v1272_v52  ;;  %v4995_v51 = vld [vmem:[#allocation10 + $0xb8] sm:$0xf0]  ;;  %v6274_v52 = vld [vmem:[#allocation10 + $0x24] sm:$0xf]  ;;  %1542 = vmatpush.bf16.msra.mxu2 %v4934_v49 }
 0x14d   : > { %v1297_v54 = vpop.f32.mrf.mxu2  ;;  %v1273_v60 = vpop.f32.mrf.mxu0 }
 0x14e   : > { %v1298_v58 = vadd.f32 %v1297_v54, %v1099_v53  ;;  %v1310_v59 = vpop.f32.mrf.mxu3  ;;  %v1286_v0 = vpop.f32.mrf.mxu1  ;;  %v4923_v53 = vld [vmem:[#allocation10 + $0x28] sm:$0xf0]  ;;  %v4986_v54 = vor.u32 %v6291_v47, %v4985_v46 }
 0x14f   : > { %v4987_v60 = vld [vmem:[#allocation10 + $0xa8] sm:$0xf0] }
 0x150   : > { %v1311_v2 = vadd.f32 %v1310_v59, %v1298_v58  ;;  %v4926_v58 = vor.u32 %v6274_v52, %v4923_v53  ;;  %v6290_v59 = vld [vmem:[#allocation10 + $0xa4] sm:$0xf]  ;;  %1530 = vmatpush.bf16.msra.mxu1 %v4986_v54 }
 0x151   : > { %v4990_v0 = vor.u32 %v6290_v59, %v4987_v60 }
 0x152   : > { %v1576_v10 = vpack.c.bf16 %v1311_v2, %v1285_v57  ;;  %v4998_v57 = vor.u32 %v6292_v50, %v4995_v51  ;;  %1543 = vmatpush.bf16.msra.mxu2 %v4926_v58  ;;  %v1566_v2 = vrot.slane %v7648_v45, 4 }
 0x154   : > { %1579 = vrot.lane.b32.xlu2 %v1576_v10, %s7304_s24  ;;  %1582 = vrot.lane.b32.xlu0 %v1576_v10, %s7302_s25  ;;  %v1605_v19 = vsel %vm1600_vm0, %v1576_v10, 0  ;;  %v1578_v20 = vrot.slane %v1576_v10, 4 }
 0x155   : > { %v1299_v23 = vpop.f32.mrf.mxu2  ;;  %1614 = vmatpush.bf16.xpose.msrb.mxu0 %v1605_v19  ;;  %1555 = vmatpush.bf16.msra.mxu3 %v4998_v57 }
 0x156   : > { %v1312_v25 = vpop.f32.mrf.mxu3  ;;  %v1681_v26 = vsel %vm1600_vm0, %v1578_v20, 0  ;;  %1531 = vmatpush.bf16.msra.mxu1 %v4978_v61  ;;  %1544 = vmatpush.bf16.msra.mxu2 %v4918_v5 }
 0x159   : > { %1556 = vmatpush.bf16.msra.mxu3 %v4990_v0 }
 0x15a   : > { %1532 = vmatpush.bf16.msra.mxu1 %v4970_v1 }
 0x15c   : > { %1585 = vrot.lane.b32.xlu0 %v1576_v10, %s7303_s10  ;;  %1567 = vrot.lane.b32.xlu2 %v7648_v45, %s7304_s24  ;;  %v6270_v10 = vld [vmem:[#allocation10 + $0x4] sm:$0xf] }
 0x15d   : > { %1690 = vmatpush.bf16.xpose.msra.mxu0 %v1681_v26  ;;  %1533 = vmatmul.bf16.vlgmr.msra.gmra.mxu1 %v7638_v12  ;;  %v4910_v13 = vor.u32 %v6270_v10, %v4907_v11 }
 0x15e   : > { %5031 = vmatmul.msk.bf16.vlgmr.msrb.gmra.mxu0 %vm1600_vm0, %v7648_v45  ;;  %1557 = vmatpush.bf16.msra.mxu3 %v4982_v8 }
 0x15f   : > { %1545 = vmatpush.bf16.msra.mxu2 %v4910_v13 }
 0x162   : > { %1558 = vmatpush.bf16.msra.mxu3 %v4974_v16  ;;  %1546 = vmatmul.bf16.vlgmr.msra.gmra.mxu2 %v7636_v9 }
 0x165   : > { %1559 = vmatmul.bf16.vlgmr.msra.gmra.mxu3 %v7638_v12  ;;  %v1521_v45 = vpop.f32.mrf.mxu0 }
 0x166   : > { %v1522_v43 = vadd.f32 %v1521_v45, %v1348_v42 }
 0x16d   : > { %v1523_v21 = vpop.f32.mrf.mxu0 }
 0x16e   : > { %5035 = vmatmul.msk.bf16.vlgmr.msra.gmra.mxu0 %vm1600_vm0, %v1566_v2 }
 0x1a6   : > { %v1571_v26 = vpop.permute.xlu1 %1570 }
 0x1a7   : > { %v1572_v34 = vrot.slane %v1571_v26, 4 }
 0x1ae   : > { %v1580_v17 = vpop.permute.xlu2 %1579  ;;  %v1574_v31 = vpop.permute.xlu1 %1573 }
 0x1af   : > { %v1581_v18 = vrot.slane %v1580_v17, 4  ;;  %v1624_v19 = vsel %vm1600_vm0, %v1580_v17, 0  ;;  %v1575_v36 = vrot.slane %v1574_v31, 4 }
 0x1b0   : > { %1633 = vmatpush.bf16.xpose.msrb.mxu1 %v1624_v19 }
 0x1b1   : > { %v1700_v20 = vsel %vm1600_vm0, %v1581_v18, 0 }
 0x1b6   : > { %v1568_v22 = vpop.permute.xlu2 %1567 }
 0x1b7   : > { %5032 = vmatmul.msk.bf16.vlgmr.msrb.gmra.mxu1 %vm1600_vm0, %v1568_v22  ;;  %v1569_v23 = vrot.slane %v1568_v22, 4 }
 0x1b8   : > { %1709 = vmatpush.bf16.xpose.msra.mxu1 %v1700_v20 }
 0x1c6   : > { %v1583_v24 = vpop.permute.xlu0 %1582 }
 0x1c7   : > { %v1584_v25 = vrot.slane %v1583_v24, 4  ;;  %v1643_v9 = vsel %vm1600_vm0, %v1583_v24, 0  ;;  %5036 = vmatmul.msk.bf16.vlgmr.msra.gmra.mxu1 %vm1600_vm0, %v1569_v23 }
 0x1c8   : > { %1652 = vmatpush.bf16.xpose.msrb.mxu2 %v1643_v9 }
 0x1c9   : > { %v1719_v12 = vsel %vm1600_vm0, %v1584_v25, 0 }
 0x1ce   : > { %v1586_v27 = vpop.permute.xlu0 %1585 }
 0x1cf   : > { %v1587_v28 = vrot.slane %v1586_v27, 4  ;;  %v1662_v29 = vsel %vm1600_vm0, %v1586_v27, 0  ;;  %5033 = vmatmul.msk.bf16.vlgmr.msrb.gmra.mxu2 %vm1600_vm0, %v1571_v26 }
 0x1d0   : > { %1728 = vmatpush.bf16.xpose.msra.mxu2 %v1719_v12  ;;  %1671 = vmatpush.bf16.xpose.msrb.mxu3 %v1662_v29 }
 0x1d1   : > { %v1738_v30 = vsel %vm1600_vm0, %v1587_v28, 0 }
 0x1d7   : > { %5034 = vmatmul.msk.bf16.vlgmr.msrb.gmra.mxu3 %vm1600_vm0, %v1574_v31 }
 0x1d8   : > { %1747 = vmatpush.bf16.xpose.msra.mxu3 %v1738_v30 }
 0x1da   : > { %v1534_v38 = vpop.f32.mrf.mxu1 }
 0x1db   : > { %v7681_v32 = vpop.f32.mrf.mxu0  ;;  %v1535_v47 = vadd.f32 %v1534_v38, %v1522_v43 }
 0x1dc   : > { %v1754_v33 = vsel %vm1753_vm1, %v7681_v32, -inf }
 0x1dd   : > { %1755 = vmax.xlane.f32.xlu2 %v1754_v33 }
 0x1df   : > { %5037 = vmatmul.msk.bf16.vlgmr.msra.gmra.mxu2 %vm1600_vm0, %v1572_v34 }
 0x1e2   : > { %v1536_v40 = vpop.f32.mrf.mxu1 }
 0x1e3   : > { %v1618_v35 = vpop.f32.mrf.mxu0 }
 0x1e5   : > { %v1547_v46 = vpop.f32.mrf.mxu2 }
 0x1e6   : > { %v1548_v48 = vadd.f32 %v1547_v46, %v1349_v44 }
 0x1e7   : > { %5038 = vmatmul.msk.bf16.vlgmr.msra.gmra.mxu3 %vm1600_vm0, %v1575_v36 }
 0x1e8   : > { %v1560_v49 = vpop.f32.mrf.mxu3 }
 0x1e9   : > { %v1561_v50 = vadd.f32 %v1560_v49, %v1548_v48 }
 0x1eb   : > { %v7687_v37 = vpop.f32.mrf.mxu0  ;;  %v1588_v51 = vpack.c.bf16 %v1561_v50, %v1535_v47 }
 0x1ec   : > { %v1766_v18 = vsel %vm1753_vm1, %v7687_v37, -inf }
 0x1ed   : > { %v1855_v52 = vsel %vm1853_vm2, %v1588_v51, 0  ;;  %v1590_v53 = vrot.slane %v1588_v51, 4  ;;  %v1549_v54 = vpop.f32.mrf.mxu2 }
 0x1ee   : > { %1864 = vmatpush.bf16.msrb.mxu0 %v1855_v52 }
 0x1ef   : > { %v1931_v55 = vsel %vm1853_vm2, %v1590_v53, 0 }
 0x1f0   : > { %v1562_v56 = vpop.f32.mrf.mxu3 }
 0x1f2   : > { %1940 = vmatpush.bf16.msra.mxu0 %v1931_v55 }
 0x1f3   : > { %v1694_v39 = vpop.f32.mrf.mxu0 }
 0x234   : > { %v1635_v57 = vpop.f32.mrf.mxu1 }
 0x235   : > { %v1757_v58 = vsel %vm1753_vm1, %v1635_v57, -inf }
 0x236   : > { %1758 = vmax.xlane.f32.xlu2 %v1757_v58 }
 0x23c   : > { %v1637_v59 = vpop.f32.mrf.mxu1 }
 0x244   : > { %v1711_v60 = vpop.f32.mrf.mxu1 }
 0x245   : > { %v1769_v5 = vsel %vm1753_vm1, %v1711_v60, -inf }
 0x24c   : > { %v1713_v61 = vpop.f32.mrf.mxu1 }
 0x250   : > { %v1756_v13 = vpop.xlane.xlu2 %1755 }
 0x251   : > { %v1778_v36 = vsub.f32 %v7681_v32, %v1756_v13 }
 0x252   : > { %v1654_v62 = vpop.f32.mrf.mxu2 }
 0x253   : > { %v1760_v63 = vsel %vm1753_vm1, %v1654_v62, -inf  ;;  %v1786_v39 = vmul.f32 1.442695, %v1778_v36 }
 0x254   : > { %1761 = vmax.xlane.f32.xlu0 %v1760_v63 }
 0x25a   : > { %v1656_v0 = vpop.f32.mrf.mxu2  ;;  %v1673_v1 = vpop.f32.mrf.mxu3 }
 0x25b   : > { %v1763_v2 = vsel %vm1753_vm1, %v1673_v1, -inf }
 0x25c   : > { %1764 = vmax.xlane.f32.xlu1 %v1763_v2 }
 0x262   : > { %v1675_v3 = vpop.f32.mrf.mxu3  ;;  %v1730_v4 = vpop.f32.mrf.mxu2 }
 0x263   : > { %v1772_v6 = vsel %vm1753_vm1, %v1730_v4, -inf }
 0x264   : > { %1770 = vmax.xlane.f32.xlu1 %v1769_v5  ;;  %1773 = vmax.xlane.f32.xlu2 %v1772_v6 }
 0x26a   : > { %v1732_v7 = vpop.f32.mrf.mxu2  ;;  %v1749_v8 = vpop.f32.mrf.mxu3 }
 0x26b   : > { %v1775_v10 = vsel %vm1753_vm1, %v1749_v8, -inf }
 0x26c   : > { %1776 = vmax.xlane.f32.xlu0 %v1775_v10 }
 0x272   : > { %v1751_v11 = vpop.f32.mrf.mxu3 }
 0x2a9   : > { %v1759_v14 = vpop.xlane.xlu2 %1758 }
 0x2aa   : > { %v1779_v15 = vsub.f32 %v1635_v57, %v1759_v14 }
 0x2ac   : > { %v1788_v16 = vmul.f32 1.442695, %v1779_v15 }
 0x2ae   : > { %6761 = vpow2.f32 %v1788_v16 }
 0x2b4   : > { %v6762_v45 = vpop.eup %6761 }
 0x2b5   : > { %v1805_v17 = vsel %vm1753_vm1, %v6762_v45, 0.0 }
 0x2b6   : > { %1806 = vadd.xlane.f32.xlu2 %v1805_v17 }
 0x2be   : > { %1767 = vmax.xlane.f32.xlu2 %v1766_v18 }
 0x2c7   : > { %v1762_v19 = vpop.xlane.xlu0 %1761 }
 0x2c8   : > { %v1780_v20 = vsub.f32 %v1654_v62, %v1762_v19 }
 0x2ca   : > { %v1790_v21 = vmul.f32 1.442695, %v1780_v20 }
 0x2cc   : > { %6763 = vpow2.f32 %v1790_v21 }
 0x2cf   : > { %v1765_v22 = vpop.xlane.xlu1 %1764 }
 0x2d0   : > { %v1781_v23 = vsub.f32 %v1673_v1, %v1765_v22 }
 0x2d2   : > { %v6764_v24 = vpop.eup %6763  ;;  %v1792_v25 = vmul.f32 1.442695, %v1781_v23 }
 0x2d3   : > { %v1808_v9 = vsel %vm1753_vm1, %v6764_v24, 0.0 }
 0x2d4   : > { %6765 = vpow2.f32 %v1792_v25  ;;  %1809 = vadd.xlane.f32.xlu0 %v1808_v9 }
 0x2d6   : > { %1591 = vrot.lane.b32.xlu2 %v1588_v51, %s7304_s24 }
 0x2d7   : > { %v1771_v27 = vpop.xlane.xlu1 %1770  ;;  %v1774_v31 = vpop.xlane.xlu2 %1773 }
 0x2d8   : > { %v1783_v28 = vsub.f32 %v1711_v60, %v1771_v27  ;;  %v1784_v34 = vsub.f32 %v1730_v4, %v1774_v31 }
 0x2da   : > { %v7702_v12 = vpop.eup %6765  ;;  %v1796_v29 = vmul.f32 1.442695, %v1783_v28  ;;  %v1798_v35 = vmul.f32 1.442695, %v1784_v34 }
 0x2db   : > { %v1811_v26 = vsel %vm1753_vm1, %v7702_v12, 0.0 }
 0x2dc   : > { %1812 = vadd.xlane.f32.xlu1 %v1811_v26  ;;  %6767 = vpow2.f32 %v1796_v29 }
 0x2dd   : > { %6769 = vpow2.f32 %v1798_v35 }
 0x2de   : > { %6771 = vpow2.f32 %v1786_v39 }
 0x2df   : > { %v1777_v38 = vpop.xlane.xlu0 %1776 }
 0x2e0   : > { %v1785_v40 = vsub.f32 %v1749_v8, %v1777_v38 }
 0x2e2   : > { %v7708_v30 = vpop.eup %6767  ;;  %v1800_v42 = vmul.f32 1.442695, %v1785_v40 }
 0x2e3   : > { %v1817_v33 = vsel %vm1753_vm1, %v7708_v30, 0.0  ;;  %v7713_v41 = vpop.eup %6769 }
 0x2e4   : > { %v1820_v43 = vsel %vm1753_vm1, %v7713_v41, 0.0  ;;  %6773 = vpow2.f32 %v1800_v42  ;;  %v7717_v44 = vpop.eup %6771 }
 0x2e5   : > { %v1802_v46 = vsel %vm1753_vm1, %v7717_v44, 0.0 }
 0x2e8   : > { %1594 = vrot.lane.b32.xlu0 %v1588_v51, %s7302_s25 }
 0x2ea   : > { %v7721_v32 = vpop.eup %6773 }
 0x2eb   : > { %v1823_v47 = vsel %vm1753_vm1, %v7721_v32, 0.0 }
 0x2f5   : > { %1597 = vrot.lane.b32.xlu1 %v1588_v51, %s7303_s10 }
 0x2ff   : > { %1818 = vadd.xlane.f32.xlu2 %v1817_v33 }
 0x312   : > { %1821 = vadd.xlane.f32.xlu0 %v1820_v43 }
 0x31a   : > { %1803 = vadd.xlane.f32.xlu0 %v1802_v46 }
 0x31f   : > { %1824 = vadd.xlane.f32.xlu1 %v1823_v47 }
 0x329   : > { %v1807_v48 = vpop.xlane.xlu2 %1806 }
 0x32a   : > { %6775 = vrcp.f32 %v1807_v48 }
 0x330   : > { %v6776_v52 = vpop.eup %6775 }
 0x331   : > { %v1768_v49 = vpop.xlane.xlu2 %1767  ;;  %v1835_v53 = vmul.f32 %v6776_v52, %v6762_v45 }
 0x332   : > { %v1782_v50 = vsub.f32 %v7687_v37, %v1768_v49 }
 0x333   : > { %v1843_v58 = vpack.c.bf16 %v1835_v53, %v1835_v53 }
 0x334   : > { %v1794_v51 = vmul.f32 1.442695, %v1782_v50 }
 0x336   : > { %6777 = vpow2.f32 %v1794_v51 }
 0x339   : > { %v1592_v54 = vpop.permute.xlu2 %1591 }
 0x33a   : > { %v1593_v55 = vrot.slane %v1592_v54, 4  ;;  %v1874_v56 = vsel %vm1853_vm2, %v1592_v54, 0 }
 0x33b   : > { %1883 = vmatpush.bf16.msrb.mxu1 %v1874_v56 }
 0x33c   : > { %v6778_v57 = vpop.eup %6777  ;;  %v1950_v59 = vsel %vm1853_vm2, %v1593_v55, 0 }
 0x33d   : > { %v1814_v60 = vsel %vm1753_vm1, %v6778_v57, 0.0 }
 0x33e   : > { %1815 = vadd.xlane.f32.xlu1 %v1814_v60  ;;  %5040 = vmatmul.msk.bf16.vlgmr.msrb.gmra.mxu1 %vm1753_vm1, %v1843_v58  ;;  %v5105_v58 = vld [vmem:[#allocation11 + $0x70] sm:$0xf]  ;;  %v6316_v60 = vld [vmem:[#allocation11 + $0x74] sm:$0xf] }
 0x33f   : > { %1959 = vmatpush.bf16.msra.mxu1 %v1950_v59  ;;  %v6317_v59 = vld [vmem:[#allocation11 + $0x74] sm:$0xf0] }
 0x347   : > { %v1810_v37 = vpop.xlane.xlu0 %1809 }
 0x348   : > { %6779 = vrcp.f32 %v1810_v37 }
 0x34e   : > { %v6780_v61 = vpop.eup %6779 }
 0x34f   : > { %v1836_v62 = vmul.f32 %v6780_v61, %v6764_v24  ;;  %v1813_v63 = vpop.xlane.xlu1 %1812  ;;  %v5106_v61 = vor.u32 %v6317_v59, %v5105_v58  ;;  %v6331_v58 = vld [vmem:[#allocation11 + $0xe4] sm:$0xf0] }
 0x350   : > { %6781 = vrcp.f32 %v1813_v63 }
 0x351   : > { %v1844_v3 = vpack.c.bf16 %v1836_v62, %v1836_v62  ;;  %v5107_v62 = vld [vmem:[#allocation11 + $0x78] sm:$0xf0] }
 0x352   : > { %v5110_v63 = vor.u32 %v6316_v60, %v5107_v62  ;;  %v6330_v60 = vld [vmem:[#allocation11 + $0xe4] sm:$0xf] }
 0x356   : > { %v6782_v5 = vpop.eup %6781 }
 0x357   : > { %v1837_v6 = vmul.f32 %v6782_v5, %v7702_v12 }
 0x359   : > { %v1845_v11 = vpack.c.bf16 %v1837_v6, %v1837_v6 }
 0x35a   : > { %v1595_v0 = vpop.permute.xlu0 %1594 }
 0x35b   : > { %v1596_v1 = vrot.slane %v1595_v0, 4  ;;  %v1893_v2 = vsel %vm1853_vm2, %v1595_v0, 0 }
 0x35c   : > { %1902 = vmatpush.bf16.msrb.mxu2 %v1893_v2  ;;  %v5097_v2 = vld [vmem:[#allocation11 + $0x60] sm:$0xf] }
 0x35d   : > { %v1969_v4 = vsel %vm1853_vm2, %v1596_v1, 0 }
 0x35f   : > { %5041 = vmatmul.msk.bf16.vlgmr.msrb.gmra.mxu2 %vm1753_vm1, %v1844_v3  ;;  %v6315_v3 = vld [vmem:[#allocation11 + $0x64] sm:$0xf0] }
 0x360   : > { %1978 = vmatpush.bf16.msra.mxu2 %v1969_v4  ;;  %v6314_v4 = vld [vmem:[#allocation11 + $0x64] sm:$0xf]  ;;  %v5098_v6 = vor.u32 %v6315_v3, %v5097_v2  ;;  %v6329_v2 = vld [vmem:[#allocation11 + $0xd4] sm:$0xf0]  ;;  %v6328_v3 = vld [vmem:[#allocation11 + $0xd4] sm:$0xf] }
 0x364   : > { %2283 = vmatpush.bf16.msrb.mxu2 %v5110_v63 }
 0x367   : > { %v1598_v7 = vpop.permute.xlu1 %1597 }
 0x368   : > { %v1599_v8 = vrot.slane %v1598_v7, 4  ;;  %v1912_v10 = vsel %vm1853_vm2, %v1598_v7, 0  ;;  %v5099_v7 = vld [vmem:[#allocation11 + $0x68] sm:$0xf0] }
 0x369   : > { %1921 = vmatpush.bf16.msrb.mxu3 %v1912_v10  ;;  %v6313_v10 = vld [vmem:[#allocation11 + $0x54] sm:$0xf0] }
 0x36a   : > { %v1988_v13 = vsel %vm1853_vm2, %v1599_v8, 0  ;;  %v5089_v8 = vld [vmem:[#allocation11 + $0x50] sm:$0xf] }
 0x36c   : > { %5042 = vmatmul.msk.bf16.vlgmr.msrb.gmra.mxu3 %vm1753_vm1, %v1845_v11  ;;  %v5102_v11 = vor.u32 %v6314_v4, %v5099_v7  ;;  %v5155_v4 = vld [vmem:[#allocation11 + $0xd8] sm:$0xf0] }
 0x36d   : > { %1997 = vmatpush.bf16.msra.mxu3 %v1988_v13  ;;  %v6312_v13 = vld [vmem:[#allocation11 + $0x54] sm:$0xf] }
 0x36e   : > { %2284 = vmatpush.bf16.msrb.mxu2 %v5102_v11 }
 0x372   : > { %v1819_v14 = vpop.xlane.xlu2 %1818 }
 0x373   : > { %6783 = vrcp.f32 %v1819_v14  ;;  %v5091_v14 = vld [vmem:[#allocation11 + $0x58] sm:$0xf0] }
 0x379   : > { %v6784_v15 = vpop.eup %6783 }
 0x37a   : > { %v1839_v16 = vmul.f32 %v6784_v15, %v7708_v30 }
 0x37c   : > { %v1847_v45 = vpack.c.bf16 %v1839_v16, %v1839_v16  ;;  %v5090_v16 = vor.u32 %v6313_v10, %v5089_v8 }
 0x37e   : > { %5044 = vmatmul.msk.bf16.vlgmr.msra.gmra.mxu1 %vm1753_vm1, %v1847_v45  ;;  %v5094_v45 = vor.u32 %v6312_v13, %v5091_v14  ;;  %v5145_v13 = vld [vmem:[#allocation11 + $0xc0] sm:$0xf]  ;;  %v6327_v14 = vld [vmem:[#allocation11 + $0xc4] sm:$0xf0] }
 0x380   : > { %2285 = vmatpush.bf16.msrb.mxu2 %v5094_v45  ;;  %v5146_v45 = vor.u32 %v6327_v14, %v5145_v13  ;;  %v6458_v14 = vld [vmem:[#allocation19 + $0x3dc] sm:$0xf0] }
 0x385   : > { %v1822_v17 = vpop.xlane.xlu0 %1821 }
 0x386   : > { %6785 = vrcp.f32 %v1822_v17  ;;  %v5081_v17 = vld [vmem:[#allocation11 + $0x40] sm:$0xf] }
 0x38c   : > { %v6786_v18 = vpop.eup %6785 }
 0x38d   : > { %v1840_v19 = vmul.f32 %v6786_v18, %v7713_v41  ;;  %v1804_v20 = vpop.xlane.xlu0 %1803  ;;  %v6311_v18 = vld [vmem:[#allocation11 + $0x44] sm:$0xf0] }
 0x38e   : > { %6787 = vrcp.f32 %v1804_v20  ;;  %v6310_v20 = vld [vmem:[#allocation11 + $0x44] sm:$0xf] }
 0x38f   : > { %v1848_v21 = vpack.c.bf16 %v1840_v19, %v1840_v19 }
 0x391   : > { %5045 = vmatmul.msk.bf16.vlgmr.msra.gmra.mxu2 %vm1753_vm1, %v1848_v21  ;;  %v5083_v21 = vld [vmem:[#allocation11 + $0x48] sm:$0xf0] }
 0x392   : > { %v1825_v22 = vpop.xlane.xlu1 %1824 }
 0x393   : > { %6789 = vrcp.f32 %v1825_v22  ;;  %v5082_v22 = vor.u32 %v6311_v18, %v5081_v17  ;;  %v5137_v18 = vld [vmem:[#allocation11 + $0xb0] sm:$0xf] }
 0x394   : > { %v6788_v23 = vpop.eup %6787 }
 0x395   : > { %v1834_v24 = vmul.f32 %v6788_v23, %v7717_v44 }
 0x397   : > { %v1842_v25 = vpack.c.bf16 %v1834_v24, %v1834_v24  ;;  %v5086_v24 = vor.u32 %v6310_v20, %v5083_v21  ;;  %v6324_v20 = vld [vmem:[#allocation11 + $0xb4] sm:$0xf]  ;;  %v5139_v21 = vld [vmem:[#allocation11 + $0xb8] sm:$0xf0] }
 0x399   : > { %v6790_v9 = vpop.eup %6789  ;;  %5039 = vmatmul.msk.bf16.vlgmr.msrb.gmra.mxu0 %vm1753_vm1, %v1842_v25  ;;  %v5073_v25 = vld [vmem:[#allocation11 + $0x30] sm:$0xf]  ;;  %2286 = vmatpush.bf16.msrb.mxu2 %v5086_v24  ;;  %v5129_v24 = vld [vmem:[#allocation11 + $0xa0] sm:$0xf] }
 0x39a   : > { %v1841_v12 = vmul.f32 %v6790_v9, %v7721_v32  ;;  %2257 = vmatpush.bf16.msrb.mxu0 %v5106_v61  ;;  %v6309_v9 = vld [vmem:[#allocation11 + $0x34] sm:$0xf0] }
 0x39c   : > { %v1849_v26 = vpack.c.bf16 %v1841_v12, %v1841_v12  ;;  %v6308_v12 = vld [vmem:[#allocation11 + $0x34] sm:$0xf] }
 0x39e   : > { %5046 = vmatmul.msk.bf16.vlgmr.msra.gmra.mxu3 %vm1753_vm1, %v1849_v26  ;;  %2258 = vmatpush.bf16.msrb.mxu0 %v5098_v6  ;;  %v5075_v26 = vld [vmem:[#allocation11 + $0x38] sm:$0xf0] }
 0x3a2   : > { %2259 = vmatpush.bf16.msrb.mxu0 %v5090_v16  ;;  %v5147_v16 = vld [vmem:[#allocation11 + $0xc8] sm:$0xf0] }
 0x3a6   : > { %2260 = vmatpush.bf16.msrb.mxu0 %v5082_v22 }
 0x3b1   : > { %v1816_v27 = vpop.xlane.xlu1 %1815 }
 0x3b2   : > { %6791 = vrcp.f32 %v1816_v27  ;;  %v5074_v27 = vor.u32 %v6309_v9, %v5073_v25  ;;  %v6323_v25 = vld [vmem:[#allocation11 + $0xa4] sm:$0xf0]  ;;  %v6322_v9 = vld [vmem:[#allocation11 + $0xa4] sm:$0xf] }
 0x3b4   : > { %2261 = vmatpush.bf16.msrb.mxu0 %v5074_v27  ;;  %v5121_v27 = vld [vmem:[#allocation11 + $0x90] sm:$0xf] }
 0x3b8   : > { %v6792_v28 = vpop.eup %6791 }
 0x3b9   : > { %v1838_v29 = vmul.f32 %v6792_v28, %v6778_v57  ;;  %v5078_v28 = vor.u32 %v6308_v12, %v5075_v26  ;;  %v5130_v12 = vor.u32 %v6323_v25, %v5129_v24  ;;  %v5131_v26 = vld [vmem:[#allocation11 + $0xa8] sm:$0xf0]  ;;  %v6450_v24 = vld [vmem:[#allocation19 + $0x39c] sm:$0xf0] }
 0x3bb   : > { %v1846_v30 = vpack.c.bf16 %v1838_v29, %v1838_v29  ;;  %v1885_v31 = vpop.f32.mrf.mxu1  ;;  %v5065_v29 = vld [vmem:[#allocation11 + $0x20] sm:$0xf]  ;;  %2287 = vmatpush.bf16.msrb.mxu2 %v5078_v28  ;;  %v6321_v28 = vld [vmem:[#allocation11 + $0x94] sm:$0xf0] }
 0x3bc   : > { %v2004_v33 = vpack.c.bf16 %v1885_v31, %v1885_v31  ;;  %v6306_v31 = vld [vmem:[#allocation11 + $0x24] sm:$0xf] }
 0x3bd   : > { %5043 = vmatmul.msk.bf16.vlgmr.msra.gmra.mxu0 %vm1753_vm1, %v1846_v30  ;;  %v6307_v30 = vld [vmem:[#allocation11 + $0x24] sm:$0xf0] }
 0x3be   : > { %v2012_v34 = vunpack.c.l.b16 %v2004_v33  ;;  %v5066_v33 = vor.u32 %v6307_v30, %v5065_v29  ;;  %v5134_v29 = vor.u32 %v6322_v9, %v5131_v26  ;;  %v6320_v30 = vld [vmem:[#allocation11 + $0x94] sm:$0xf]  ;;  %v5371_v26 = vld [vmem:[#allocation19 + $0x1a0] sm:$0xf0] }
 0x3c0   : > { %v2013_v35 = vpack.c.b16 %v2012_v34, %v2012_v34  ;;  %v5067_v34 = vld [vmem:[#allocation11 + $0x28] sm:$0xf0]  ;;  %2262 = vmatpush.bf16.msrb.mxu0 %v5066_v33  ;;  %v5122_v33 = vor.u32 %v6321_v28, %v5121_v27 }
 0x3c1   : > { %v6446_v27 = vld [vmem:[#allocation19 + $0x384] sm:$0xf] }
 0x3c2   : > { %2014 = vrot.lane.b32.xlu0 %v2013_v35, %s7303_s10  ;;  %v5057_v35 = vld [vmem:[#allocation11 + $0x10] sm:$0xf] }
 0x3c3   : > { %v1887_v36 = vpop.f32.mrf.mxu1 }
 0x3c4   : > { %v6305_v36 = vld [vmem:[#allocation11 + $0x14] sm:$0xf0] }
 0x3e2   : > { %v1904_v38 = vpop.f32.mrf.mxu2 }
 0x3e3   : > { %v2005_v39 = vpack.c.bf16 %v1904_v38, %v1904_v38  ;;  %v5070_v38 = vor.u32 %v6306_v31, %v5067_v34  ;;  %v5123_v31 = vld [vmem:[#allocation11 + $0x98] sm:$0xf0] }
 0x3e4   : > { %v5126_v34 = vor.u32 %v6320_v30, %v5123_v31  ;;  %v5337_v30 = vld [vmem:[#allocation19 + $0x140] sm:$0xf] }
 0x3e5   : > { %v2017_v40 = vunpack.c.l.b16 %v2005_v39  ;;  %v6304_v39 = vld [vmem:[#allocation11 + $0x14] sm:$0xf]  ;;  %2288 = vmatpush.bf16.msrb.mxu2 %v5070_v38  ;;  %v6318_v38 = vld [vmem:[#allocation11 + $0x84] sm:$0xf]  ;;  %v6378_v31 = vld [vmem:[#allocation19 + $0x15c] sm:$0xf0] }
 0x3e7   : > { %v2018_v41 = vpack.c.b16 %v2017_v40, %v2017_v40  ;;  %v5059_v40 = vld [vmem:[#allocation11 + $0x18] sm:$0xf0] }
 0x3e9   : > { %2019 = vrot.lane.b32.xlu1 %v2018_v41, %s7302_s25  ;;  %v5058_v41 = vor.u32 %v6305_v36, %v5057_v35  ;;  %v5113_v35 = vld [vmem:[#allocation11 + $0x80] sm:$0xf]  ;;  %v6319_v36 = vld [vmem:[#allocation11 + $0x84] sm:$0xf0] }
 0x3ea   : > { %v1906_v42 = vpop.f32.mrf.mxu2 }
 0x3eb   : > { %v5062_v42 = vor.u32 %v6304_v39, %v5059_v40  ;;  %2263 = vmatpush.bf16.msrb.mxu0 %v5058_v41  ;;  %v5115_v39 = vld [vmem:[#allocation11 + $0x88] sm:$0xf0]  ;;  %v5114_v40 = vor.u32 %v6319_v36, %v5113_v35  ;;  %v6442_v35 = vld [vmem:[#allocation19 + $0x35c] sm:$0xf0] }
 0x3ec   : > { %v5118_v41 = vor.u32 %v6318_v38, %v5115_v39  ;;  %v6374_v36 = vld [vmem:[#allocation19 + $0x144] sm:$0xf]  ;;  %v5338_v38 = vor.u32 %v6378_v31, %v5337_v30 }
 0x3ed   : > { %2289 = vmatpush.bf16.msrb.mxu2 %v5062_v42  ;;  %v5339_v39 = vld [vmem:[#allocation19 + $0x160] sm:$0xf0] }
 0x3ef   : > { %v1923_v43 = vpop.f32.mrf.mxu3 }
 0x3f0   : > { %v2006_v44 = vpack.c.bf16 %v1923_v43, %v1923_v43  ;;  %v5049_v43 = vld [vmem:[#allocation11] sm:$0xf] }
 0x3f2   : > { %v2022_v46 = vunpack.c.l.b16 %v2006_v44  ;;  %v6303_v44 = vld [vmem:[#allocation11 + $0x4] sm:$0xf0] }
 0x3f4   : > { %v2023_v32 = vpack.c.b16 %v2022_v46, %v2022_v46  ;;  %v6302_v46 = vld [vmem:[#allocation11 + $0x4] sm:$0xf] }
 0x3f6   : > { %2024 = vrot.lane.b32.xlu2 %v2023_v32, %s7304_s24  ;;  %v5051_v32 = vld [vmem:[#allocation11 + $0x8] sm:$0xf0] }
 0x3f7   : > { %v1925_v47 = vpop.f32.mrf.mxu3 }
 0x3f8   : > { %v5050_v47 = vor.u32 %v6303_v44, %v5049_v43 }
 0x3fa   : > { %2264 = vmatpush.bf16.msrb.mxu0 %v5050_v47 }
 0x3fb   : > { %v1961_v48 = vpop.f32.mrf.mxu1 }
 0x3fc   : > { %v2008_v49 = vpack.c.bf16 %v1961_v48, %v1961_v48  ;;  %v5054_v48 = vor.u32 %v6302_v46, %v5051_v32 }
 0x3fe   : > { %v2027_v50 = vunpack.c.l.b16 %v2008_v49  ;;  %2290 = vmatpush.bf16.msrb.mxu2 %v5054_v48 }
 0x400   : > { %v2028_v51 = vpack.c.b16 %v2027_v50, %v2027_v50 }
 0x402   : > { %2029 = vrot.lane.b32.xlu0 %v2028_v51, %s7303_s10  ;;  %v5169_v51 = vld [vmem:[#allocation11 + $0xf0] sm:$0xf]  ;;  %s4412_s10 = sshll.u32 %s804_s21, 4  ;;  %s4413_s10 = int_to_ptr.vmem [resolvable:$true] %s4412_s10 }
 0x403   : > { %v1963_v52 = vpop.f32.mrf.mxu1 }
 0x404   : > { %v6333_v52 = vld [vmem:[#allocation11 + $0xf4] sm:$0xf0] }
 0x414   : > { %v1980_v53 = vpop.f32.mrf.mxu2 }
 0x415   : > { %v2009_v54 = vpack.c.bf16 %v1980_v53, %v1980_v53  ;;  %v6332_v53 = vld [vmem:[#allocation11 + $0xf4] sm:$0xf] }
 0x416   : > { %v7750_v55 = vpop.f32.mrf.mxu0 }
 0x417   : > { %v2032_v56 = vunpack.c.l.b16 %v2009_v54  ;;  %v5170_v54 = vor.u32 %v6333_v52, %v5169_v51  ;;  %v2003_v63 = vpack.c.bf16 %v7750_v55, %v7750_v55  ;;  %v5158_v55 = vor.u32 %v6328_v3, %v5155_v4 }
 0x419   : > { %v2033_v57 = vpack.c.b16 %v2032_v56, %v2032_v56  ;;  %v5171_v56 = vld [vmem:[#allocation11 + $0xf8] sm:$0xf0]  ;;  %2270 = vmatpush.bf16.msrb.mxu1 %v5170_v54  ;;  %v2091_v54 = vld [vmem:[#allocation14] sm:$0x3] }
 0x41a   : > { %v5174_v59 = vor.u32 %v6332_v53, %v5171_v56  ;;  %v2093_v56 = vperm.slane %v2091_v54, 0 }
 0x41b   : > { %2034 = vrot.lane.b32.xlu0 %v2033_v57, %s7302_s25  ;;  %v5161_v57 = vld [vmem:[#allocation11 + $0xe0] sm:$0xf]  ;;  %s4410_s25 = scalar_lea.hbm %s7978_s5, %s6590_s16 }
 0x41c   : > { %v1982_v37 = vpop.f32.mrf.mxu2  ;;  %v5162_v62 = vor.u32 %v6331_v58, %v5161_v57  ;;  %2296 = vmatpush.bf16.msrb.mxu3 %v5174_v59  ;;  %s4414_s15 = sshll.u32 %s4410_s25, 4  ;;  %s4415_s15 = int_to_ptr.hbm [resolvable:$true] %s4414_s15 }
 0x41d   : > { %v5163_v37 = vld [vmem:[#allocation11 + $0xe8] sm:$0xf0] }
 0x41e   : > { %v1868_v0 = vpop.f32.mrf.mxu0  ;;  %2271 = vmatpush.bf16.msrb.mxu1 %v5162_v62 }
 0x41f   : > { %v5166_v0 = vor.u32 %v6330_v60, %v5163_v37 }
 0x421   : > { %v1999_v1 = vpop.f32.mrf.mxu3  ;;  %2297 = vmatpush.bf16.msrb.mxu3 %v5166_v0 }
 0x422   : > { %v2010_v5 = vpack.c.bf16 %v1999_v1, %v1999_v1  ;;  %v5153_v1 = vld [vmem:[#allocation11 + $0xd0] sm:$0xf] }
 0x423   : > { %v5154_v10 = vor.u32 %v6329_v2, %v5153_v1  ;;  %v6800_v1 = vld [vmem:[%s7594_s26 + $0x8] sm:$0xff] }
 0x424   : > { %v2037_v15 = vunpack.c.l.b16 %v2010_v5 }
 0x425   : > { %2272 = vmatpush.bf16.msrb.mxu1 %v5154_v10  ;;  %2298 = vmatpush.bf16.msrb.mxu3 %v5158_v55  ;;  %v5401_v10 = vld [vmem:[#allocation19 + $0x1c0] sm:$0xf] }
 0x426   : > { %v2038_v19 = vpack.c.b16 %v2037_v15, %v2037_v15  ;;  %v6326_v15 = vld [vmem:[#allocation11 + $0xc4] sm:$0xf]  ;;  %v5657_v55 = vld [vmem:[#allocation19 + $0x3c0] sm:$0xf] }
 0x427   : > { %v5150_v17 = vor.u32 %v6326_v15, %v5147_v16  ;;  %v6390_v15 = vld [vmem:[#allocation19 + $0x1c4] sm:$0xf] }
 0x428   : > { %2039 = vrot.lane.b32.xlu1 %v2038_v19, %s7304_s24  ;;  %v6325_v19 = vld [vmem:[#allocation11 + $0xb4] sm:$0xf0]  ;;  %v5403_v16 = vld [vmem:[#allocation19 + $0x1e0] sm:$0xf0]  ;;  %s7205_s24 = sshra.s32 %s4415_s15, 4  ;;  %s7206_s24 = int_to_ptr.hbm [resolvable:$true] %s7205_s24 }
 0x429   : > { %v2001_v23 = vpop.f32.mrf.mxu3  ;;  %2273 = vmatpush.bf16.msrb.mxu1 %v5146_v45  ;;  %v5138_v22 = vor.u32 %v6325_v19, %v5137_v18  ;;  %2299 = vmatpush.bf16.msrb.mxu3 %v5150_v17  ;;  %v5658_v45 = vor.u32 %v6458_v14, %v5657_v55  ;;  %v5406_v17 = vor.u32 %v6390_v15, %v5403_v16  ;;  %v6454_v18 = vld [vmem:[#allocation19 + $0x3c4] sm:$0xf]  ;;  %v5497_v55 = vld [vmem:[#allocation19 + $0x280] sm:$0xf]  ;;  %s7207_s3 = scalar_lea.hbm %s7206_s24, 16  ;;  %p7212_p7 = scmp.lt.s32.totalorder %s7206_s24, %s7978_s5 }
 0x42a   : > { %v5142_v23 = vor.u32 %v6324_v20, %v5139_v21  ;;  %v5659_v19 = vld [vmem:[#allocation19 + $0x3e0] sm:$0xf0]  ;;  %v5369_v20 = vld [vmem:[#allocation19 + $0x180] sm:$0xf]  ;;  %p7208_p1 = scmp.ne.s32.totalorder %s7206_s24, %s7207_s3  ;;  %p7213_p9 = scmp.lt.s32.totalorder %s7211_s14, %s7207_s3 }
 0x42b   : > { %v5662_v21 = vor.u32 %v6454_v18, %v5659_v19  ;;  %3173 = vmatpush.bf16.msra.mxu2 %v5406_v17  ;;  %v6418_v14 = vld [vmem:[#allocation19 + $0x29c] sm:$0xf0]  ;;  %v6350_v15 = vld [vmem:[#allocation19 + $0x84] sm:$0xf] }
 0x42c   : > { %v5243_v16 = vld [vmem:[#allocation19 + $0xa0] sm:$0xf0]  ;;  %v5498_v19 = vor.u32 %v6418_v14, %v5497_v55  ;;  %v6447_v55 = vld [vmem:[#allocation19 + $0x38c] sm:$0xf]  ;;  %p7209_p3 = pnand %p7208_p1, %p7536_p0  ;;  %p7214_p8 = por %p7213_p9, %p7212_p7 }
 0x42d   : > { %2274 = vmatpush.bf16.msrb.mxu1 %v5138_v22  ;;  %2300 = vmatpush.bf16.msrb.mxu3 %v5142_v23  ;;  %v6386_v22 = vld [vmem:[#allocation19 + $0x19c] sm:$0xf0]  ;;  %v5499_v17 = vld [vmem:[#allocation19 + $0x2a0] sm:$0xf0] }
 0x42e   : > { %v5625_v23 = vld [vmem:[#allocation19 + $0x380] sm:$0xf]  ;;  %v5370_v25 = vor.u32 %v6386_v22, %v5369_v20  ;;  %v5246_v20 = vor.u32 %v6350_v15, %v5243_v16  ;;  %v5345_v15 = vld [vmem:[#allocation19 + $0x148] sm:$0xf]  ;;  %p7210_p13 = pneg %p7209_p3 }
 0x42f   : > { %v5626_v9 = vor.u32 %v6450_v24, %v5625_v23  ;;  %v6346_v22 = vld [vmem:[#allocation19 + $0x5c] sm:$0xf0]  ;;  %v6379_v16 = vld [vmem:[#allocation19 + $0x164] sm:$0xf0] }
 0x430   : > { %v5465_v23 = vld [vmem:[#allocation19 + $0x240] sm:$0xf]  ;;  %p7215_p10 = pnand %p7214_p8, %p7210_p13 }
 0x431   : > { %2275 = vmatpush.bf16.msrb.mxu1 %v5130_v12  ;;  %2301 = vmatpush.bf16.msrb.mxu3 %v5134_v29  ;;  %v6382_v12 = vld [vmem:[#allocation19 + $0x184] sm:$0xf] }
 0x432   : > { %v5374_v28 = vor.u32 %v6382_v12, %v5371_v26  ;;  %v5627_v29 = vld [vmem:[#allocation19 + $0x3a0] sm:$0xf0] }
 0x433   : > { %v6342_v12 = vld [vmem:[#allocation19 + $0x44] sm:$0xf] }
 0x434   : > { %v2015_v61 = vpop.permute.xlu0 %2014  ;;  %3174 = vmatpush.bf16.msra.mxu2 %v5374_v28  ;;  %v5211_v26 = vld [vmem:[#allocation19 + $0x60] sm:$0xf0] }
 0x435   : > { %v2043_v5 = vsel %vm1600_vm0, %v2003_v63, %v2015_v61  ;;  %2276 = vmatpush.bf16.msrb.mxu1 %v5122_v33  ;;  %2302 = vmatpush.bf16.msrb.mxu3 %v5126_v34  ;;  %v6799_v63 = vld [vmem:[%s7594_s26] sm:$0xff]  ;;  %v5630_v33 = vor.u32 %v6446_v27, %v5627_v29  ;;  %v5593_v34 = vld [vmem:[#allocation19 + $0x340] sm:$0xf]  ;;  %v6406_v27 = vld [vmem:[#allocation19 + $0x244] sm:$0xf] }
 0x436   : > { %v5467_v28 = vld [vmem:[#allocation19 + $0x260] sm:$0xf0] }
 0x439   : > { %2277 = vmatpush.bf16.msrb.mxu1 %v5114_v40  ;;  %2303 = vmatpush.bf16.msrb.mxu3 %v5118_v41  ;;  %v6438_v40 = vld [vmem:[#allocation19 + $0x344] sm:$0xf] }
 0x43a   : > { %v7754_v49 = vpop.f32.mrf.mxu0  ;;  %v5595_v41 = vld [vmem:[#allocation19 + $0x360] sm:$0xf0] }
 0x43b   : > { %v2007_v43 = vpack.c.bf16 %v7754_v49, %v7754_v49  ;;  %v2094_v49 = vperm.slane %v2091_v54, 1 }
 0x43d   : > { %3160 = vmatpush.bf16.msra.mxu1 %v5658_v45  ;;  %3186 = vmatpush.bf16.msra.mxu3 %v5662_v21  ;;  %v6414_v45 = vld [vmem:[#allocation19 + $0x284] sm:$0xf]  ;;  %v5209_v21 = vld [vmem:[#allocation19 + $0x40] sm:$0xf] }
 0x43e   : > { %v5210_v30 = vor.u32 %v6346_v22, %v5209_v21 }
 0x441   : > { %3161 = vmatpush.bf16.msra.mxu1 %v5626_v9  ;;  %3187 = vmatpush.bf16.msra.mxu3 %v5630_v33  ;;  %v6410_v9 = vld [vmem:[#allocation19 + $0x25c] sm:$0xf0] }
 0x442   : > { %v1944_v50 = vpop.f32.mrf.mxu0  ;;  %v5466_v33 = vor.u32 %v6410_v9, %v5465_v23  ;;  %v6439_v23 = vld [vmem:[#allocation19 + $0x34c] sm:$0xf] }
 0x450   : > { %v2025_v7 = vpop.permute.xlu2 %2024 }
 0x45b   : > { %v2020_v6 = vpop.permute.xlu1 %2019 }
 0x45c   : > { %v2046_v8 = vsel %vm2044_vm3, %v2043_v5, %v2020_v6  ;;  %v7305_v5 = vmov 256.0  }
 0x45d   : > { %v2049_v11 = vsel %vm2047_vm4, %v2046_v8, %v2025_v7  ;;  %6793 = vrcp.f32 %v7305_v5 }
 0x45e   : > { %2265 = vmatmul.bf16.vlgmr.msrb.gmra.mxu0 %v2049_v11  ;;  %2291 = vmatmul.bf16.vlgmr.msrb.gmra.mxu2 %v2049_v11  ;;  %v6394_v11 = vld [vmem:[#allocation19 + $0x1dc] sm:$0xf0] }
 0x45f   : > { %v5402_v13 = vor.u32 %v6394_v11, %v5401_v10  ;;  %v5241_v10 = vld [vmem:[#allocation19 + $0x80] sm:$0xf] }
 0x460   : > { %v6354_v11 = vld [vmem:[#allocation19 + $0x9c] sm:$0xf0] }
 0x461   : > { %3147 = vmatpush.bf16.msra.mxu0 %v5402_v13  ;;  %v5242_v18 = vor.u32 %v6354_v11, %v5241_v10  ;;  %v5379_v11 = vld [vmem:[#allocation19 + $0x1a8] sm:$0xf0] }
 0x463   : > { %v7774_v6 = vpop.eup %6793 }
 0x464   : > { %v7777_v7 = vmul.f32 256.0, %v7774_v6  ;;  %vm2321_vm5 = vweird.f32 %v7774_v6 }
 0x465   : > { %3148 = vmatpush.bf16.msra.mxu0 %v5370_v25  ;;  %v5502_v25 = vor.u32 %v6414_v45, %v5499_v17  ;;  %v5601_v45 = vld [vmem:[#allocation19 + $0x348] sm:$0xf]  ;;  %v5346_v17 = vor.u32 %v6379_v16, %v5345_v15 }
 0x466   : > { %v2318_v8 = vsub.f32 1.0, %v7777_v7  ;;  %v6339_v15 = vld [vmem:[#allocation19 + $0x24] sm:$0xf0] }
 0x467   : > { %v5441_v16 = vld [vmem:[#allocation19 + $0x208] sm:$0xf] }
 0x469   : > { %3149 = vmatpush.bf16.msra.mxu0 %v5338_v38 }
 0x474   : > { %v2030_v42 = vpop.permute.xlu0 %2029 }
 0x475   : > { %v2053_v46 = vsel %vm1600_vm0, %v2007_v43, %v2030_v42  ;;  %v5594_v42 = vor.u32 %v6442_v35, %v5593_v34  ;;  %v5342_v43 = vor.u32 %v6374_v36, %v5339_v39  ;;  %v5214_v34 = vor.u32 %v6342_v12, %v5211_v26  ;;  %v5313_v12 = vld [vmem:[#allocation19 + $0x108] sm:$0xf] }
 0x476   : > { %v5470_v35 = vor.u32 %v6406_v27, %v5467_v28  ;;  %v6371_v26 = vld [vmem:[#allocation19 + $0x124] sm:$0xf0] }
 0x477   : > { %3162 = vmatpush.bf16.msra.mxu1 %v5594_v42  ;;  %3175 = vmatpush.bf16.msra.mxu2 %v5342_v43  ;;  %v6338_v42 = vld [vmem:[#allocation19 + $0x1c] sm:$0xf0]  ;;  %v5569_v27 = vld [vmem:[#allocation19 + $0x308] sm:$0xf]  ;;  %v5314_v28 = vor.u32 %v6371_v26, %v5313_v12 }
 0x478   : > { %v5433_v43 = vld [vmem:[#allocation19 + $0x200] sm:$0xf] }
 0x48d   : > { %v2035_v44 = vpop.permute.xlu0 %2034 }
 0x48e   : > { %v2055_v32 = vsel %vm2044_vm3, %v2053_v46, %v2035_v44  ;;  %v5305_v44 = vld [vmem:[#allocation19 + $0x100] sm:$0xf] }
 0x48f   : > { %v6370_v46 = vld [vmem:[#allocation19 + $0x11c] sm:$0xf0] }
 0x490   : > { %v5306_v54 = vor.u32 %v6370_v46, %v5305_v44  ;;  %v6402_v44 = vld [vmem:[#allocation19 + $0x21c] sm:$0xf0]  ;;  %v6334_v46 = vld [vmem:[#allocation19 + $0x4] sm:$0xf] }
 0x492   : > { %3150 = vmatpush.bf16.msra.mxu0 %v5306_v54  ;;  %v5665_v54 = vld [vmem:[#allocation19 + $0x3c8] sm:$0xf] }
 0x49a   : > { %v2040_v47 = vpop.permute.xlu1 %2039 }
 0x49b   : > { %v2057_v48 = vsel %vm2047_vm4, %v2055_v32, %v2040_v47  ;;  %v5561_v32 = vld [vmem:[#allocation19 + $0x300] sm:$0xf]  ;;  %v5598_v47 = vor.u32 %v6438_v40, %v5595_v41 }
 0x49c   : > { %2278 = vmatmul.bf16.vlgmr.msrb.gmra.mxu1 %v2057_v48  ;;  %2304 = vmatmul.bf16.vlgmr.msrb.gmra.mxu3 %v2057_v48  ;;  %v6434_v48 = vld [vmem:[#allocation19 + $0x31c] sm:$0xf0] }
 0x49d   : > { %3188 = vmatpush.bf16.msra.mxu3 %v5598_v47  ;;  %v5177_v41 = vld [vmem:[#allocation19] sm:$0xf] }
 0x4db   : > { %v2266_v50 = vpop.f32.mrf.mxu0 }
 0x4dc   : > { %v2267_v58 = vadd.f32 %v2266_v50, %v2093_v56  ;;  %v6366_v50 = vld [vmem:[#allocation19 + $0x104] sm:$0xf]  ;;  %v5562_v56 = vor.u32 %v6434_v48, %v5561_v32  ;;  %v5434_v32 = vor.u32 %v6402_v44, %v5433_v43  ;;  %v6359_v44 = vld [vmem:[#allocation19 + $0xcc] sm:$0xf] }
 0x4dd   : > { %v6398_v48 = vld [vmem:[#allocation19 + $0x204] sm:$0xf] }
 0x4de   : > { %3163 = vmatpush.bf16.msra.mxu1 %v5562_v56  ;;  %v6459_v56 = vld [vmem:[#allocation19 + $0x3e4] sm:$0xf0] }
 0x4e1   : > { %v2292_v51 = vpop.f32.mrf.mxu2 }
 0x4e2   : > { %v2293_v59 = vadd.f32 %v2292_v51, %v2094_v49  ;;  %v5307_v51 = vld [vmem:[#allocation19 + $0x120] sm:$0xf0]  ;;  %v5273_v49 = vld [vmem:[#allocation19 + $0xc0] sm:$0xf] }
 0x4e3   : > { %v2268_v52 = vpop.f32.mrf.mxu0 }
 0x4e4   : > { %v6430_v52 = vld [vmem:[#allocation19 + $0x304] sm:$0xf] }
 0x4e9   : > { %v2294_v53 = vpop.f32.mrf.mxu2 }
 0x4ea   : > { %v5563_v53 = vld [vmem:[#allocation19 + $0x320] sm:$0xf0] }
 0x519   : > { %v2279_v57 = vpop.f32.mrf.mxu1 }
 0x51a   : > { %v2280_v60 = vadd.f32 %v2279_v57, %v2267_v58  ;;  %v5310_v57 = vor.u32 %v6366_v50, %v5307_v51  ;;  %v6362_v58 = vld [vmem:[#allocation19 + $0xdc] sm:$0xf0]  ;;  %v5435_v50 = vld [vmem:[#allocation19 + $0x220] sm:$0xf0]  ;;  %v5409_v51 = vld [vmem:[#allocation19 + $0x1c8] sm:$0xf] }
 0x51c   : > { %v7767_v0 = vadd.f32 %v6799_v63, %v2280_v60  ;;  %v2319_v60 = vmul.f32 %v7774_v6, %v2318_v8  ;;  %v5275_v63 = vld [vmem:[#allocation19 + $0xe0] sm:$0xf0]  ;;  %3176 = vmatpush.bf16.msra.mxu2 %v5310_v57 }
 0x51e   : > { %v2320_v13 = vadd.f32 %v7774_v6, %v2319_v60  ;;  %v6455_v60 = vld [vmem:[#allocation19 + $0x3cc] sm:$0xf] }
 0x51f   : > { %v2305_v37 = vpop.f32.mrf.mxu3 }
 0x520   : > { %v2306_v61 = vadd.f32 %v2305_v37, %v2293_v59  ;;  %v5529_v59 = vld [vmem:[#allocation19 + $0x2c0] sm:$0xf]  ;;  %v5566_v37 = vor.u32 %v6430_v52, %v5563_v53  ;;  %v7784_v24 = vsel %vm2321_vm5, %v7774_v6, %v2320_v13  ;;  %v5438_v52 = vor.u32 %v6398_v48, %v5435_v50  ;;  %v6395_v53 = vld [vmem:[#allocation19 + $0x1e4] sm:$0xf0]  ;;  %v5635_v13 = vld [vmem:[#allocation19 + $0x3a8] sm:$0xf0] }
 0x521   : > { %v2281_v62 = vpop.f32.mrf.mxu1  ;;  %v5410_v57 = vor.u32 %v6395_v53, %v5409_v51  ;;  %v5638_v14 = vor.u32 %v6447_v55, %v5635_v13  ;;  %v5539_v48 = vld [vmem:[#allocation19 + $0x2e8] sm:$0xf0]  ;;  %v5249_v51 = vld [vmem:[#allocation19 + $0x88] sm:$0xf] }
 0x522   : > { %v7770_v2 = vadd.f32 %v6800_v1, %v2306_v61  ;;  %v6426_v61 = vld [vmem:[#allocation19 + $0x2dc] sm:$0xf0]  ;;  %v6358_v62 = vld [vmem:[#allocation19 + $0xc4] sm:$0xf]  ;;  %3189 = vmatpush.bf16.msra.mxu3 %v5566_v37  ;;  %v5505_v53 = vld [vmem:[#allocation19 + $0x288] sm:$0xf] }
 0x523   : > { %v6422_v1 = vld [vmem:[#allocation19 + $0x2c4] sm:$0xf]  ;;  %v5530_v5 = vor.u32 %v6426_v61, %v5529_v59  ;;  %v5278_v7 = vor.u32 %v6358_v62, %v5275_v63  ;;  %v5411_v59 = vld [vmem:[#allocation19 + $0x1e8] sm:$0xf0]  ;;  %v5377_v62 = vld [vmem:[#allocation19 + $0x188] sm:$0xf] }
 0x524   : > { %v2313_v3 = vadd.f32 %v7770_v2, %v7767_v0  ;;  %v5667_v61 = vld [vmem:[#allocation19 + $0x3e8] sm:$0xf0]  ;;  %v6387_v63 = vld [vmem:[#allocation19 + $0x1a4] sm:$0xf0] }
 0x525   : > { %3164 = vmatpush.bf16.msra.mxu1 %v5530_v5  ;;  %3177 = vmatpush.bf16.msra.mxu2 %v5278_v7  ;;  %v6451_v5 = vld [vmem:[#allocation19 + $0x3a4] sm:$0xf0]  ;;  %v6383_v7 = vld [vmem:[#allocation19 + $0x18c] sm:$0xf] }
 0x526   : > { %2314 = vadd.xlane.f32.xlu2 %v2313_v3  ;;  %v5531_v3 = vld [vmem:[#allocation19 + $0x2e0] sm:$0xf0]  ;;  %v6407_v55 = vld [vmem:[#allocation19 + $0x24c] sm:$0xf] }
 0x527   : > { %v2307_v4 = vpop.f32.mrf.mxu3  ;;  %v5534_v8 = vor.u32 %v6422_v1, %v5531_v3  ;;  %v5670_v1 = vor.u32 %v6455_v60, %v5667_v61  ;;  %v5378_v3 = vor.u32 %v6387_v63, %v5377_v62  ;;  %v6415_v60 = vld [vmem:[#allocation19 + $0x28c] sm:$0xf]  ;;  %v5217_v62 = vld [vmem:[#allocation19 + $0x48] sm:$0xf] }
 0x528   : > { %v5274_v4 = vor.u32 %v6362_v58, %v5273_v49  ;;  %v5666_v49 = vor.u32 %v6459_v56, %v5665_v54  ;;  %v6391_v58 = vld [vmem:[#allocation19 + $0x1cc] sm:$0xf]  ;;  %v6419_v56 = vld [vmem:[#allocation19 + $0x2a4] sm:$0xf0] }
 0x529   : > { %3190 = vmatpush.bf16.msra.mxu3 %v5534_v8  ;;  %3165 = vmatpush.bf16.msra.mxu1 %v5498_v19  ;;  %v5414_v37 = vor.u32 %v6391_v58, %v5411_v59  ;;  %v5382_v8 = vor.u32 %v6383_v7, %v5379_v11  ;;  %v6375_v19 = vld [vmem:[#allocation19 + $0x14c] sm:$0xf]  ;;  %v5506_v58 = vor.u32 %v6419_v56, %v5505_v53  ;;  %v6347_v63 = vld [vmem:[#allocation19 + $0x64] sm:$0xf0]  ;;  %v5419_v53 = vld [vmem:[#allocation19 + $0x1f0] sm:$0xf0] }
 0x52a   : > { %3151 = vmatpush.bf16.msra.mxu0 %v5274_v4  ;;  %3178 = vmatpush.bf16.msra.mxu2 %v5246_v20  ;;  %v5633_v4 = vld [vmem:[#allocation19 + $0x388] sm:$0xf]  ;;  %v5347_v20 = vld [vmem:[#allocation19 + $0x168] sm:$0xf0]  ;;  %v5675_v56 = vld [vmem:[#allocation19 + $0x3f0] sm:$0xf0] }
 0x52b   : > { %v5634_v10 = vor.u32 %v6451_v5, %v5633_v4  ;;  %v5350_v22 = vor.u32 %v6375_v19, %v5347_v20  ;;  %v6411_v4 = vld [vmem:[#allocation19 + $0x264] sm:$0xf0]  ;;  %v6343_v5 = vld [vmem:[#allocation19 + $0x4c] sm:$0xf] }
 0x52c   : > { %v5219_v7 = vld [vmem:[#allocation19 + $0x68] sm:$0xf0] }
 0x52d   : > { %3191 = vmatpush.bf16.msra.mxu3 %v5502_v25  ;;  %3166 = vmatpush.bf16.msra.mxu1 %v5466_v33  ;;  %v5603_v25 = vld [vmem:[#allocation19 + $0x368] sm:$0xf0]  ;;  %v5222_v11 = vor.u32 %v6343_v5, %v5219_v7 }
 0x52e   : > { %3152 = vmatpush.bf16.msra.mxu0 %v5242_v18  ;;  %3179 = vmatpush.bf16.msra.mxu2 %v5214_v34  ;;  %v6443_v18 = vld [vmem:[#allocation19 + $0x364] sm:$0xf0]  ;;  %v5606_v9 = vor.u32 %v6439_v23, %v5603_v25  ;;  %v5475_v13 = vld [vmem:[#allocation19 + $0x268] sm:$0xf0] }
 0x52f   : > { %v5602_v21 = vor.u32 %v6443_v18, %v5601_v45  ;;  %v6335_v18 = vld [vmem:[#allocation19 + $0xc] sm:$0xf] }
 0x530   : > { %v5187_v19 = vld [vmem:[#allocation19 + $0x28] sm:$0xf0] }
 0x531   : > { %3192 = vmatpush.bf16.msra.mxu3 %v5470_v35  ;;  %3167 = vmatpush.bf16.msra.mxu1 %v5434_v32  ;;  %v6431_v35 = vld [vmem:[#allocation19 + $0x30c] sm:$0xf] }
 0x532   : > { %3153 = vmatpush.bf16.msra.mxu0 %v5210_v30  ;;  %v6367_v30 = vld [vmem:[#allocation19 + $0x10c] sm:$0xf] }
 0x533   : > { %v5443_v23 = vld [vmem:[#allocation19 + $0x228] sm:$0xf0] }
 0x535   : > { %3193 = vmatpush.bf16.msra.mxu3 %v5438_v52  ;;  %3212 = vmatpush.bf16.msrb.mxu1 %v5666_v49  ;;  %v6355_v52 = vld [vmem:[#allocation19 + $0xa4] sm:$0xf0]  ;;  %v5251_v49 = vld [vmem:[#allocation19 + $0xa8] sm:$0xf0] }
 0x536   : > { %v5250_v54 = vor.u32 %v6355_v52, %v5249_v51 }
 0x539   : > { %3238 = vmatpush.bf16.msrb.mxu3 %v5670_v1  ;;  %3213 = vmatpush.bf16.msrb.mxu1 %v5634_v10  ;;  %v5473_v1 = vld [vmem:[#allocation19 + $0x248] sm:$0xf] }
 0x53a   : > { %v5474_v10 = vor.u32 %v6411_v4, %v5473_v1  ;;  %v5387_v1 = vld [vmem:[#allocation19 + $0x1b0] sm:$0xf0] }
 0x53b   : > { %v5643_v4 = vld [vmem:[#allocation19 + $0x3b0] sm:$0xf0] }
 0x53d   : > { %3239 = vmatpush.bf16.msrb.mxu3 %v5638_v14  ;;  %3214 = vmatpush.bf16.msrb.mxu1 %v5602_v21  ;;  %v5185_v14 = vld [vmem:[#allocation19 + $0x8] sm:$0xf]  ;;  %v5190_v21 = vor.u32 %v6335_v18, %v5187_v19 }
 0x53e   : > { %v5186_v45 = vor.u32 %v6339_v15, %v5185_v14  ;;  %v6444_v14 = vld [vmem:[#allocation19 + $0x36c] sm:$0xf0]  ;;  %v6376_v15 = vld [vmem:[#allocation19 + $0x154] sm:$0xf] }
 0x541   : > { %3240 = vmatpush.bf16.msrb.mxu3 %v5606_v9 }
 0x599   : > { %v2315_v29 = vpop.xlane.xlu2 %2314 }
 0x59a   : > { %v2323_v31 = vmul.f32 %v7784_v24, %v2315_v29  ;;  %v6435_v29 = vld [vmem:[#allocation19 + $0x324] sm:$0xf0] }
 0x59b   : > { %v5570_v33 = vor.u32 %v6435_v29, %v5569_v27 }
 0x59c   : > { %v7788_v6 = vsub.f32 %v7767_v0, %v2323_v31  ;;  %v7791_v36 = vsub.f32 %v7770_v2, %v2323_v31  ;;  %v5178_v0 = vor.u32 %v6338_v42, %v5177_v41  ;;  %v5179_v2 = vld [vmem:[#allocation19 + $0x20] sm:$0xf0]  ;;  %v5315_v31 = vld [vmem:[#allocation19 + $0x128] sm:$0xf0]  ;;  %v6363_v41 = vld [vmem:[#allocation19 + $0xe4] sm:$0xf0] }
 0x59d   : > { %v5182_v47 = vor.u32 %v6334_v46, %v5179_v2  ;;  %v5318_v34 = vor.u32 %v6367_v30, %v5315_v31  ;;  %v5537_v42 = vld [vmem:[#allocation19 + $0x2c8] sm:$0xf]  ;;  %3215 = vmatpush.bf16.msrb.mxu1 %v5570_v33  ;;  %v5283_v46 = vld [vmem:[#allocation19 + $0xe8] sm:$0xf0]  ;;  %v2311_v30 = vld [vmem:[#allocation16] sm:$0x3] }
 0x59e   : > { %v2326_v38 = vmul.f32 %v7788_v6, %v7788_v6  ;;  %v2327_v39 = vmul.f32 %v7791_v36, %v7791_v36  ;;  %3154 = vmatpush.bf16.msra.mxu0 %v5178_v0  ;;  %v6427_v0 = vld [vmem:[#allocation19 + $0x2e4] sm:$0xf0]  ;;  %v5286_v32 = vor.u32 %v6359_v44, %v5283_v46 }
 0x59f   : > { %3180 = vmatpush.bf16.msra.mxu2 %v5182_v47  ;;  %v5538_v2 = vor.u32 %v6427_v0, %v5537_v42  ;;  %v6423_v47 = vld [vmem:[#allocation19 + $0x2cc] sm:$0xf] }
 0x5a0   : > { %v2328_v40 = vadd.f32 %v2327_v39, %v2326_v38  ;;  %v5571_v38 = vld [vmem:[#allocation19 + $0x328] sm:$0xf0]  ;;  %v5542_v50 = vor.u32 %v6423_v47, %v5539_v48  ;;  %v5673_v47 = vld [vmem:[#allocation19 + $0x3d0] sm:$0xf] }
 0x5a1   : > { %v5574_v39 = vor.u32 %v6431_v35, %v5571_v38  ;;  %3216 = vmatpush.bf16.msrb.mxu1 %v5538_v2  ;;  %v2345_v35 = vperm.slane %v2311_v30, 1  ;;  %v2312_v38 = vld [vmem:[#allocation17] sm:$0x3]  ;;  %v5417_v2 = vld [vmem:[#allocation19 + $0x1d0] sm:$0xf] }
 0x5a2   : > { %2329 = vadd.xlane.f32.xlu0 %v2328_v40  ;;  %3199 = vmatpush.bf16.msrb.mxu0 %v5410_v57  ;;  %v5281_v40 = vld [vmem:[#allocation19 + $0xc8] sm:$0xf]  ;;  %v6351_v57 = vld [vmem:[#allocation19 + $0x8c] sm:$0xf]  ;;  %v2354_v42 = vperm.slane %v2312_v38, 1 }
 0x5a3   : > { %3225 = vmatpush.bf16.msrb.mxu2 %v5414_v37  ;;  %v5282_v43 = vor.u32 %v6363_v41, %v5281_v40  ;;  %3241 = vmatpush.bf16.msrb.mxu3 %v5574_v39  ;;  %v5254_v59 = vor.u32 %v6351_v57, %v5251_v49  ;;  %v5507_v37 = vld [vmem:[#allocation19 + $0x2a8] sm:$0xf0]  ;;  %v2353_v41 = vperm.slane %v2312_v38, 0  ;;  %v6460_v48 = vld [vmem:[#allocation19 + $0x3ec] sm:$0xf0] }
 0x5a4   : > { %v5510_v61 = vor.u32 %v6415_v60, %v5507_v37  ;;  %v5674_v49 = vor.u32 %v6460_v48, %v5673_v47  ;;  %v5545_v38 = vld [vmem:[#allocation19 + $0x2d0] sm:$0xf] }
 0x5a5   : > { %3217 = vmatpush.bf16.msrb.mxu1 %v5506_v58  ;;  %v5385_v58 = vld [vmem:[#allocation19 + $0x190] sm:$0xf] }
 0x5a6   : > { %3200 = vmatpush.bf16.msrb.mxu0 %v5378_v3  ;;  %v5218_v3 = vor.u32 %v6347_v63, %v5217_v62  ;;  %v6452_v62 = vld [vmem:[#allocation19 + $0x3ac] sm:$0xf0]  ;;  %v6384_v63 = vld [vmem:[#allocation19 + $0x194] sm:$0xf] }
 0x5a7   : > { %3226 = vmatpush.bf16.msrb.mxu2 %v5382_v8  ;;  %3242 = vmatpush.bf16.msrb.mxu3 %v5542_v50  ;;  %v5478_v8 = vor.u32 %v6407_v55, %v5475_v13  ;;  %v6392_v50 = vld [vmem:[#allocation19 + $0x1d4] sm:$0xf]  ;;  %v5390_v55 = vor.u32 %v6384_v63, %v5387_v1  ;;  %v5513_v48 = vld [vmem:[#allocation19 + $0x290] sm:$0xf] }
 0x5a8   : > { %v5422_v60 = vor.u32 %v6392_v50, %v5419_v53  ;;  %v6420_v50 = vld [vmem:[#allocation19 + $0x2ac] sm:$0xf0]  ;;  %v6352_v53 = vld [vmem:[#allocation19 + $0x94] sm:$0xf] }
 0x5a9   : > { %3218 = vmatpush.bf16.msrb.mxu1 %v5474_v10  ;;  %v5353_v10 = vld [vmem:[#allocation19 + $0x150] sm:$0xf]  ;;  %v6344_v1 = vld [vmem:[#allocation19 + $0x54] sm:$0xf] }
 0x5aa   : > { %3201 = vmatpush.bf16.msrb.mxu0 %v5346_v17  ;;  %v6403_v17 = vld [vmem:[#allocation19 + $0x224] sm:$0xf0]  ;;  %v6412_v63 = vld [vmem:[#allocation19 + $0x26c] sm:$0xf0] }
 0x5ab   : > { %3227 = vmatpush.bf16.msrb.mxu2 %v5350_v22  ;;  %3243 = vmatpush.bf16.msrb.mxu3 %v5510_v61  ;;  %v5442_v20 = vor.u32 %v6403_v17, %v5441_v16  ;;  %v6399_v22 = vld [vmem:[#allocation19 + $0x20c] sm:$0xf]  ;;  %v5641_v61 = vld [vmem:[#allocation19 + $0x390] sm:$0xf]  ;;  %v5355_v16 = vld [vmem:[#allocation19 + $0x170] sm:$0xf0] }
 0x5ac   : > { %v5446_v25 = vor.u32 %v6399_v22, %v5443_v23  ;;  %v5642_v7 = vor.u32 %v6452_v62, %v5641_v61  ;;  %v5611_v17 = vld [vmem:[#allocation19 + $0x370] sm:$0xf0]  ;;  %v5358_v22 = vor.u32 %v6376_v15, %v5355_v16  ;;  %v5481_v62 = vld [vmem:[#allocation19 + $0x250] sm:$0xf] }
 0x5ad   : > { %3219 = vmatpush.bf16.msrb.mxu1 %v5442_v20  ;;  %v5321_v20 = vld [vmem:[#allocation19 + $0x110] sm:$0xf]  ;;  %v6336_v16 = vld [vmem:[#allocation19 + $0x14] sm:$0xf] }
 0x5ae   : > { %3202 = vmatpush.bf16.msrb.mxu0 %v5314_v28 }
 0x5af   : > { %3228 = vmatpush.bf16.msrb.mxu2 %v5318_v34  ;;  %3244 = vmatpush.bf16.msrb.mxu3 %v5478_v8  ;;  %v2344_v34 = vperm.slane %v2311_v30, 0  ;;  %v5609_v8 = vld [vmem:[#allocation19 + $0x350] sm:$0xf] }
 0x5b0   : > { %v5610_v19 = vor.u32 %v6444_v14, %v5609_v8  ;;  %v6404_v8 = vld [vmem:[#allocation19 + $0x22c] sm:$0xf0] }
 0x5b2   : > { %3203 = vmatpush.bf16.msrb.mxu0 %v5282_v43 }
 0x5b3   : > { %3229 = vmatpush.bf16.msrb.mxu2 %v5286_v32  ;;  %3245 = vmatpush.bf16.msrb.mxu3 %v5446_v25  ;;  %v6396_v32 = vld [vmem:[#allocation19 + $0x1ec] sm:$0xf0] }
 0x5b4   : > { %v5577_v25 = vld [vmem:[#allocation19 + $0x310] sm:$0xf] }
 0x5b6   : > { %3204 = vmatpush.bf16.msrb.mxu0 %v5250_v54  ;;  %v6456_v54 = vld [vmem:[#allocation19 + $0x3d4] sm:$0xf] }
 0x5b7   : > { %3230 = vmatpush.bf16.msrb.mxu2 %v5254_v59  ;;  %v6388_v59 = vld [vmem:[#allocation19 + $0x1ac] sm:$0xf0]  ;;  %v5678_v37 = vor.u32 %v6456_v54, %v5675_v56  ;;  %v5259_v54 = vld [vmem:[#allocation19 + $0xb0] sm:$0xf0] }
 0x5b8   : > { %v5386_v5 = vor.u32 %v6388_v59, %v5385_v58  ;;  %v6416_v56 = vld [vmem:[#allocation19 + $0x294] sm:$0xf]  ;;  %v5514_v58 = vor.u32 %v6420_v50, %v5513_v48  ;;  %v5225_v59 = vld [vmem:[#allocation19 + $0x50] sm:$0xf]  ;;  %v5617_v50 = vld [vmem:[#allocation19 + $0x358] sm:$0xf] }
 0x5ba   : > { %3205 = vmatpush.bf16.msrb.mxu0 %v5218_v3  ;;  %v6448_v3 = vld [vmem:[#allocation19 + $0x394] sm:$0xf] }
 0x5bb   : > { %3231 = vmatpush.bf16.msrb.mxu2 %v5222_v11  ;;  %v6380_v11 = vld [vmem:[#allocation19 + $0x16c] sm:$0xf0]  ;;  %v5646_v13 = vor.u32 %v6448_v3, %v5643_v4  ;;  %v5227_v3 = vld [vmem:[#allocation19 + $0x70] sm:$0xf0] }
 0x5bc   : > { %v5354_v18 = vor.u32 %v6380_v11, %v5353_v10  ;;  %v6408_v4 = vld [vmem:[#allocation19 + $0x254] sm:$0xf]  ;;  %v5482_v11 = vor.u32 %v6412_v63, %v5481_v62  ;;  %v5230_v14 = vor.u32 %v6344_v1, %v5227_v3  ;;  %v5585_v63 = vld [vmem:[#allocation19 + $0x318] sm:$0xf]  ;;  %v6369_v3 = vld [vmem:[#allocation19 + $0x11c] sm:$0xf] }
 0x5bd   : > { %v6437_v1 = vld [vmem:[#allocation19 + $0x334] sm:$0xf0] }
 0x5be   : > { %3206 = vmatpush.bf16.msrb.mxu0 %v5186_v45  ;;  %v6440_v45 = vld [vmem:[#allocation19 + $0x354] sm:$0xf] }
 0x5bf   : > { %3232 = vmatpush.bf16.msrb.mxu2 %v5190_v21  ;;  %v6372_v21 = vld [vmem:[#allocation19 + $0x12c] sm:$0xf0]  ;;  %v5614_v23 = vor.u32 %v6440_v45, %v5611_v17  ;;  %v5195_v45 = vld [vmem:[#allocation19 + $0x30] sm:$0xf0] }
 0x5c0   : > { %v6400_v17 = vld [vmem:[#allocation19 + $0x214] sm:$0xf] }
 0x615   : > { %v2330_v9 = vpop.xlane.xlu0 %2329 }
 0x616   : > { %v2331_v12 = vmul.f32 %v2330_v9, %v7784_v24  ;;  %v6436_v9 = vld [vmem:[#allocation19 + $0x32c] sm:$0xf0] }
 0x617   : > { %v5578_v30 = vor.u32 %v6436_v9, %v5577_v25 }
 0x618   : > { %v2332_v26 = vadd.f32 1e-05, %v2331_v12  ;;  %v6368_v12 = vld [vmem:[#allocation19 + $0x114] sm:$0xf] }
 0x61a   : > { %6795 = vrsqrt.f32 %v2332_v26  ;;  %vm2339_vm7 = vweird.f32 %v2332_v26 }
 0x620   : > { %v6796_v27 = vpop.eup %6795 }
 0x621   : > { %v2334_v28 = vmul.f32 %v6796_v27, %v2332_v26  ;;  %vm2340_vm6 = vweird.f32 %v6796_v27  ;;  %v5323_v26 = vld [vmem:[#allocation19 + $0x130] sm:$0xf0] }
 0x622   : > { %vm2341_vm8 = vmor %vm2339_vm7, %vm2340_vm6 }
 0x623   : > { %v2335_v29 = vmul.f32 %v6796_v27, %v2334_v28  ;;  %v5579_v28 = vld [vmem:[#allocation19 + $0x330] sm:$0xf0] }
 0x625   : > { %v2336_v31 = vmul.f32 0.5, %v2335_v29  ;;  %v5322_v29 = vor.u32 %v6372_v21, %v5321_v20  ;;  %v6397_v20 = vld [vmem:[#allocation19 + $0x1f4] sm:$0xf0] }
 0x626   : > { %v5681_v21 = vld [vmem:[#allocation19 + $0x3d8] sm:$0xf] }
 0x627   : > { %v2337_v33 = vsub.f32 1.5, %v2336_v31  ;;  %v5289_v31 = vld [vmem:[#allocation19 + $0xd0] sm:$0xf] }
 0x629   : > { %v2338_v39 = vmul.f32 %v6796_v27, %v2337_v33  ;;  %v6364_v33 = vld [vmem:[#allocation19 + $0xec] sm:$0xf0] }
 0x62b   : > { %v2342_v40 = vsel %vm2341_vm8, %v6796_v27, %v2338_v39  ;;  %v6432_v27 = vld [vmem:[#allocation19 + $0x314] sm:$0xf]  ;;  %v6428_v39 = vld [vmem:[#allocation19 + $0x2ec] sm:$0xf0] }
 0x62c   : > { %v2348_v43 = vmul.f32 %v2344_v34, %v2342_v40  ;;  %v2349_v0 = vmul.f32 %v2345_v35, %v2342_v40  ;;  %v5326_v34 = vor.u32 %v6368_v12, %v5323_v26  ;;  %v5582_v35 = vor.u32 %v6432_v27, %v5579_v28  ;;  %v6360_v40 = vld [vmem:[#allocation19 + $0xd4] sm:$0xf]  ;;  %v5427_v12 = vld [vmem:[#allocation19 + $0x1f8] sm:$0xf0] }
 0x62d   : > { %v6457_v26 = vld [vmem:[#allocation19 + $0x3dc] sm:$0xf]  ;;  %v5198_v28 = vor.u32 %v6336_v16, %v5195_v45  ;;  %v6429_v16 = vld [vmem:[#allocation19 + $0x2f4] sm:$0xf0] }
 0x62e   : > { %v2350_v44 = vmul.f32 %v2348_v43, %v7788_v6  ;;  %v2351_v46 = vmul.f32 %v2349_v0, %v7791_v36  ;;  %v5418_v36 = vor.u32 %v6396_v32, %v5417_v2  ;;  %v5547_v43 = vld [vmem:[#allocation19 + $0x2f0] sm:$0xf0]  ;;  %v5290_v0 = vor.u32 %v6364_v33, %v5289_v31  ;;  %v6356_v2 = vld [vmem:[#allocation19 + $0xac] sm:$0xf0]  ;;  %v5683_v27 = vld [vmem:[#allocation19 + $0x3f8] sm:$0xf0] }
 0x62f   : > { %v5393_v33 = vld [vmem:[#allocation19 + $0x198] sm:$0xf]  ;;  %v6361_v45 = vld [vmem:[#allocation19 + $0xdc] sm:$0xf] }
 0x630   : > { %v7800_v51 = vadd.f32 %v2353_v41, %v2350_v44  ;;  %v7802_v52 = vadd.f32 %v2354_v42, %v2351_v46  ;;  %v5291_v41 = vld [vmem:[#allocation19 + $0xf0] sm:$0xf0]  ;;  %v5546_v44 = vor.u32 %v6428_v39, %v5545_v38  ;;  %v5257_v46 = vld [vmem:[#allocation19 + $0x90] sm:$0xf]  ;;  %v5686_v38 = vor.u32 %v6457_v26, %v5683_v27  ;;  %v5649_v39 = vld [vmem:[#allocation19 + $0x398] sm:$0xf] }
 0x631   : > { %v6424_v42 = vld [vmem:[#allocation19 + $0x2d4] sm:$0xf]  ;;  %v5294_v32 = vor.u32 %v6360_v40, %v5291_v41  ;;  %v6453_v40 = vld [vmem:[#allocation19 + $0x3b4] sm:$0xf0]  ;;  %v6385_v41 = vld [vmem:[#allocation19 + $0x19c] sm:$0xf] }
 0x632   : > { %v7806_v57 = vpack.c.bf16 %v7800_v51, %v7800_v51  ;;  %v7810_v6 = vpack.c.bf16 %v7802_v52, %v7802_v52  ;;  %v5550_v47 = vor.u32 %v6424_v42, %v5547_v43  ;;  %v5395_v42 = vld [vmem:[#allocation19 + $0x1b8] sm:$0xf0]  ;;  %v6421_v26 = vld [vmem:[#allocation19 + $0x2b4] sm:$0xf0] }
 0x633   : > { %v6449_v43 = vld [vmem:[#allocation19 + $0x39c] sm:$0xf] }
 0x634   : > { %3155 = vmatmul.bf16.vlgmr.msra.gmra.mxu0 %v7806_v57  ;;  %3168 = vmatmul.bf16.vlgmr.msra.gmra.mxu1 %v7810_v6  ;;  %v6353_v27 = vld [vmem:[#allocation19 + $0x9c] sm:$0xf] }
 0x635   : > { %3181 = vmatmul.bf16.vlgmr.msra.gmra.mxu2 %v7806_v57  ;;  %3194 = vmatmul.bf16.vlgmr.msra.gmra.mxu3 %v7810_v6 }
 0x636   : > { %3251 = vmatpush.bf16.msra.mxu0 %v5418_v36  ;;  %3264 = vmatpush.bf16.msra.mxu1 %v5674_v49  ;;  %v5515_v36 = vld [vmem:[#allocation19 + $0x2b0] sm:$0xf0]  ;;  %v5258_v49 = vor.u32 %v6356_v2, %v5257_v46  ;;  %v5650_v46 = vor.u32 %v6453_v40, %v5649_v39  ;;  %v5361_v2 = vld [vmem:[#allocation19 + $0x158] sm:$0xf] }
 0x637   : > { %3277 = vmatpush.bf16.msra.mxu2 %v5422_v60  ;;  %3290 = vmatpush.bf16.msra.mxu3 %v5678_v37  ;;  %v6348_v60 = vld [vmem:[#allocation19 + $0x6c] sm:$0xf0]  ;;  %v5262_v37 = vor.u32 %v6352_v53, %v5259_v54  ;;  %v5518_v61 = vor.u32 %v6416_v56, %v5515_v36  ;;  %v6445_v53 = vld [vmem:[#allocation19 + $0x374] sm:$0xf0]  ;;  %v6377_v54 = vld [vmem:[#allocation19 + $0x15c] sm:$0xf] }
 0x638   : > { %v5226_v10 = vor.u32 %v6348_v60, %v5225_v59  ;;  %v5363_v56 = vld [vmem:[#allocation19 + $0x178] sm:$0xf0]  ;;  %v5618_v59 = vor.u32 %v6445_v53, %v5617_v50  ;;  %v5329_v60 = vld [vmem:[#allocation19 + $0x118] sm:$0xf] }
 0x639   : > { %v6441_v36 = vld [vmem:[#allocation19 + $0x35c] sm:$0xf]  ;;  %v5489_v40 = vld [vmem:[#allocation19 + $0x258] sm:$0xf] }
 0x63a   : > { %3252 = vmatpush.bf16.msra.mxu0 %v5386_v5  ;;  %3265 = vmatpush.bf16.msra.mxu1 %v5642_v7  ;;  %v5483_v5 = vld [vmem:[#allocation19 + $0x270] sm:$0xf0]  ;;  %v5193_v7 = vld [vmem:[#allocation19 + $0x10] sm:$0xf] }
 0x63b   : > { %3278 = vmatpush.bf16.msra.mxu2 %v5390_v55  ;;  %3291 = vmatpush.bf16.msra.mxu3 %v5646_v13  ;;  %v6340_v55 = vld [vmem:[#allocation19 + $0x2c] sm:$0xf0]  ;;  %v5486_v15 = vor.u32 %v6408_v4, %v5483_v5  ;;  %v5331_v4 = vld [vmem:[#allocation19 + $0x138] sm:$0xf0] }
 0x63c   : > { %v5449_v13 = vld [vmem:[#allocation19 + $0x210] sm:$0xf]  ;;  %v5194_v25 = vor.u32 %v6340_v55, %v5193_v7  ;;  %v6433_v5 = vld [vmem:[#allocation19 + $0x31c] sm:$0xf]  ;;  %v5297_v55 = vld [vmem:[#allocation19 + $0xd8] sm:$0xf] }
 0x63d   : > { %v5450_v9 = vor.u32 %v6404_v8, %v5449_v13  ;;  %v5587_v7 = vld [vmem:[#allocation19 + $0x338] sm:$0xf0]  ;;  %v6365_v13 = vld [vmem:[#allocation19 + $0xf4] sm:$0xf0]  ;;  %v5334_v8 = vor.u32 %v6369_v3, %v5331_v4 }
 0x63e   : > { %3253 = vmatpush.bf16.msra.mxu0 %v5354_v18  ;;  %3266 = vmatpush.bf16.msra.mxu1 %v5610_v19  ;;  %v5451_v18 = vld [vmem:[#allocation19 + $0x230] sm:$0xf0]  ;;  %v5425_v19 = vld [vmem:[#allocation19 + $0x1d8] sm:$0xf] }
 0x63f   : > { %3279 = vmatpush.bf16.msra.mxu2 %v5358_v22  ;;  %3292 = vmatpush.bf16.msra.mxu3 %v5614_v23  ;;  %v6461_v22 = vld [vmem:[#allocation19 + $0x3f4] sm:$0xf0]  ;;  %v6393_v23 = vld [vmem:[#allocation19 + $0x1dc] sm:$0xf] }
 0x640   : > { %v5682_v31 = vor.u32 %v6461_v22, %v5681_v21  ;;  %v5265_v22 = vld [vmem:[#allocation19 + $0x98] sm:$0xf] }
 0x642   : > { %3254 = vmatpush.bf16.msra.mxu0 %v5322_v29  ;;  %3267 = vmatpush.bf16.msra.mxu1 %v5578_v30  ;;  %v5454_v29 = vor.u32 %v6400_v17, %v5451_v18  ;;  %v5426_v30 = vor.u32 %v6397_v20, %v5425_v19  ;;  %v5299_v17 = vld [vmem:[#allocation19 + $0xf8] sm:$0xf0]  ;;  %v5298_v20 = vor.u32 %v6365_v13, %v5297_v55  ;;  %v6475_v55 = vld [vmem:[#allocation20 + $0x64] sm:$0xf0]  ;;  %v5801_v13 = vld [vmem:[#allocation20 + $0xe0] sm:$0xf] }
 0x643   : > { %3280 = vmatpush.bf16.msra.mxu2 %v5326_v34  ;;  %3293 = vmatpush.bf16.msra.mxu3 %v5582_v35  ;;  %v6389_v34 = vld [vmem:[#allocation19 + $0x1b4] sm:$0xf0]  ;;  %v5430_v35 = vor.u32 %v6393_v23, %v5427_v12  ;;  %v6425_v18 = vld [vmem:[#allocation19 + $0x2dc] sm:$0xf] }
 0x644   : > { %3207 = vmatmul.bf16.vlgmr.msrb.gmra.mxu0 %v7806_v57  ;;  %3220 = vmatmul.bf16.vlgmr.msrb.gmra.mxu1 %v7810_v6  ;;  %v5555_v19 = vld [vmem:[#allocation19 + $0x2f8] sm:$0xf0]  ;;  %v6357_v23 = vld [vmem:[#allocation19 + $0xb4] sm:$0xf0] }
 0x645   : > { %3233 = vmatmul.bf16.vlgmr.msrb.gmra.mxu2 %v7806_v57  ;;  %3246 = vmatmul.bf16.vlgmr.msrb.gmra.mxu3 %v7810_v6  ;;  %v5521_v12 = vld [vmem:[#allocation19 + $0x298] sm:$0xf] }
 0x646   : > { %3255 = vmatpush.bf16.msra.mxu0 %v5290_v0  ;;  %3268 = vmatpush.bf16.msra.mxu1 %v5546_v44  ;;  %v5651_v0 = vld [vmem:[#allocation19 + $0x3b8] sm:$0xf0]  ;;  %v5394_v44 = vor.u32 %v6389_v34, %v5393_v33  ;;  %v5522_v33 = vor.u32 %v6421_v26, %v5521_v12  ;;  %v5233_v34 = vld [vmem:[#allocation19 + $0x58] sm:$0xf] }
 0x647   : > { %3281 = vmatpush.bf16.msra.mxu2 %v5294_v32  ;;  %3294 = vmatpush.bf16.msra.mxu3 %v5550_v47  ;;  %v6381_v32 = vld [vmem:[#allocation19 + $0x174] sm:$0xf0]  ;;  %v5398_v47 = vor.u32 %v6385_v41, %v5395_v42  ;;  %v5654_v48 = vor.u32 %v6449_v43, %v5651_v0  ;;  %v6345_v42 = vld [vmem:[#allocation19 + $0x5c] sm:$0xf] }
 0x648   : > { %v6413_v41 = vld [vmem:[#allocation19 + $0x274] sm:$0xf0]  ;;  %v5235_v43 = vld [vmem:[#allocation19 + $0x78] sm:$0xf0] }
 0x649   : > { %v6409_v0 = vld [vmem:[#allocation19 + $0x25c] sm:$0xf]  ;;  %v5238_v50 = vor.u32 %v6345_v42, %v5235_v43  ;;  %v5777_v42 = vld [vmem:[#allocation20 + $0xb0] sm:$0xf]  ;;  %v5849_v43 = vld [vmem:[#allocation20 + $0x140] sm:$0xf] }
 0x64a   : > { %3256 = vmatpush.bf16.msra.mxu0 %v5258_v49  ;;  %3269 = vmatpush.bf16.msra.mxu1 %v5514_v58  ;;  %v5619_v49 = vld [vmem:[#allocation19 + $0x378] sm:$0xf0]  ;;  %v5362_v58 = vor.u32 %v6381_v32, %v5361_v2  ;;  %v5490_v2 = vor.u32 %v6413_v41, %v5489_v40  ;;  %v5201_v32 = vld [vmem:[#allocation19 + $0x18] sm:$0xf] }
 0x64b   : > { %3282 = vmatpush.bf16.msra.mxu2 %v5262_v37  ;;  %3295 = vmatpush.bf16.msra.mxu3 %v5518_v61  ;;  %v6373_v37 = vld [vmem:[#allocation19 + $0x134] sm:$0xf0]  ;;  %v5366_v61 = vor.u32 %v6377_v54, %v5363_v56  ;;  %v5622_v62 = vor.u32 %v6441_v36, %v5619_v49  ;;  %v6337_v56 = vld [vmem:[#allocation19 + $0x1c] sm:$0xf] }
 0x64c   : > { %v6405_v54 = vld [vmem:[#allocation19 + $0x234] sm:$0xf0]  ;;  %v5203_v36 = vld [vmem:[#allocation19 + $0x38] sm:$0xf0] }
 0x64d   : > { %v6401_v49 = vld [vmem:[#allocation19 + $0x21c] sm:$0xf] }
 0x64e   : > { %3257 = vmatpush.bf16.msra.mxu0 %v5226_v10  ;;  %3270 = vmatpush.bf16.msra.mxu1 %v5482_v11  ;;  %v5330_v10 = vor.u32 %v6373_v37, %v5329_v60  ;;  %v5586_v11 = vor.u32 %v6437_v1, %v5585_v63  ;;  %v6477_v60 = vld [vmem:[#allocation20 + $0x74] sm:$0xf0]  ;;  %v5809_v37 = vld [vmem:[#allocation20 + $0xf0] sm:$0xf]  ;;  %v5206_v1 = vor.u32 %v6337_v56, %v5203_v36  ;;  %v6467_v36 = vld [vmem:[#allocation20 + $0x24] sm:$0xf0] }
 0x64f   : > { %3283 = vmatpush.bf16.msra.mxu2 %v5230_v14  ;;  %3296 = vmatpush.bf16.msra.mxu3 %v5486_v15  ;;  %v5590_v14 = vor.u32 %v6433_v5, %v5587_v7  ;;  %v5553_v15 = vld [vmem:[#allocation19 + $0x2d8] sm:$0xf]  ;;  %v5737_v5 = vld [vmem:[#allocation20 + $0x60] sm:$0xf] }
 0x650   : > { %v5554_v21 = vor.u32 %v6429_v16, %v5553_v15  ;;  %v5738_v16 = vor.u32 %v6475_v55, %v5737_v5  ;;  %v6501_v56 = vld [vmem:[#allocation20 + $0x134] sm:$0xf0]  ;;  %v6463_v5 = vld [vmem:[#allocation20 + $0x4] sm:$0xf0] }
 0x651   : > { %v6479_v55 = vld [vmem:[#allocation20 + $0x84] sm:$0xf0] }
 0x652   : > { %3258 = vmatpush.bf16.msra.mxu0 %v5194_v25  ;;  %3271 = vmatpush.bf16.msra.mxu1 %v5450_v9  ;;  %v5302_v25 = vor.u32 %v6361_v45, %v5299_v17  ;;  %v5558_v9 = vor.u32 %v6425_v18, %v5555_v19  ;;  %v6473_v45 = vld [vmem:[#allocation20 + $0x54] sm:$0xf0]  ;;  %v5865_v18 = vld [vmem:[#allocation20 + $0x160] sm:$0xf]  ;;  %v6507_v19 = vld [vmem:[#allocation20 + $0x164] sm:$0xf0] }
 0x653   : > { %3284 = vmatpush.bf16.msra.mxu2 %v5198_v28  ;;  %3297 = vmatpush.bf16.msra.mxu3 %v5454_v29  ;;  %v5267_v28 = vld [vmem:[#allocation19 + $0xb8] sm:$0xf0]  ;;  %v5866_v12 = vor.u32 %v6507_v19, %v5865_v18  ;;  %v6539_v19 = vld [vmem:[#allocation20 + $0x264] sm:$0xf0] }
 0x654   : > { %v6417_v29 = vld [vmem:[#allocation19 + $0x29c] sm:$0xf] }
 0x655   : > { %3259 = vmatmul.bf16.vlgmr.msra.gmra.mxu0 %v7806_v57  ;;  %3272 = vmatmul.bf16.vlgmr.msra.gmra.mxu1 %v7810_v6 }
 0x656   : > { %3303 = vmatpush.bf16.msrb.mxu0 %v5426_v30  ;;  %3316 = vmatpush.bf16.msrb.mxu1 %v5682_v31  ;;  %v5523_v30 = vld [vmem:[#allocation19 + $0x2b8] sm:$0xf0]  ;;  %v5266_v31 = vor.u32 %v6357_v23, %v5265_v22  ;;  %v5937_v22 = vld [vmem:[#allocation20 + $0x1f0] sm:$0xf]  ;;  %v6525_v23 = vld [vmem:[#allocation20 + $0x1f4] sm:$0xf0] }
 0x657   : > { %3329 = vmatpush.bf16.msrb.mxu2 %v5430_v35  ;;  %3342 = vmatpush.bf16.msrb.mxu3 %v5686_v38  ;;  %v6349_v35 = vld [vmem:[#allocation19 + $0x74] sm:$0xf0]  ;;  %v5270_v38 = vor.u32 %v6353_v27, %v5267_v28  ;;  %v5526_v39 = vor.u32 %v6417_v29, %v5523_v30  ;;  %v5938_v26 = vor.u32 %v6525_v23, %v5937_v22  ;;  %v5785_v29 = vld [vmem:[#allocation20 + $0xc0] sm:$0xf]  ;;  %v5857_v30 = vld [vmem:[#allocation20 + $0x150] sm:$0xf] }
 0x658   : > { %3285 = vmatmul.bf16.vlgmr.msra.gmra.mxu2 %v7806_v57  ;;  %3298 = vmatmul.bf16.vlgmr.msra.gmra.mxu3 %v7810_v6  ;;  %v5985_v23 = vld [vmem:[#allocation20 + $0x250] sm:$0xf] }
 0x65a   : > { %3304 = vmatpush.bf16.msrb.mxu0 %v5394_v44  ;;  %3317 = vmatpush.bf16.msrb.mxu1 %v5650_v46  ;;  %v5491_v44 = vld [vmem:[#allocation19 + $0x278] sm:$0xf0]  ;;  %v5234_v46 = vor.u32 %v6349_v35, %v5233_v34  ;;  %v5929_v34 = vld [vmem:[#allocation20 + $0x1e0] sm:$0xf]  ;;  %v6523_v35 = vld [vmem:[#allocation20 + $0x1e4] sm:$0xf0] }
 0x65b   : > { %3330 = vmatpush.bf16.msrb.mxu2 %v5398_v47  ;;  %3343 = vmatpush.bf16.msrb.mxu3 %v5654_v48  ;;  %v6341_v47 = vld [vmem:[#allocation19 + $0x34] sm:$0xf0]  ;;  %v5494_v53 = vor.u32 %v6409_v0, %v5491_v44  ;;  %v6503_v0 = vld [vmem:[#allocation20 + $0x144] sm:$0xf0] }
 0x65c   : > { %v5457_v48 = vld [vmem:[#allocation19 + $0x218] sm:$0xf] }
 0x65d   : > { %v5458_v63 = vor.u32 %v6405_v54, %v5457_v48  ;;  %v6485_v44 = vld [vmem:[#allocation20 + $0xb4] sm:$0xf0]  ;;  %v5841_v54 = vld [vmem:[#allocation20 + $0x130] sm:$0xf] }
 0x65e   : > { %3305 = vmatpush.bf16.msrb.mxu0 %v5362_v58  ;;  %3318 = vmatpush.bf16.msrb.mxu1 %v5618_v59  ;;  %v5459_v58 = vld [vmem:[#allocation19 + $0x238] sm:$0xf0]  ;;  %v5745_v59 = vld [vmem:[#allocation20 + $0x70] sm:$0xf] }
 0x65f   : > { %3331 = vmatpush.bf16.msrb.mxu2 %v5366_v61  ;;  %3344 = vmatpush.bf16.msrb.mxu3 %v5622_v62  ;;  %v6493_v61 = vld [vmem:[#allocation20 + $0xf4] sm:$0xf0]  ;;  %v5202_v62 = vor.u32 %v6341_v47, %v5201_v32  ;;  %v5462_v3 = vor.u32 %v6401_v49, %v5459_v58  ;;  %v5746_v4 = vor.u32 %v6477_v60, %v5745_v59  ;;  %v5769_v49 = vld [vmem:[#allocation20 + $0xa0] sm:$0xf]  ;;  %v6483_v58 = vld [vmem:[#allocation20 + $0xa4] sm:$0xf0] }
 0x660   : > { %v5810_v7 = vor.u32 %v6493_v61, %v5809_v37  ;;  %v5850_v47 = vor.u32 %v6503_v0, %v5849_v43  ;;  %v5842_v59 = vor.u32 %v6501_v56, %v5841_v54  ;;  %v5697_v37 = vld [vmem:[#allocation20 + $0x10] sm:$0xf]  ;;  %v5770_v61 = vor.u32 %v6483_v58, %v5769_v49  ;;  %v6517_v0 = vld [vmem:[#allocation20 + $0x1b4] sm:$0xf0]  ;;  %v5961_v54 = vld [vmem:[#allocation20 + $0x220] sm:$0xf] }
 0x661   : > { %v5905_v43 = vld [vmem:[#allocation20 + $0x1b0] sm:$0xf]  ;;  %v6515_v49 = vld [vmem:[#allocation20 + $0x1a4] sm:$0xf0] }
 0x662   : > { %3306 = vmatpush.bf16.msrb.mxu0 %v5330_v10  ;;  %3319 = vmatpush.bf16.msrb.mxu1 %v5586_v11  ;;  %v5873_v10 = vld [vmem:[#allocation20 + $0x170] sm:$0xf]  ;;  %v6509_v11 = vld [vmem:[#allocation20 + $0x174] sm:$0xf0]  ;;  %v6531_v58 = vld [vmem:[#allocation20 + $0x224] sm:$0xf0] }
 0x663   : > { %3332 = vmatpush.bf16.msrb.mxu2 %v5334_v8  ;;  %3345 = vmatpush.bf16.msrb.mxu3 %v5590_v14  ;;  %v6491_v8 = vld [vmem:[#allocation20 + $0xe4] sm:$0xf0]  ;;  %v5729_v14 = vld [vmem:[#allocation20 + $0x50] sm:$0xf]  ;;  %v5874_v15 = vor.u32 %v6509_v11, %v5873_v10  ;;  %v5753_v11 = vld [vmem:[#allocation20 + $0x80] sm:$0xf] }
 0x664   : > { %v5802_v17 = vor.u32 %v6491_v8, %v5801_v13  ;;  %v5730_v27 = vor.u32 %v6473_v45, %v5729_v14  ;;  %v6001_v10 = vld [vmem:[#allocation20 + $0x270] sm:$0xf]  ;;  %v6541_v13 = vld [vmem:[#allocation20 + $0x274] sm:$0xf0] }
 0x665   : > { %v6065_v8 = vld [vmem:[#allocation20 + $0x2f0] sm:$0xf]  ;;  %v6557_v14 = vld [vmem:[#allocation20 + $0x2f4] sm:$0xf0]  ;;  %v6002_v45 = vor.u32 %v6541_v13, %v6001_v10 }
 0x666   : > { %3307 = vmatpush.bf16.msrb.mxu0 %v5298_v20  ;;  %3320 = vmatpush.bf16.msrb.mxu1 %v5554_v21  ;;  %v5793_v20 = vld [vmem:[#allocation20 + $0xd0] sm:$0xf]  ;;  %v6489_v21 = vld [vmem:[#allocation20 + $0xd4] sm:$0xf0]  ;;  %v6066_v18 = vor.u32 %v6557_v14, %v6065_v8 }
 0x667   : > { %3333 = vmatpush.bf16.msrb.mxu2 %v5302_v25  ;;  %3346 = vmatpush.bf16.msrb.mxu3 %v5558_v9  ;;  %v5721_v25 = vld [vmem:[#allocation20 + $0x40] sm:$0xf]  ;;  %v6471_v9 = vld [vmem:[#allocation20 + $0x44] sm:$0xf0]  ;;  %v5794_v28 = vor.u32 %v6489_v21, %v5793_v20  ;;  %v6513_v10 = vld [vmem:[#allocation20 + $0x194] sm:$0xf0] }
 0x668   : > { %v5722_v40 = vor.u32 %v6471_v9, %v5721_v25  ;;  %v6057_v20 = vld [vmem:[#allocation20 + $0x2e0] sm:$0xf]  ;;  %v6555_v21 = vld [vmem:[#allocation20 + $0x2e4] sm:$0xf0]  ;;  %v6537_v9 = vld [vmem:[#allocation20 + $0x254] sm:$0xf0] }
 0x669   : > { %v6058_v25 = vor.u32 %v6555_v21, %v6057_v20  ;;  %v6017_v14 = vld [vmem:[#allocation20 + $0x290] sm:$0xf]  ;;  %v5881_v21 = vld [vmem:[#allocation20 + $0x180] sm:$0xf] }
 0x66a   : > { %3308 = vmatpush.bf16.msrb.mxu0 %v5266_v31  ;;  %3321 = vmatpush.bf16.msrb.mxu1 %v5522_v33  ;;  %v6505_v31 = vld [vmem:[#allocation20 + $0x154] sm:$0xf0]  ;;  %v6487_v33 = vld [vmem:[#allocation20 + $0xc4] sm:$0xf0] }
 0x66b   : > { %3334 = vmatpush.bf16.msrb.mxu2 %v5270_v38  ;;  %3347 = vmatpush.bf16.msrb.mxu3 %v5526_v39  ;;  %v5713_v38 = vld [vmem:[#allocation20 + $0x30] sm:$0xf]  ;;  %v5858_v39 = vor.u32 %v6505_v31, %v5857_v30  ;;  %v5786_v41 = vor.u32 %v6487_v33, %v5785_v29  ;;  %v5913_v30 = vld [vmem:[#allocation20 + $0x1c0] sm:$0xf]  ;;  %v6519_v31 = vld [vmem:[#allocation20 + $0x1c4] sm:$0xf0] }
 0x66c   : > { %v6535_v33 = vld [vmem:[#allocation20 + $0x244] sm:$0xf0] }
 0x66e   : > { %3309 = vmatpush.bf16.msrb.mxu0 %v5234_v46  ;;  %3322 = vmatpush.bf16.msrb.mxu1 %v5490_v2  ;;  %v5921_v46 = vld [vmem:[#allocation20 + $0x1d0] sm:$0xf]  ;;  %v6521_v2 = vld [vmem:[#allocation20 + $0x1d4] sm:$0xf0] }
 0x66f   : > { %3335 = vmatpush.bf16.msrb.mxu2 %v5238_v50  ;;  %3348 = vmatpush.bf16.msrb.mxu3 %v5494_v53  ;;  %v5922_v32 = vor.u32 %v6521_v2, %v5921_v46  ;;  %v5705_v50 = vld [vmem:[#allocation20 + $0x20] sm:$0xf]  ;;  %v5778_v53 = vor.u32 %v6485_v44, %v5777_v42  ;;  %v6533_v44 = vld [vmem:[#allocation20 + $0x234] sm:$0xf0]  ;;  %v5906_v46 = vor.u32 %v6517_v0, %v5905_v43  ;;  %v6033_v2 = vld [vmem:[#allocation20 + $0x2b0] sm:$0xf] }
 0x670   : > { %v5706_v60 = vor.u32 %v6467_v36, %v5705_v50  ;;  %v5897_v36 = vld [vmem:[#allocation20 + $0x1a0] sm:$0xf]  ;;  %v6585_v43 = vld [vmem:[#allocation20 + $0x3d4] sm:$0xf0] }
 0x672   : > { %3310 = vmatpush.bf16.msrb.mxu0 %v5202_v62  ;;  %3323 = vmatpush.bf16.msrb.mxu1 %v5458_v63  ;;  %v6465_v62 = vld [vmem:[#allocation20 + $0x14] sm:$0xf0]  ;;  %v5761_v63 = vld [vmem:[#allocation20 + $0x90] sm:$0xf] }
 0x673   : > { %3336 = vmatpush.bf16.msrb.mxu2 %v5206_v1  ;;  %3349 = vmatpush.bf16.msrb.mxu3 %v5462_v3  ;;  %v6481_v1 = vld [vmem:[#allocation20 + $0x94] sm:$0xf0]  ;;  %v5698_v3 = vor.u32 %v6465_v62, %v5697_v37  ;;  %v6547_v37 = vld [vmem:[#allocation20 + $0x2a4] sm:$0xf0] }
 0x674   : > { %v6495_v62 = vld [vmem:[#allocation20 + $0x104] sm:$0xf0] }
 0x675   : > { %3311 = vmatmul.bf16.vlgmr.msrb.gmra.mxu0 %v7806_v57  ;;  %3324 = vmatmul.bf16.vlgmr.msrb.gmra.mxu1 %v7810_v6 }
 0x676   : > { %4145 = vmatpush.bf16.msra.mxu0 %v5746_v4  ;;  %4158 = vmatpush.bf16.msra.mxu1 %v5810_v7  ;;  %v5689_v4 = vld [vmem:[#allocation20] sm:$0xf]  ;;  %v5762_v7 = vor.u32 %v6481_v1, %v5761_v63  ;;  %v6129_v1 = vld [vmem:[#allocation20 + $0x370] sm:$0xf] }
 0x677   : > { %3337 = vmatmul.bf16.vlgmr.msrb.gmra.mxu2 %v7806_v57  ;;  %3350 = vmatmul.bf16.vlgmr.msrb.gmra.mxu3 %v7810_v6  ;;  %v5930_v57 = vor.u32 %v6523_v35, %v5929_v34  ;;  %v6469_v6 = vld [vmem:[#allocation20 + $0x34] sm:$0xf0]  ;;  %v5914_v34 = vor.u32 %v6519_v31, %v5913_v30  ;;  %v6041_v35 = vld [vmem:[#allocation20 + $0x2c0] sm:$0xf] }
 0x678   : > { %4171 = vmatpush.bf16.msra.mxu2 %v5874_v15  ;;  %4184 = vmatpush.bf16.msra.mxu3 %v5938_v26  ;;  %v5714_v48 = vor.u32 %v6469_v6, %v5713_v38  ;;  %v5690_v15 = vor.u32 %v6463_v5, %v5689_v4  ;;  %v6553_v26 = vld [vmem:[#allocation20 + $0x2d4] sm:$0xf0]  ;;  %v5833_v38 = vld [vmem:[#allocation20 + $0x120] sm:$0xf]  ;;  %v6499_v6 = vld [vmem:[#allocation20 + $0x124] sm:$0xf0] }
 0x679   : > { %v6573_v5 = vld [vmem:[#allocation20 + $0x374] sm:$0xf0] }
 0x67a   : > { %4146 = vmatpush.bf16.msra.mxu0 %v5738_v16  ;;  %4159 = vmatpush.bf16.msra.mxu1 %v5802_v17  ;;  %v5754_v16 = vor.u32 %v6479_v55, %v5753_v11  ;;  %v5993_v17 = vld [vmem:[#allocation20 + $0x260] sm:$0xf]  ;;  %v5953_v11 = vld [vmem:[#allocation20 + $0x210] sm:$0xf]  ;;  %v6529_v55 = vld [vmem:[#allocation20 + $0x214] sm:$0xf0]  ;;  %v6130_v13 = vor.u32 %v6573_v5, %v6129_v1 }
 0x67b   : > { %v5994_v22 = vor.u32 %v6539_v19, %v5993_v17  ;;  %v5954_v17 = vor.u32 %v6529_v55, %v5953_v11  ;;  %v6569_v30 = vld [vmem:[#allocation20 + $0x354] sm:$0xf0] }
 0x67c   : > { %4172 = vmatpush.bf16.msra.mxu2 %v5866_v12  ;;  %4185 = vmatpush.bf16.msra.mxu3 %v5930_v57  ;;  %v6049_v12 = vld [vmem:[#allocation20 + $0x2d0] sm:$0xf]  ;;  %v6551_v57 = vld [vmem:[#allocation20 + $0x2c4] sm:$0xf0]  ;;  %v6561_v5 = vld [vmem:[#allocation20 + $0x314] sm:$0xf0] }
 0x67d   : > { %v6050_v29 = vor.u32 %v6553_v26, %v6049_v12  ;;  %v6042_v42 = vor.u32 %v6551_v57, %v6041_v35  ;;  %v6543_v12 = vld [vmem:[#allocation20 + $0x284] sm:$0xf0]  ;;  %v6193_v26 = vld [vmem:[#allocation20 + $0x3f0] sm:$0xf]  ;;  %v6185_v35 = vld [vmem:[#allocation20 + $0x3e0] sm:$0xf] }
 0x67e   : > { %4147 = vmatpush.bf16.msra.mxu0 %v5730_v27  ;;  %4160 = vmatpush.bf16.msra.mxu1 %v5794_v28  ;;  %v5986_v27 = vor.u32 %v6537_v9, %v5985_v23  ;;  %v5977_v28 = vld [vmem:[#allocation20 + $0x240] sm:$0xf]  ;;  %v6527_v23 = vld [vmem:[#allocation20 + $0x204] sm:$0xf0] }
 0x67f   : > { %v6009_v9 = vld [vmem:[#allocation20 + $0x280] sm:$0xf]  ;;  %v6587_v57 = vld [vmem:[#allocation20 + $0x3e4] sm:$0xf0] }
 0x680   : > { %4173 = vmatpush.bf16.msra.mxu2 %v5858_v39  ;;  %4186 = vmatpush.bf16.msra.mxu3 %v5922_v32  ;;  %v5834_v39 = vor.u32 %v6499_v6, %v5833_v38  ;;  %v6549_v32 = vld [vmem:[#allocation20 + $0x2b4] sm:$0xf0]  ;;  %v6186_v38 = vor.u32 %v6587_v57, %v6185_v35  ;;  %v6105_v6 = vld [vmem:[#allocation20 + $0x340] sm:$0xf] }
 0x681   : > { %v6034_v56 = vor.u32 %v6549_v32, %v6033_v2  ;;  %v6565_v2 = vld [vmem:[#allocation20 + $0x334] sm:$0xf0] }
 0x682   : > { %4148 = vmatpush.bf16.msra.mxu0 %v5722_v40  ;;  %4161 = vmatpush.bf16.msra.mxu1 %v5786_v41  ;;  %v5978_v40 = vor.u32 %v6535_v33, %v5977_v28  ;;  %v5969_v41 = vld [vmem:[#allocation20 + $0x230] sm:$0xf]  ;;  %v6010_v33 = vor.u32 %v6543_v12, %v6009_v9  ;;  %v5811_v9 = vld [vmem:[#allocation20 + $0xf8] sm:$0xf0]  ;;  %v6472_v12 = vld [vmem:[#allocation20 + $0x54] sm:$0xf] }
 0x684   : > { %4174 = vmatpush.bf16.msra.mxu2 %v5850_v47  ;;  %4187 = vmatpush.bf16.msra.mxu3 %v5914_v34  ;;  %v5825_v47 = vld [vmem:[#allocation20 + $0x110] sm:$0xf] }
 0x686   : > { %4149 = vmatpush.bf16.msra.mxu0 %v5714_v48  ;;  %4162 = vmatpush.bf16.msra.mxu1 %v5778_v53  ;;  %v6497_v48 = vld [vmem:[#allocation20 + $0x114] sm:$0xf0]  ;;  %v5970_v53 = vor.u32 %v6533_v44, %v5969_v41 }
 0x687   : > { %v5826_v50 = vor.u32 %v6497_v48, %v5825_v47  ;;  %v6169_v47 = vld [vmem:[#allocation20 + $0x3c0] sm:$0xf]  ;;  %v6583_v48 = vld [vmem:[#allocation20 + $0x3c4] sm:$0xf0] }
 0x688   : > { %4175 = vmatpush.bf16.msra.mxu2 %v5842_v59  ;;  %4188 = vmatpush.bf16.msra.mxu3 %v5906_v46  ;;  %v5898_v59 = vor.u32 %v6515_v49, %v5897_v36  ;;  %v6097_v46 = vld [vmem:[#allocation20 + $0x330] sm:$0xf]  ;;  %v6089_v36 = vld [vmem:[#allocation20 + $0x320] sm:$0xf]  ;;  %v6563_v49 = vld [vmem:[#allocation20 + $0x324] sm:$0xf0] }
 0x689   : > { %v6098_v32 = vor.u32 %v6565_v2, %v6097_v46 }
 0x68a   : > { %4150 = vmatpush.bf16.msra.mxu0 %v5706_v60  ;;  %4163 = vmatpush.bf16.msra.mxu1 %v5770_v61  ;;  %v6025_v60 = vld [vmem:[#allocation20 + $0x2a0] sm:$0xf] }
 0x68b   : > { %v5817_v61 = vld [vmem:[#allocation20 + $0x100] sm:$0xf]  ;;  %v6026_v4 = vor.u32 %v6547_v37, %v6025_v60  ;;  %v5747_v37 = vld [vmem:[#allocation20 + $0x78] sm:$0xf0] }
 0x68c   : > { %4176 = vmatpush.bf16.msra.mxu2 %v5834_v39  ;;  %4189 = vmatpush.bf16.msra.mxu3 %v5898_v59  ;;  %v5818_v63 = vor.u32 %v6495_v62, %v5817_v61  ;;  %v6567_v39 = vld [vmem:[#allocation20 + $0x344] sm:$0xf0]  ;;  %v6090_v59 = vor.u32 %v6563_v49, %v6089_v36  ;;  %v6161_v61 = vld [vmem:[#allocation20 + $0x3b0] sm:$0xf]  ;;  %v6581_v62 = vld [vmem:[#allocation20 + $0x3b4] sm:$0xf0] }
 0x68d   : > { %v6106_v41 = vor.u32 %v6567_v39, %v6105_v6  ;;  %v6162_v1 = vor.u32 %v6581_v62, %v6161_v61  ;;  %v5803_v6 = vld [vmem:[#allocation20 + $0xe8] sm:$0xf0]  ;;  %v6470_v39 = vld [vmem:[#allocation20 + $0x44] sm:$0xf]  ;;  %v5715_v49 = vld [vmem:[#allocation20 + $0x38] sm:$0xf0] }
 0x68e   : > { %4151 = vmatpush.bf16.msra.mxu0 %v5698_v3  ;;  %4164 = vmatpush.bf16.msra.mxu1 %v5762_v7  ;;  %v5962_v3 = vor.u32 %v6531_v58, %v5961_v54  ;;  %v5889_v7 = vld [vmem:[#allocation20 + $0x190] sm:$0xf]  ;;  %v6170_v54 = vor.u32 %v6583_v48, %v6169_v47  ;;  %v6476_v58 = vld [vmem:[#allocation20 + $0x74] sm:$0xf] }
 0x68f   : > { %v5890_v8 = vor.u32 %v6513_v10, %v5889_v7  ;;  %v5750_v7 = vor.u32 %v6476_v58, %v5747_v37  ;;  %v6474_v10 = vld [vmem:[#allocation20 + $0x64] sm:$0xf]  ;;  %v6508_v58 = vld [vmem:[#allocation20 + $0x174] sm:$0xf] }
 0x690   : > { %4177 = vmatpush.bf16.msra.mxu2 %v5826_v50 }
 0x691   : > { %4190 = vmatpush.bf16.msra.mxu3 %v5890_v8 }
 0x692   : > { %4152 = vmatpush.bf16.msra.mxu0 %v5690_v15  ;;  %4165 = vmatpush.bf16.msra.mxu1 %v5754_v16  ;;  %v6545_v15 = vld [vmem:[#allocation20 + $0x294] sm:$0xf0]  ;;  %v6121_v16 = vld [vmem:[#allocation20 + $0x360] sm:$0xf] }
 0x693   : > { %v6018_v19 = vor.u32 %v6545_v15, %v6017_v14  ;;  %v5739_v14 = vld [vmem:[#allocation20 + $0x68] sm:$0xf0]  ;;  %v6153_v15 = vld [vmem:[#allocation20 + $0x3a0] sm:$0xf] }
 0x694   : > { %4178 = vmatpush.bf16.msra.mxu2 %v5818_v63 }
 0x696   : > { %4197 = vmatpush.bf16.msrb.mxu0 %v6002_v45  ;;  %4210 = vmatpush.bf16.msrb.mxu1 %v6066_v18  ;;  %v6571_v45 = vld [vmem:[#allocation20 + $0x364] sm:$0xf0]  ;;  %v5945_v18 = vld [vmem:[#allocation20 + $0x200] sm:$0xf] }
 0x697   : > { %v6122_v20 = vor.u32 %v6571_v45, %v6121_v16  ;;  %v5946_v31 = vor.u32 %v6527_v23, %v5945_v18  ;;  %v6579_v16 = vld [vmem:[#allocation20 + $0x3a4] sm:$0xf0]  ;;  %v5742_v23 = vor.u32 %v6474_v10, %v5739_v14 }
 0x698   : > { %4223 = vmatpush.bf16.msrb.mxu2 %v6130_v13 }
 0x69a   : > { %4198 = vmatpush.bf16.msrb.mxu0 %v5994_v22  ;;  %4211 = vmatpush.bf16.msrb.mxu1 %v6058_v25  ;;  %v6511_v22 = vld [vmem:[#allocation20 + $0x184] sm:$0xf0] }
 0x69b   : > { %v5882_v25 = vor.u32 %v6511_v22, %v5881_v21  ;;  %v6559_v21 = vld [vmem:[#allocation20 + $0x304] sm:$0xf0] }
 0x69c   : > { %4224 = vmatpush.bf16.msrb.mxu2 %v6122_v20  ;;  %v6073_v20 = vld [vmem:[#allocation20 + $0x300] sm:$0xf] }
 0x69d   : > { %4191 = vmatpush.bf16.msra.mxu3 %v5882_v25  ;;  %v6492_v25 = vld [vmem:[#allocation20 + $0xf4] sm:$0xf] }
 0x69e   : > { %4199 = vmatpush.bf16.msrb.mxu0 %v5986_v27  ;;  %4212 = vmatpush.bf16.msrb.mxu1 %v6050_v29  ;;  %v6589_v27 = vld [vmem:[#allocation20 + $0x3f4] sm:$0xf0]  ;;  %v6113_v29 = vld [vmem:[#allocation20 + $0x350] sm:$0xf] }
 0x69f   : > { %v6194_v28 = vor.u32 %v6589_v27, %v6193_v26  ;;  %v6114_v34 = vor.u32 %v6569_v30, %v6113_v29  ;;  %v6074_v26 = vor.u32 %v6559_v21, %v6073_v20  ;;  %v5731_v27 = vld [vmem:[#allocation20 + $0x58] sm:$0xf0]  ;;  %v6577_v29 = vld [vmem:[#allocation20 + $0x394] sm:$0xf0]  ;;  %v6464_v21 = vld [vmem:[#allocation20 + $0x14] sm:$0xf] }
 0x6a0   : > { %v5734_v57 = vor.u32 %v6472_v12, %v5731_v27  ;;  %v6504_v12 = vld [vmem:[#allocation20 + $0x154] sm:$0xf] }
 0x6a1   : > { %4236 = vmatpush.bf16.msrb.mxu3 %v6194_v28  ;;  %4225 = vmatpush.bf16.msrb.mxu2 %v6114_v34  ;;  %v6145_v28 = vld [vmem:[#allocation20 + $0x390] sm:$0xf]  ;;  %v5814_v34 = vor.u32 %v6492_v25, %v5811_v9  ;;  %v5939_v25 = vld [vmem:[#allocation20 + $0x1f8] sm:$0xf0] }
 0x6a2   : > { %4200 = vmatpush.bf16.msrb.mxu0 %v5978_v40  ;;  %4213 = vmatpush.bf16.msrb.mxu1 %v6042_v42  ;;  %v7831_v40 = vld [vmem:[%s7975_s18] sm:$0xff]  ;;  %v6177_v42 = vld [vmem:[#allocation20 + $0x3d0] sm:$0xf] }
 0x6a3   : > { %v6178_v0 = vor.u32 %v6585_v43, %v6177_v42  ;;  %v2491_v44 = vperm.slane %v7831_v40, 0  ;;  %v2492_v63 = vperm.slane %v7831_v40, 1  ;;  %v5723_v43 = vld [vmem:[#allocation20 + $0x48] sm:$0xf0]  ;;  %v5699_v9 = vld [vmem:[#allocation20 + $0x18] sm:$0xf0] }
 0x6a5   : > { %4237 = vmatpush.bf16.msrb.mxu3 %v6186_v38  ;;  %4226 = vmatpush.bf16.msrb.mxu2 %v6106_v41  ;;  %v6490_v38 = vld [vmem:[#allocation20 + $0xe4] sm:$0xf] }
 0x6a6   : > { %4201 = vmatpush.bf16.msrb.mxu0 %v5970_v53  ;;  %4214 = vmatpush.bf16.msrb.mxu1 %v6034_v56  ;;  %v5806_v48 = vor.u32 %v6490_v38, %v5803_v6  ;;  %v6462_v38 = vld [vmem:[#allocation20 + $0x4] sm:$0xf] }
 0x6a9   : > { %4238 = vmatpush.bf16.msrb.mxu3 %v6178_v0  ;;  %4227 = vmatpush.bf16.msrb.mxu2 %v6098_v32  ;;  %v6137_v0 = vld [vmem:[#allocation20 + $0x380] sm:$0xf] }
 0x6aa   : > { %4202 = vmatpush.bf16.msrb.mxu0 %v5962_v3  ;;  %4215 = vmatpush.bf16.msrb.mxu1 %v6026_v4  ;;  %v6081_v4 = vld [vmem:[#allocation20 + $0x310] sm:$0xf] }
 0x6ab   : > { %v6082_v11 = vor.u32 %v6561_v5, %v6081_v4 }
 0x6ad   : > { %4239 = vmatpush.bf16.msrb.mxu3 %v6170_v54  ;;  %4228 = vmatpush.bf16.msrb.mxu2 %v6090_v59  ;;  %v5795_v54 = vld [vmem:[#allocation20 + $0xd8] sm:$0xf0] }
 0x6ae   : > { %4203 = vmatpush.bf16.msrb.mxu0 %v5954_v17  ;;  %4216 = vmatpush.bf16.msrb.mxu1 %v6018_v19  ;;  %v6154_v19 = vor.u32 %v6579_v16, %v6153_v15  ;;  %v5875_v59 = vld [vmem:[#allocation20 + $0x178] sm:$0xf0] }
 0x6af   : > { %v5878_v4 = vor.u32 %v6508_v58, %v5875_v59  ;;  %v6500_v59 = vld [vmem:[#allocation20 + $0x134] sm:$0xf] }
 0x6b1   : > { %v3156_v50 = vpop.f32.mrf.mxu0  ;;  %v3169_v53 = vpop.f32.mrf.mxu1  ;;  %4240 = vmatpush.bf16.msrb.mxu3 %v6162_v1  ;;  %4229 = vmatpush.bf16.msrb.mxu2 %v6082_v11  ;;  %v5787_v1 = vld [vmem:[#allocation20 + $0xc8] sm:$0xf0] }
 0x6b2   : > { %4204 = vmatpush.bf16.msrb.mxu0 %v5946_v31  ;;  %4217 = vmatpush.bf16.msrb.mxu1 %v6010_v33  ;;  %v3157_v56 = vadd.f32 %v3156_v50, %v2491_v44  ;;  %v6146_v31 = vor.u32 %v6577_v29, %v6145_v28  ;;  %v2493_v33 = vperm.slane %v7831_v40, 2  ;;  %v6575_v44 = vld [vmem:[#allocation20 + $0x384] sm:$0xf0]  ;;  %v5726_v50 = vor.u32 %v6470_v39, %v5723_v43  ;;  %v5707_v11 = vld [vmem:[#allocation20 + $0x28] sm:$0xf0] }
 0x6b3   : > { %v6138_v32 = vor.u32 %v6575_v44, %v6137_v0  ;;  %v2495_v28 = vperm.slane %v7831_v40, 4  ;;  %v6522_v39 = vld [vmem:[#allocation20 + $0x1e4] sm:$0xf]  ;;  %v5691_v0 = vld [vmem:[#allocation20 + $0x8] sm:$0xf0] }
 0x6b4   : > { %v3170_v60 = vadd.f32 %v3169_v53, %v3157_v56  ;;  %v6488_v53 = vld [vmem:[#allocation20 + $0xd4] sm:$0xf]  ;;  %v6502_v44 = vld [vmem:[#allocation20 + $0x144] sm:$0xf] }
 0x6b5   : > { %4241 = vmatpush.bf16.msrb.mxu3 %v6154_v19  ;;  %4230 = vmatpush.bf16.msrb.mxu2 %v6074_v26  ;;  %v6468_v56 = vld [vmem:[#allocation20 + $0x34] sm:$0xf]  ;;  %v5798_v61 = vor.u32 %v6488_v53, %v5795_v54  ;;  %v5859_v26 = vld [vmem:[#allocation20 + $0x158] sm:$0xf0]  ;;  %v5694_v53 = vor.u32 %v6462_v38, %v5691_v0  ;;  %v5899_v0 = vld [vmem:[#allocation20 + $0x1a8] sm:$0xf0] }
 0x6b6   : > { %v3355_v3 = vmax.f32 %v3170_v60, 0.0  ;;  %v2494_v60 = vperm.slane %v7831_v40, 3  ;;  %v5718_v62 = vor.u32 %v6468_v56, %v5715_v49  ;;  %v5862_v6 = vor.u32 %v6504_v12, %v5859_v26  ;;  %v5763_v54 = vld [vmem:[#allocation20 + $0x98] sm:$0xf0]  ;;  %v6516_v26 = vld [vmem:[#allocation20 + $0x1b4] sm:$0xf] }
 0x6b7   : > { %v5923_v49 = vld [vmem:[#allocation20 + $0x1d8] sm:$0xf0]  ;;  %v6536_v38 = vld [vmem:[#allocation20 + $0x254] sm:$0xf] }
 0x6b8   : > { %v7835_v55 = vpack.c.bf16 %v3355_v3, %v3355_v3  ;;  %v3182_v13 = vpop.f32.mrf.mxu2  ;;  %v3195_v8 = vpop.f32.mrf.mxu3  ;;  %v6466_v3 = vld [vmem:[#allocation20 + $0x24] sm:$0xf] }
 0x6b9   : > { %v3183_v45 = vadd.f32 %v3182_v13, %v2492_v63  ;;  %v3158_v17 = vpop.f32.mrf.mxu0  ;;  %v3171_v18 = vpop.f32.mrf.mxu1  ;;  %4242 = vmatpush.bf16.msrb.mxu3 %v6146_v31  ;;  %v6486_v63 = vld [vmem:[#allocation20 + $0xc4] sm:$0xf]  ;;  %v5710_v20 = vor.u32 %v6466_v3, %v5707_v11  ;;  %v5771_v31 = vld [vmem:[#allocation20 + $0xa8] sm:$0xf0] }
 0x6ba   : > { %4153 = vmatmul.bf16.vlgmr.msra.gmra.mxu0 %v7835_v55  ;;  %v6506_v13 = vld [vmem:[#allocation20 + $0x164] sm:$0xf]  ;;  %v6484_v17 = vld [vmem:[#allocation20 + $0xb4] sm:$0xf]  ;;  %v5779_v18 = vld [vmem:[#allocation20 + $0xb8] sm:$0xf0] }
 0x6bb   : > { %v3196_v22 = vadd.f32 %v3195_v8, %v3183_v45  ;;  %4249 = vmatpush.bf16.msra.mxu0 %v5750_v7  ;;  %v5867_v8 = vld [vmem:[#allocation20 + $0x168] sm:$0xf0]  ;;  %v5790_v45 = vor.u32 %v6486_v63, %v5787_v1  ;;  %v5782_v29 = vor.u32 %v6484_v17, %v5779_v18  ;;  %v6003_v63 = vld [vmem:[#allocation20 + $0x278] sm:$0xf0]  ;;  %v6478_v3 = vld [vmem:[#allocation20 + $0x84] sm:$0xf] }
 0x6bc   : > { %v6518_v11 = vld [vmem:[#allocation20 + $0x1c4] sm:$0xf] }
 0x6bd   : > { %v3356_v30 = vmax.f32 %v3196_v22, 0.0  ;;  %4243 = vmatpush.bf16.msrb.mxu3 %v6138_v32  ;;  %v5870_v22 = vor.u32 %v6506_v13, %v5867_v8  ;;  %v6480_v32 = vld [vmem:[#allocation20 + $0x94] sm:$0xf]  ;;  %v5915_v13 = vld [vmem:[#allocation20 + $0x1c8] sm:$0xf0] }
 0x6be   : > { %v5766_v1 = vor.u32 %v6480_v32, %v5763_v54 }
 0x6bf   : > { %v7839_v35 = vpack.c.bf16 %v3356_v30, %v3356_v30  ;;  %4250 = vmatpush.bf16.msra.mxu0 %v5742_v23  ;;  %v6524_v23 = vld [vmem:[#allocation20 + $0x1f4] sm:$0xf]  ;;  %v6482_v30 = vld [vmem:[#allocation20 + $0xa4] sm:$0xf] }
 0x6c0   : > { %v3184_v41 = vpop.f32.mrf.mxu2  ;;  %v3197_v42 = vpop.f32.mrf.mxu3 }
 0x6c1   : > { %4166 = vmatmul.bf16.vlgmr.msra.gmra.mxu1 %v7839_v35  ;;  %v3208_v46 = vpop.f32.mrf.mxu0  ;;  %v3221_v2 = vpop.f32.mrf.mxu1  ;;  %v5931_v41 = vld [vmem:[#allocation20 + $0x1e8] sm:$0xf0] }
 0x6c2   : > { %v3209_v47 = vadd.f32 %v3208_v46, %v2493_v33  ;;  %4262 = vmatpush.bf16.msra.mxu1 %v5814_v34  ;;  %v5942_v33 = vor.u32 %v6524_v23, %v5939_v25  ;;  %v5851_v46 = vld [vmem:[#allocation20 + $0x148] sm:$0xf0] }
 0x6c3   : > { %4251 = vmatpush.bf16.msra.mxu0 %v5734_v57  ;;  %v5702_v57 = vor.u32 %v6464_v21, %v5699_v9  ;;  %v5854_v56 = vor.u32 %v6502_v44, %v5851_v46  ;;  %v6494_v46 = vld [vmem:[#allocation20 + $0x104] sm:$0xf] }
 0x6c4   : > { %v3222_v36 = vadd.f32 %v3221_v2, %v3209_v47  ;;  %v5774_v2 = vor.u32 %v6482_v30, %v5771_v31  ;;  %v5934_v47 = vor.u32 %v6522_v39, %v5931_v41 }
 0x6c6   : > { %v3357_v37 = vmax.f32 %v3222_v36, 0.0  ;;  %4263 = vmatpush.bf16.msra.mxu1 %v5806_v48  ;;  %v6520_v36 = vld [vmem:[#allocation20 + $0x1d4] sm:$0xf] }
 0x6c7   : > { %4252 = vmatpush.bf16.msra.mxu0 %v5726_v50 }
 0x6c8   : > { %v7843_v5 = vpack.c.bf16 %v3357_v37, %v3357_v37  ;;  %v3234_v7 = vpop.f32.mrf.mxu2  ;;  %v3247_v10 = vpop.f32.mrf.mxu3  ;;  %v2496_v37 = vperm.slane %v7831_v40, 5 }
 0x6c9   : > { %v3235_v14 = vadd.f32 %v3234_v7, %v2494_v60  ;;  %v3210_v15 = vpop.f32.mrf.mxu0  ;;  %v3223_v16 = vpop.f32.mrf.mxu1  ;;  %v5843_v60 = vld [vmem:[#allocation20 + $0x138] sm:$0xf0]  ;;  %v5755_v7 = vld [vmem:[#allocation20 + $0x88] sm:$0xf0] }
 0x6ca   : > { %4179 = vmatmul.bf16.vlgmr.msra.gmra.mxu2 %v7843_v5  ;;  %4264 = vmatpush.bf16.msra.mxu1 %v5798_v61  ;;  %v5835_v15 = vld [vmem:[#allocation20 + $0x128] sm:$0xf0]  ;;  %v5758_v21 = vor.u32 %v6478_v3, %v5755_v7  ;;  %v5971_v3 = vld [vmem:[#allocation20 + $0x238] sm:$0xf0]  ;;  %v6510_v7 = vld [vmem:[#allocation20 + $0x184] sm:$0xf] }
 0x6cb   : > { %v3248_v19 = vadd.f32 %v3247_v10, %v3235_v14  ;;  %4253 = vmatpush.bf16.msra.mxu0 %v5718_v62  ;;  %4275 = vmatpush.bf16.msra.mxu2 %v5878_v4  ;;  %v6540_v62 = vld [vmem:[#allocation20 + $0x274] sm:$0xf]  ;;  %v5926_v4 = vor.u32 %v6520_v36, %v5923_v49  ;;  %v5846_v10 = vor.u32 %v6500_v59, %v5843_v60  ;;  %v6498_v14 = vld [vmem:[#allocation20 + $0x124] sm:$0xf]  ;;  %v5979_v36 = vld [vmem:[#allocation20 + $0x248] sm:$0xf0] }
 0x6cc   : > { %v6006_v16 = vor.u32 %v6540_v62, %v6003_v63  ;;  %v5838_v12 = vor.u32 %v6498_v14, %v5835_v15  ;;  %v6512_v59 = vld [vmem:[#allocation20 + $0x194] sm:$0xf]  ;;  %v5891_v60 = vld [vmem:[#allocation20 + $0x198] sm:$0xf0]  ;;  %v6043_v14 = vld [vmem:[#allocation20 + $0x2c8] sm:$0xf0] }
 0x6cd   : > { %v3358_v27 = vmax.f32 %v3248_v19, 0.0  ;;  %v6538_v19 = vld [vmem:[#allocation20 + $0x264] sm:$0xf]  ;;  %v6552_v62 = vld [vmem:[#allocation20 + $0x2d4] sm:$0xf] }
 0x6ce   : > { %4265 = vmatpush.bf16.msra.mxu1 %v5790_v45  ;;  %v6051_v63 = vld [vmem:[#allocation20 + $0x2d8] sm:$0xf0]  ;;  %v6530_v15 = vld [vmem:[#allocation20 + $0x224] sm:$0xf] }
 0x6cf   : > { %v7847_v34 = vpack.c.bf16 %v3358_v27, %v3358_v27  ;;  %4254 = vmatpush.bf16.msra.mxu0 %v5710_v20  ;;  %4276 = vmatpush.bf16.msra.mxu2 %v5870_v22  ;;  %v5995_v20 = vld [vmem:[#allocation20 + $0x268] sm:$0xf0]  ;;  %v5918_v22 = vor.u32 %v6518_v11, %v5915_v13  ;;  %v5907_v27 = vld [vmem:[#allocation20 + $0x1b8] sm:$0xf0]  ;;  %v6054_v11 = vor.u32 %v6552_v62, %v6051_v63 }
 0x6d0   : > { %v3236_v42 = vpop.f32.mrf.mxu2  ;;  %v3249_v43 = vpop.f32.mrf.mxu3  ;;  %v5998_v31 = vor.u32 %v6538_v19, %v5995_v20  ;;  %v5910_v39 = vor.u32 %v6516_v26, %v5907_v27  ;;  %v2497_v19 = vperm.slane %v7831_v40, 6 }
 0x6d1   : > { %4192 = vmatmul.bf16.vlgmr.msra.gmra.mxu3 %v7847_v34  ;;  %v6514_v43 = vld [vmem:[#allocation20 + $0x1a4] sm:$0xf] }
 0x6d2   : > { %4266 = vmatpush.bf16.msra.mxu1 %v5782_v29  ;;  %4288 = vmatpush.bf16.msra.mxu3 %v5942_v33  ;;  %v3260_v48 = vpop.f32.mrf.mxu0  ;;  %v3273_v50 = vpop.f32.mrf.mxu1  ;;  %v5827_v29 = vld [vmem:[#allocation20 + $0x118] sm:$0xf0]  ;;  %v6556_v33 = vld [vmem:[#allocation20 + $0x2f4] sm:$0xf]  ;;  %v5902_v49 = vor.u32 %v6514_v43, %v5899_v0 }
 0x6d3   : > { %4255 = vmatpush.bf16.msra.mxu0 %v5702_v57  ;;  %4277 = vmatpush.bf16.msra.mxu2 %v5862_v6  ;;  %v3261_v58 = vadd.f32 %v3260_v48, %v2495_v28  ;;  %v6496_v28 = vld [vmem:[#allocation20 + $0x114] sm:$0xf]  ;;  %v6067_v57 = vld [vmem:[#allocation20 + $0x2f8] sm:$0xf0]  ;;  %v6554_v48 = vld [vmem:[#allocation20 + $0x2e4] sm:$0xf] }
 0x6d4   : > { %v5987_v6 = vld [vmem:[#allocation20 + $0x258] sm:$0xf0]  ;;  %v5830_v42 = vor.u32 %v6496_v28, %v5827_v29  ;;  %v6070_v44 = vor.u32 %v6556_v33, %v6067_v57  ;;  %v6546_v29 = vld [vmem:[#allocation20 + $0x2a4] sm:$0xf]  ;;  %v6572_v57 = vld [vmem:[#allocation20 + $0x374] sm:$0xf] }
 0x6d5   : > { %v3274_v61 = vadd.f32 %v3273_v50, %v3261_v58  ;;  %v6059_v50 = vld [vmem:[#allocation20 + $0x2e8] sm:$0xf0]  ;;  %v6544_v43 = vld [vmem:[#allocation20 + $0x294] sm:$0xf]  ;;  %v6019_v0 = vld [vmem:[#allocation20 + $0x298] sm:$0xf0] }
 0x6d6   : > { %4267 = vmatpush.bf16.msra.mxu1 %v5774_v2  ;;  %4289 = vmatpush.bf16.msra.mxu3 %v5934_v47  ;;  %v5819_v2 = vld [vmem:[#allocation20 + $0x108] sm:$0xf0]  ;;  %v5990_v47 = vor.u32 %v6536_v38, %v5987_v6  ;;  %v6131_v38 = vld [vmem:[#allocation20 + $0x378] sm:$0xf0]  ;;  %v2498_v6 = vperm.slane %v7831_v40, 7 }
 0x6d7   : > { %4256 = vmatpush.bf16.msra.mxu0 %v5694_v53  ;;  %4278 = vmatpush.bf16.msra.mxu2 %v5854_v56  ;;  %v3359_v8 = vmax.f32 %v3274_v61, 0.0  ;;  %v6534_v56 = vld [vmem:[#allocation20 + $0x244] sm:$0xf]  ;;  %v5822_v58 = vor.u32 %v6494_v46, %v5819_v2 }
 0x6d8   : > { %v5982_v61 = vor.u32 %v6534_v56, %v5979_v36  ;;  %v6022_v56 = vor.u32 %v6544_v43, %v6019_v0  ;;  %v6542_v40 = vld [vmem:[#allocation20 + $0x284] sm:$0xf]  ;;  %v6011_v36 = vld [vmem:[#allocation20 + $0x288] sm:$0xf0] }
 0x6d9   : > { %v7851_v45 = vpack.c.bf16 %v3359_v8, %v3359_v8  ;;  %v6550_v8 = vld [vmem:[#allocation20 + $0x2c4] sm:$0xf]  ;;  %v6014_v63 = vor.u32 %v6542_v40, %v6011_v36  ;;  %v6139_v0 = vld [vmem:[#allocation20 + $0x388] sm:$0xf0] }
 0x6da   : > { %4268 = vmatpush.bf16.msra.mxu1 %v5766_v1  ;;  %4290 = vmatpush.bf16.msra.mxu3 %v5926_v4  ;;  %v3262_v25 = vpop.f32.mrf.mxu0  ;;  %v3275_v9 = vpop.f32.mrf.mxu1  ;;  %v6532_v1 = vld [vmem:[#allocation20 + $0x234] sm:$0xf]  ;;  %v5894_v4 = vor.u32 %v6512_v59, %v5891_v60  ;;  %v6195_v60 = vld [vmem:[#allocation20 + $0x3f8] sm:$0xf0]  ;;  %v6574_v43 = vld [vmem:[#allocation20 + $0x384] sm:$0xf] }
 0x6db   : > { %v3286_v17 = vpop.f32.mrf.mxu2  ;;  %v3299_v18 = vpop.f32.mrf.mxu3  ;;  %4279 = vmatpush.bf16.msra.mxu2 %v5846_v10  ;;  %4205 = vmatmul.bf16.vlgmr.msrb.gmra.mxu0 %v7851_v45  ;;  %v5883_v10 = vld [vmem:[#allocation20 + $0x188] sm:$0xf0]  ;;  %v5974_v13 = vor.u32 %v6532_v1, %v5971_v3  ;;  %v5955_v25 = vld [vmem:[#allocation20 + $0x218] sm:$0xf0]  ;;  %v6588_v59 = vld [vmem:[#allocation20 + $0x3f4] sm:$0xf] }
 0x6dc   : > { %v3287_v23 = vadd.f32 %v3286_v17, %v2496_v37  ;;  %4301 = vmatpush.bf16.msrb.mxu0 %v6006_v16  ;;  %v6062_v37 = vor.u32 %v6554_v48, %v6059_v50  ;;  %v5963_v16 = vld [vmem:[#allocation20 + $0x228] sm:$0xf0]  ;;  %v5886_v17 = vor.u32 %v6510_v7, %v5883_v10  ;;  %v6570_v48 = vld [vmem:[#allocation20 + $0x364] sm:$0xf]  ;;  %v6198_v1 = vor.u32 %v6588_v59, %v6195_v60 }
 0x6dd   : > { %v5966_v20 = vor.u32 %v6530_v15, %v5963_v16  ;;  %v6123_v50 = vld [vmem:[#allocation20 + $0x368] sm:$0xf0]  ;;  %v6586_v7 = vld [vmem:[#allocation20 + $0x3e4] sm:$0xf] }
 0x6de   : > { %v3300_v30 = vadd.f32 %v3299_v18, %v3287_v23  ;;  %4269 = vmatpush.bf16.msra.mxu1 %v5758_v21  ;;  %4291 = vmatpush.bf16.msra.mxu3 %v5918_v22  ;;  %v6046_v18 = vor.u32 %v6550_v8, %v6043_v14  ;;  %v6548_v21 = vld [vmem:[#allocation20 + $0x2b4] sm:$0xf]  ;;  %v6035_v22 = vld [vmem:[#allocation20 + $0x2b8] sm:$0xf0]  ;;  %v6187_v10 = vld [vmem:[#allocation20 + $0x3e8] sm:$0xf0] }
 0x6df   : > { %4280 = vmatpush.bf16.msra.mxu2 %v5838_v12  ;;  %v6528_v23 = vld [vmem:[#allocation20 + $0x214] sm:$0xf]  ;;  %v6038_v26 = vor.u32 %v6548_v21, %v6035_v22  ;;  %v6566_v8 = vld [vmem:[#allocation20 + $0x344] sm:$0xf]  ;;  %v6107_v14 = vld [vmem:[#allocation20 + $0x348] sm:$0xf0]  ;;  %v6190_v15 = vor.u32 %v6586_v7, %v6187_v10 }
 0x6e0   : > { %v3360_v41 = vmax.f32 %v3300_v30, 0.0  ;;  %4302 = vmatpush.bf16.msrb.mxu0 %v5998_v31  ;;  %v5958_v28 = vor.u32 %v6528_v23, %v5955_v25  ;;  %v6027_v30 = vld [vmem:[#allocation20 + $0x2a8] sm:$0xf0]  ;;  %v6110_v16 = vor.u32 %v6566_v8, %v6107_v14  ;;  %v6582_v22 = vld [vmem:[#allocation20 + $0x3c4] sm:$0xf] }
 0x6e1   : > { %v5947_v31 = vld [vmem:[#allocation20 + $0x208] sm:$0xf0]  ;;  %v6562_v25 = vld [vmem:[#allocation20 + $0x324] sm:$0xf] }
 0x6e2   : > { %v7854_v32 = vpack.c.bf16 %v3360_v41, %v3360_v41  ;;  %4292 = vmatpush.bf16.msra.mxu3 %v5910_v39  ;;  %v6030_v39 = vor.u32 %v6546_v29, %v6027_v30  ;;  %v6171_v23 = vld [vmem:[#allocation20 + $0x3c8] sm:$0xf0]  ;;  %v6560_v29 = vld [vmem:[#allocation20 + $0x314] sm:$0xf] }
 0x6e3   : > { %v3288_v53 = vpop.f32.mrf.mxu2  ;;  %v3301_v54 = vpop.f32.mrf.mxu3  ;;  %4281 = vmatpush.bf16.msra.mxu2 %v5830_v42 }
 0x6e4   : > { %4218 = vmatmul.bf16.vlgmr.msrb.gmra.mxu1 %v7854_v32  ;;  %4303 = vmatpush.bf16.msrb.mxu0 %v5990_v47 }
 0x6e5   : > { %4314 = vmatpush.bf16.msrb.mxu1 %v6070_v44  ;;  %v6134_v44 = vor.u32 %v6572_v57, %v6131_v38  ;;  %v6558_v57 = vld [vmem:[#allocation20 + $0x304] sm:$0xf]  ;;  %v6075_v38 = vld [vmem:[#allocation20 + $0x308] sm:$0xf0] }
 0x6e6   : > { %4293 = vmatpush.bf16.msra.mxu3 %v5902_v49 }
 0x6e7   : > { %4282 = vmatpush.bf16.msra.mxu2 %v5822_v58  ;;  %v6126_v58 = vor.u32 %v6570_v48, %v6123_v50 }
 0x6e8   : > { %4304 = vmatpush.bf16.msrb.mxu0 %v5982_v61  ;;  %v6115_v61 = vld [vmem:[#allocation20 + $0x358] sm:$0xf0] }
 0x6e9   : > { %4315 = vmatpush.bf16.msrb.mxu1 %v6062_v37  ;;  %v6568_v37 = vld [vmem:[#allocation20 + $0x354] sm:$0xf] }
 0x6ea   : > { %4294 = vmatpush.bf16.msra.mxu3 %v5894_v4  ;;  %v6118_v4 = vor.u32 %v6568_v37, %v6115_v61 }
 0x6eb   : > { %4257 = vmatmul.bf16.vlgmr.msra.gmra.mxu0 %v7835_v55  ;;  %v6526_v55 = vld [vmem:[#allocation20 + $0x204] sm:$0xf] }
 0x6ec   : > { %4305 = vmatpush.bf16.msrb.mxu0 %v5974_v13  ;;  %v5950_v42 = vor.u32 %v6526_v55, %v5947_v31  ;;  %v6578_v31 = vld [vmem:[#allocation20 + $0x3a4] sm:$0xf] }
 0x6ed   : > { %4316 = vmatpush.bf16.msrb.mxu1 %v6054_v11 }
 0x6ee   : > { %4295 = vmatpush.bf16.msra.mxu3 %v5886_v17  ;;  %v6584_v17 = vld [vmem:[#allocation20 + $0x3d4] sm:$0xf] }
 0x6f0   : > { %4306 = vmatpush.bf16.msrb.mxu0 %v5966_v20 }
 0x6f1   : > { %4317 = vmatpush.bf16.msrb.mxu1 %v6046_v18  ;;  %v6179_v18 = vld [vmem:[#allocation20 + $0x3d8] sm:$0xf0] }
 0x6f2   : > { %v3312_v9 = vpop.f32.mrf.mxu0  ;;  %v3325_v12 = vpop.f32.mrf.mxu1  ;;  %v6182_v20 = vor.u32 %v6584_v17, %v6179_v18 }
 0x6f3   : > { %v3313_v27 = vadd.f32 %v3312_v9, %v2497_v19  ;;  %v6099_v19 = vld [vmem:[#allocation20 + $0x338] sm:$0xf0]  ;;  %v6091_v9 = vld [vmem:[#allocation20 + $0x328] sm:$0xf0] }
 0x6f4   : > { %4270 = vmatmul.bf16.vlgmr.msra.gmra.mxu1 %v7839_v35  ;;  %4307 = vmatpush.bf16.msrb.mxu0 %v5958_v28  ;;  %v6163_v28 = vld [vmem:[#allocation20 + $0x3b8] sm:$0xf0] }
 0x6f5   : > { %v3326_v33 = vadd.f32 %v3325_v12, %v3313_v27  ;;  %4318 = vmatpush.bf16.msrb.mxu1 %v6038_v26  ;;  %v6174_v12 = vor.u32 %v6582_v22, %v6171_v23  ;;  %v6094_v26 = vor.u32 %v6562_v25, %v6091_v9  ;;  %v6580_v27 = vld [vmem:[#allocation20 + $0x3b4] sm:$0xf] }
 0x6f6   : > { %v6166_v30 = vor.u32 %v6580_v27, %v6163_v28 }
 0x6f7   : > { %v3361_v41 = vmax.f32 %v3326_v33, 0.0  ;;  %v6155_v33 = vld [vmem:[#allocation20 + $0x3a8] sm:$0xf0] }
 0x6f8   : > { %4308 = vmatpush.bf16.msrb.mxu0 %v5950_v42 }
 0x6f9   : > { %v7861_v46 = vpack.c.bf16 %v3361_v41, %v3361_v41  ;;  %4319 = vmatpush.bf16.msrb.mxu1 %v6030_v39  ;;  %v6576_v39 = vld [vmem:[#allocation20 + $0x394] sm:$0xf]  ;;  %v6147_v41 = vld [vmem:[#allocation20 + $0x398] sm:$0xf0] }
 0x6fa   : > { %v3338_v2 = vpop.f32.mrf.mxu2  ;;  %v3351_v47 = vpop.f32.mrf.mxu3  ;;  %v6150_v42 = vor.u32 %v6576_v39, %v6147_v41 }
 0x6fb   : > { %v3339_v53 = vadd.f32 %v3338_v2, %v2498_v6  ;;  %v3314_v35 = vpop.f32.mrf.mxu0  ;;  %v3327_v54 = vpop.f32.mrf.mxu1  ;;  %4231 = vmatmul.bf16.vlgmr.msrb.gmra.mxu2 %v7861_v46  ;;  %4309 = vmatmul.bf16.vlgmr.msrb.gmra.mxu0 %v7851_v45  ;;  %v6564_v45 = vld [vmem:[#allocation20 + $0x334] sm:$0xf]  ;;  %v6158_v6 = vor.u32 %v6578_v31, %v6155_v33 }
 0x6fc   : > { %4327 = vmatpush.bf16.msrb.mxu2 %v6134_v44  ;;  %v6102_v21 = vor.u32 %v6564_v45, %v6099_v19  ;;  %v6142_v44 = vor.u32 %v6574_v43, %v6139_v0 }
 0x6fd   : > { %v3352_v49 = vadd.f32 %v3351_v47, %v3339_v53  ;;  %4320 = vmatpush.bf16.msrb.mxu1 %v6022_v56 }
 0x6ff   : > { %v3362_v62 = vmax.f32 %v3352_v49, 0.0 }
 0x700   : > { %4328 = vmatpush.bf16.msrb.mxu2 %v6126_v58 }
 0x701   : > { %v3370_v3 = vpack.c.bf16 %v3362_v62, %v3362_v62  ;;  %4321 = vmatpush.bf16.msrb.mxu1 %v6014_v63 }
 0x702   : > { %v3340_v11 = vpop.f32.mrf.mxu2  ;;  %v3353_v13 = vpop.f32.mrf.mxu3 }
 0x703   : > { %4244 = vmatmul.bf16.vlgmr.msrb.gmra.mxu3 %v3370_v3 }
 0x704   : > { %4340 = vmatpush.bf16.msrb.mxu3 %v6198_v1  ;;  %4329 = vmatpush.bf16.msrb.mxu2 %v6118_v4 }
 0x705   : > { %4322 = vmatmul.bf16.vlgmr.msrb.gmra.mxu1 %v7854_v32  ;;  %v6083_v32 = vld [vmem:[#allocation20 + $0x318] sm:$0xf0] }
 0x706   : > { %v6086_v55 = vor.u32 %v6560_v29, %v6083_v32 }
 0x708   : > { %4341 = vmatpush.bf16.msrb.mxu3 %v6190_v15  ;;  %4330 = vmatpush.bf16.msrb.mxu2 %v6110_v16 }
 0x70b   : > { %4283 = vmatmul.bf16.vlgmr.msra.gmra.mxu2 %v7843_v5  ;;  %v6078_v5 = vor.u32 %v6558_v57, %v6075_v38 }
 0x70c   : > { %4342 = vmatpush.bf16.msrb.mxu3 %v6182_v20  ;;  %4331 = vmatpush.bf16.msrb.mxu2 %v6102_v21 }
 0x710   : > { %4343 = vmatpush.bf16.msrb.mxu3 %v6174_v12  ;;  %4332 = vmatpush.bf16.msrb.mxu2 %v6094_v26 }
 0x713   : > { %4296 = vmatmul.bf16.vlgmr.msra.gmra.mxu3 %v7847_v34  ;;  %v3499_v34 = vld [vmem:[%s7976_s4] sm:$0x3] }
 0x714   : > { %4344 = vmatpush.bf16.msrb.mxu3 %v6166_v30  ;;  %4333 = vmatpush.bf16.msrb.mxu2 %v6086_v55  ;;  %v3501_v47 = vperm.slane %v3499_v34, 0  ;;  %v3502_v18 = vperm.slane %v3499_v34, 1 }
 0x718   : > { %4345 = vmatpush.bf16.msrb.mxu3 %v6158_v6  ;;  %4334 = vmatpush.bf16.msrb.mxu2 %v6078_v5 }
 0x71b   : > { %4335 = vmatmul.bf16.vlgmr.msrb.gmra.mxu2 %v7861_v46 }
 0x71c   : > { %4346 = vmatpush.bf16.msrb.mxu3 %v6150_v42 }
 0x720   : > { %4347 = vmatpush.bf16.msrb.mxu3 %v6142_v44 }
 0x723   : > { %4348 = vmatmul.bf16.vlgmr.msrb.gmra.mxu3 %v3370_v3 }
 0x737   : > { %v4154_v2 = vpop.f32.mrf.mxu0 }
 0x738   : > { %v4155_v48 = vadd.f32 %v4154_v2, %v3501_v47 }
 0x73e   : > { %v4167_v50 = vpop.f32.mrf.mxu1 }
 0x73f   : > { %v4168_v53 = vadd.f32 %v4167_v50, %v4155_v48  ;;  %v4156_v35 = vpop.f32.mrf.mxu0  ;;  %v4355_v50 = vld [vmem:[#allocation22] sm:$0x3] }
 0x746   : > { %v4169_v54 = vpop.f32.mrf.mxu1 }
 0x747   : > { %v4381_v54 = vperm.slane %v4355_v50, 0 }
 0x74d   : > { %v4180_v56 = vpop.f32.mrf.mxu2 }
 0x74e   : > { %v4181_v40 = vadd.f32 %v4180_v56, %v4168_v53  ;;  %v4382_v56 = vperm.slane %v4355_v50, 1 }
 0x754   : > { %v4193_v36 = vpop.f32.mrf.mxu3 }
 0x755   : > { %v4194_v49 = vadd.f32 %v4193_v36, %v4181_v40  ;;  %v4182_v58 = vpop.f32.mrf.mxu2  ;;  %v4356_v36 = vld [vmem:[%s7977_s22] sm:$0x3] }
 0x758   : > { %v4206_v46 = vpop.f32.mrf.mxu0 }
 0x759   : > { %v4207_v59 = vadd.f32 %v4206_v46, %v4194_v49  ;;  %v4390_v46 = vperm.slane %v4356_v36, 0 }
 0x75c   : > { %v4195_v60 = vpop.f32.mrf.mxu3 }
 0x760   : > { %v4208_v61 = vpop.f32.mrf.mxu0 }
 0x761   : > { %v4219_v37 = vpop.f32.mrf.mxu1 }
 0x762   : > { %v4220_v26 = vadd.f32 %v4219_v37, %v4207_v59  ;;  %v4391_v59 = vperm.slane %v4356_v36, 1 }
 0x768   : > { %v4258_v63 = vpop.f32.mrf.mxu0 }
 0x769   : > { %v4221_v62 = vpop.f32.mrf.mxu1  ;;  %v4259_v45 = vadd.f32 %v4258_v63, %v3502_v18 }
 0x770   : > { %v4260_v3 = vpop.f32.mrf.mxu0 }
 0x771   : > { %v4271_v1 = vpop.f32.mrf.mxu1 }
 0x772   : > { %v4272_v20 = vadd.f32 %v4271_v1, %v4259_v45 }
 0x778   : > { %v4310_v7 = vpop.f32.mrf.mxu0 }
 0x779   : > { %v4273_v4 = vpop.f32.mrf.mxu1 }
 0x77e   : > { %v4232_v10 = vpop.f32.mrf.mxu2 }
 0x77f   : > { %v4233_v27 = vadd.f32 %v4232_v10, %v4220_v26 }
 0x780   : > { %v4312_v13 = vpop.f32.mrf.mxu0 }
 0x782   : > { %v4323_v11 = vpop.f32.mrf.mxu1 }
 0x786   : > { %v4245_v8 = vpop.f32.mrf.mxu3  ;;  %v4234_v14 = vpop.f32.mrf.mxu2 }
 0x787   : > { %v4246_v29 = vadd.f32 %v4245_v8, %v4233_v27 }
 0x789   : > { %v4353_v33 = vadd.f32 %v4246_v29, %v7800_v51 }
 0x78a   : > { %v4325_v15 = vpop.f32.mrf.mxu1 }
 0x78e   : > { %v4247_v16 = vpop.f32.mrf.mxu3  ;;  %v4284_v17 = vpop.f32.mrf.mxu2 }
 0x78f   : > { %v4285_v22 = vadd.f32 %v4284_v17, %v4272_v20 }
 0x796   : > { %v4297_v19 = vpop.f32.mrf.mxu3  ;;  %v4286_v21 = vpop.f32.mrf.mxu2 }
 0x797   : > { %v4298_v23 = vadd.f32 %v4297_v19, %v4285_v22 }
 0x799   : > { %v4311_v9 = vadd.f32 %v4310_v7, %v4298_v23 }
 0x79b   : > { %v4324_v28 = vadd.f32 %v4323_v11, %v4311_v9 }
 0x79e   : > { %v4299_v25 = vpop.f32.mrf.mxu3  ;;  %v4336_v12 = vpop.f32.mrf.mxu2 }
 0x79f   : > { %v4337_v32 = vadd.f32 %v4336_v12, %v4324_v28 }
 0x7a6   : > { %v4349_v30 = vpop.f32.mrf.mxu3  ;;  %v4338_v31 = vpop.f32.mrf.mxu2 }
 0x7a7   : > { %v4350_v55 = vadd.f32 %v4349_v30, %v4337_v32 }
 0x7a9   : > { %v4354_v57 = vadd.f32 %v4350_v55, %v7802_v52 }
 0x7ab   : > { %v4357_v38 = vadd.f32 %v4354_v57, %v4353_v33 }
 0x7ad   : > { %4358 = vadd.xlane.f32.xlu1 %v4357_v38 }
 0x7ae   : > { %v4351_v6 = vpop.f32.mrf.mxu3 }
 0x820   : > { %v4359_v5 = vpop.xlane.xlu1 %4358 }
 0x821   : > { %v4360_v39 = vmul.f32 %v4359_v5, %v7784_v24 }
 0x823   : > { %v4361_v41 = vsub.f32 %v4353_v33, %v4360_v39  ;;  %v4362_v42 = vsub.f32 %v4354_v57, %v4360_v39 }
 0x825   : > { %v4363_v43 = vmul.f32 %v4361_v41, %v4361_v41  ;;  %v4364_v0 = vmul.f32 %v4362_v42, %v4362_v42 }
 0x827   : > { %v4365_v44 = vadd.f32 %v4364_v0, %v4363_v43 }
 0x829   : > { %4366 = vadd.xlane.f32.xlu2 %v4365_v44 }
 0x89c   : > { %v4367_v34 = vpop.xlane.xlu2 %4366 }
 0x89d   : > { %v4368_v2 = vmul.f32 %v4367_v34, %v7784_v24 }
 0x89f   : > { %v4369_v47 = vadd.f32 1e-05, %v4368_v2 }
 0x8a1   : > { %6797 = vrsqrt.f32 %v4369_v47  ;;  %vm4376_vm10 = vweird.f32 %v4369_v47 }
 0x8a7   : > { %v6798_v51 = vpop.eup %6797 }
 0x8a8   : > { %v4371_v52 = vmul.f32 %v6798_v51, %v4369_v47  ;;  %vm4377_vm9 = vweird.f32 %v6798_v51 }
 0x8a9   : > { %vm4378_vm11 = vmor %vm4376_vm10, %vm4377_vm9 }
 0x8aa   : > { %v4372_v48 = vmul.f32 %v6798_v51, %v4371_v52 }
 0x8ac   : > { %v4373_v53 = vmul.f32 0.5, %v4372_v48 }
 0x8ae   : > { %v4374_v35 = vsub.f32 1.5, %v4373_v53 }
 0x8b0   : > { %v4375_v40 = vmul.f32 %v6798_v51, %v4374_v35 }
 0x8b2   : > { %v4379_v24 = vsel %vm4378_vm11, %v6798_v51, %v4375_v40 }
 0x8b3   : > { %v4385_v49 = vmul.f32 %v4381_v54, %v4379_v24  ;;  %v4386_v58 = vmul.f32 %v4382_v56, %v4379_v24 }
 0x8b5   : > { %v4387_v60 = vmul.f32 %v4385_v49, %v4361_v41  ;;  %v4388_v37 = vmul.f32 %v4386_v58, %v4362_v42 }
 0x8b7   : > { %v4394_v61 = vadd.f32 %v4390_v46, %v4387_v60  ;;  %v4395_v62 = vadd.f32 %v4391_v59, %v4388_v37 }
 0x8b9   : > { %4396 = vst [vmem:[%s804_s21] sm:$0xff] %v4394_v61 }
 0x8ba   : > { %4397 = vst [vmem:[%s804_s21 + $0x8] sm:$0xff] %v4395_v62 }
 0x8bb   : > { %7218 = shalt.err (!%p7215_p10)
}
 0x8bc   : > { %6639 = dma.vmem_to_hbm [thread:$0]  (%p7536_p0), %s4413_s10, 256, %s4415_s15, %s4399_s9  }
 0x8bd PF: > { %s4426_s12 = sand.u32 1, %s7273_s27   ;;  %p7979_p12 = scmp.ge.s32.totalorder %s7285_s30, 2 }
 0x8be   : > { %s4427_s4 = scalar_lea.sflag [#allocation4], %s4426_s12 }
 0x8bf   : > { %p6683_p5 = pnand %p7979_p12, %p7542_p6 }
 0x8c1   : > { %p6684_p11 = pneg %p6683_p5 }
 0x8c3   : > { %7268 = dma.done.wait (%p6684_p11), %s4427_s4, 256  }
 0x8c4   : > { %7270 = vsyncadd (%p6684_p11), %s4427_s4, 4294967040  ;;  %s7980_s16 = sld [smem:[#allocation33_spill]]  ;;  %p39_p2 = scmp.ge.s32.totalorder %s7512_s1, 4  }
 0x8c5   : > { %s7981_s29 = sld [smem:[#allocation34_spill]]  ;;  %s7982_s27 = smov %s7277_s28 }
 0x8c6   : > { %s7984_s30 = smov %s7512_s1  ;;  %41 = sbr.rel (!%p39_p2) target bundleno = 30 (0x1e), region = 194 }
 0x8ca   : > { %s7983_s28 = smov %s7980_s16 }
 0x8cb   :  { %4433 = vsyncpa [#allocation3], 1 }
 0x8cc   :  { %4435 = vsyncpa [#allocation3 + $0x1], 1 }
 0x8cd   :  { %4436 = vsyncpa [#allocation6], 1 }
 0x8ce   :  { %4438 = vsyncpa [#allocation6 + $0x1], 1 }
 0x8cf   :  { %4439 = vsyncpa [#allocation9], 1 }
 0x8d0   :  { %4440 = vsyncpa [#allocation12], 1 }
 0x8d1   :  { %4441 = vsyncpa [#allocation15], 1 }
 0x8d2   :  { %4442 = vsyncpa [#allocation18], 1 }
 0x8d3   :  { %4443 = vsyncpa [#allocation21], 1 }
 0x8d4   :  { %4444 = vsyncpa [#allocation4], 1 }
 0x8d5   :  { %4446 = vsyncpa [#allocation4 + $0x1], 1 }

</bundles_post_ra>
